<compile_context>
chip_gen: v6e
topology: v6e:2x2x1
jax: 0.10.0
libtpu: 0.0.40
codegen_flags: <defaults>
</compile_context>

<pallas_src>
import functools

import jax
import jax.numpy as jnp
from jax import lax
from jax.experimental import pallas as pl
from jax.experimental.pallas import tpu as pltpu

EPS = 1e-5                      # nn.BatchNorm2d default eps
MXU_DTYPE = jnp.bfloat16        # matmul-operand / t3-storage dtype (f32 accum)


def _vmem_limit_bytes():
    """Generation-aware scoped-VMEM ceiling: ~48 MiB (v7x), ~96 MiB (v5e/v6e)."""
    cap = 64 * 1024 * 1024
    try:
        cap = int(getattr(pltpu.get_tpu_info(), "vmem_capacity_bytes", cap))
    except Exception:
        pass
    return min((cap * 3) // 4, 96 * 1024 * 1024)


# ---------------------------------------------------------------------------
# pass 1: per-channel sum / sum-of-squares of x (one-pass BN statistics)
# ---------------------------------------------------------------------------
def _stats_kernel(x_ref, stats_ref):
    r, w, c = x_ref.shape
    x = x_ref[...].astype(jnp.float32).reshape(r * w, c)
    s = jnp.sum(x, axis=0, keepdims=True)
    ss = jnp.sum(x * x, axis=0, keepdims=True)
    stats_ref[0] = jnp.concatenate([s, ss], axis=0)            # (2, C)


# ---------------------------------------------------------------------------
# pass 2: folded BN1 + ReLU + 1x1 conv (MXU) + partial stats of t3
# ---------------------------------------------------------------------------
def _bn_relu_conv1x1_kernel(x_ref, bn1_ref, w1_ref, c1b_ref, t3_ref, stats_ref):
    r, w, cin = x_ref.shape
    cout = w1_ref.shape[1]
    x = x_ref[...].astype(jnp.float32).reshape(r * w, cin)
    # BN folded to a single per-channel multiply-add, ReLU fused.
    t2 = jnp.maximum(x * bn1_ref[0:1, :] + bn1_ref[1:2, :], 0.0)
    t3 = jnp.dot(t2.astype(w1_ref.dtype), w1_ref[...],
                 preferred_element_type=jnp.float32) + c1b_ref[...]
    # BN2 statistics on the f32 value *before* the bf16 cast that goes to HBM.
    s = jnp.sum(t3, axis=0, keepdims=True)
    ss = jnp.sum(t3 * t3, axis=0, keepdims=True)
    stats_ref[0] = jnp.concatenate([s, ss], axis=0)            # (2, Cout)
    t3_ref[...] = t3.reshape(r, w, cout).astype(t3_ref.dtype)  # bf16 store


# ---------------------------------------------------------------------------
# pass 3: folded BN2 + ReLU + 3x3 conv (padding=1) + residual + output stats
#         (one (image, row-band) tile per grid step; halo rows come in as two
#          tiny side inputs already in post-BN2-ReLU space, zero at image edge)
# ---------------------------------------------------------------------------
def _bn_relu_conv3x3_residual_kernel(t3_ref, x_ref, top_ref, bot_ref, bn2_ref,
                                     w2_ref, c2b_ref, out_ref, stat_ref,
                                     *, split_k):
    _, th, ww, cout = t3_ref.shape
    cin = c2b_ref.shape[1]
    hw = th * ww

    scale2 = bn2_ref[0:1, :].reshape(1, 1, cout)
    shift2 = bn2_ref[1:2, :].reshape(1, 1, cout)
    t5c = jnp.maximum(t3_ref[0].astype(jnp.float32) * scale2 + shift2, 0.0)
    top = top_ref[0]            # (1, W, Cout) f32, post-BN2+ReLU, zero at edges
    bot = bot_ref[0]

    # column-validity masks as (H*W, 1) booleans (broadcast across lanes)
    w_idx = lax.broadcasted_iota(jnp.int32, (hw, 1), 0) % ww
    not_first_col = w_idx >= 1
    not_last_col = w_idx < (ww - 1)

    def taps_for(oy):
        # vertical tap = static leading-axis slice of the haloed band (no roll)
        if oy < 0:
            band = jnp.concatenate([top, t5c[:-1]], axis=0)
        elif oy > 0:
            band = jnp.concatenate([t5c[1:], bot], axis=0)
        else:
            band = t5c
        base = band.reshape(hw, cout)                          # f32
        cols = []
        for ox in (-1, 0, 1):
            if ox == 0:
                tap = base
            else:
                tap = pltpu.roll(base, (-ox) % hw, 0)          # column shift
                tap = jnp.where(not_first_col if ox < 0 else not_last_col,
                                tap, 0.0)                      # scalar zero
            cols.append(tap.astype(MXU_DTYPE))                 # bf16 taps
        return jnp.concatenate(cols, axis=-1)                  # (H*W, 3*Cout)

    if split_k:
        # large Cout: 3 accumulating matmuls (K=3*Cout) keep the im2col small
        conv = jnp.zeros((hw, cin), jnp.float32)
        for gi, oy in enumerate((-1, 0, 1)):
            k0 = gi * 3 * cout
            conv = conv + jnp.dot(taps_for(oy), w2_ref[k0:k0 + 3 * cout, :],
                                  preferred_element_type=jnp.float32)
    else:
        # small Cout: one deep-K matmul (H*W, 9*Cout) x (9*Cout, Cin)
        patches = jnp.concatenate([taps_for(-1), taps_for(0), taps_for(1)],
                                  axis=-1)
        conv = jnp.dot(patches, w2_ref[...], preferred_element_type=jnp.float32)

    out = x_ref[0].astype(jnp.float32).reshape(hw, cin) + conv + c2b_ref[...]
    out_ref[0] = out.reshape(th, ww, cin).astype(out_ref.dtype)

    # fused per-channel stats of the output (next block's BN1 statistics)
    s = jnp.sum(out, axis=0, keepdims=True)
    ss = jnp.sum(out * out, axis=0, keepdims=True)
    stat_ref[0, 0] = jnp.concatenate([s, ss], axis=0)          # (2, Cin)


# ---------------------------------------------------------------------------
# tiling heuristics & BN folding
# ---------------------------------------------------------------------------
def _fold_bn(stats, count, gamma, beta):
    """stats = (2, C) [sum, sum_sq] -> (2, C) [scale, shift] (folded BN)."""
    mean = stats[0:1, :] / count
    var = jnp.maximum(stats[1:2, :] / count - mean * mean, 0.0)  # biased var
    scale = gamma * lax.rsqrt(var + EPS)
    shift = beta - mean * scale
    return jnp.concatenate([scale, shift], axis=0).astype(jnp.float32)


def _auto_row_tile(nh, w, c, budget_bytes):
    """Largest divisor of N*H whose (rows, W, C) f32 tile fits the budget."""
    target = max(1, budget_bytes // max(1, w * c * 4))
    best = 1
    for t in range(1, nh + 1):
        if nh % t == 0 and t <= target:
            best = t
    return best


def _auto_tile_h(h, w, cin, cout, budget_bytes, full_k):
    """Largest divisor of H whose pass-3 band working set fits the budget."""
    kwidth = (9 if full_k else 3) * cout
    per_row = w * (2 * 2 * cout          # double-buffered bf16 t3 band
                   + 2 * 2 * 4 * cin     # double-buffered f32 x + out bands
                   + 4 * cout            # f32 t5 center band
                   + 2 * 2 * kwidth      # bf16 taps + concat copy
                   + 3 * 4 * cin)        # f32 conv acc / residual / out value
    target = max(1, budget_bytes // max(1, per_row))
    best = 1
    for t in range(1, h + 1):
        if h % t == 0 and t <= target:
            best = t
    return best


# ---------------------------------------------------------------------------
# wrapper
# ---------------------------------------------------------------------------
def residual_block_nhwc(x, params, *, row_tile=None, tile_h=None, split_k3=None,
                        x_stats=None, return_out_stats=False):
    """YOLOv3 ResidualBlock forward.  x: (N, H, W, Cin) NHWC float32.

    x_stats: optional (2, Cin) [sum, sum_sq] of x (from the producing block's
      fused output stats) — skips pass 1.  With return_out_stats=True also
      returns the (2, Cin) stats of the output for chaining the next block.
    """
    N, H, W, Cin = x.shape
    w1 = params["w1"].astype(MXU_DTYPE)                         # (Cin, Cout)
    Cout = w1.shape[1]
    w2 = params["w2"].reshape(9 * Cout, Cin).astype(MXU_DTYPE)  # (9*Cout, Cin)
    c1b = params["c1b"].astype(jnp.float32)                     # (1, Cout)
    c2b = params["c2b"].astype(jnp.float32)                     # (1, Cin)

    vmem_limit = _vmem_limit_bytes()
    NH = N * H
    if row_tile is None:
        row_tile = _auto_row_tile(NH, W, max(Cin, Cout),
                                  min(8 << 20, vmem_limit // 6))
    assert NH % row_tile == 0, (NH, row_tile)
    g = NH // row_tile

    if split_k3 is None:
        split_k3 = (9 * Cout > 256)
    if tile_h is None:
        tile_h = _auto_tile_h(H, W, Cin, Cout, vmem_limit // 2,
                              full_k=not split_k3)
    assert H % tile_h == 0, (H, tile_h)
    nb = H // tile_h

    count = float(NH * W)                                       # elems/channel
    x_rows = x.reshape(NH, W, Cin)

    cp12 = pltpu.CompilerParams(dimension_semantics=("parallel",),
                                vmem_limit_bytes=vmem_limit)

    # ---- pass 1: x statistics (skipped when supplied by the producer) ------
    if x_stats is None:
        x_stats_tiles = pl.pallas_call(
            _stats_kernel,
            out_shape=jax.ShapeDtypeStruct((g, 2, Cin), jnp.float32),
            grid=(g,),
            in_specs=[pl.BlockSpec((row_tile, W, Cin), lambda i: (i, 0, 0))],
            out_specs=pl.BlockSpec((1, 2, Cin), lambda i: (i, 0, 0)),
            compiler_params=cp12,
            cost_estimate=pl.CostEstimate(
                flops=int(3 * NH * W * Cin), transcendentals=0,
                bytes_accessed=int(x_rows.size * 4 + g * 2 * Cin * 4)),
        )(x_rows)
        x_stats = jnp.sum(x_stats_tiles, axis=0)
    bn1 = _fold_bn(x_stats, count, params["g1"], params["b1"])

    # ---- pass 2: BN1 + ReLU + 1x1 conv + t3 statistics (t3 stored bf16) -----
    t3_rows, t3_stats = pl.pallas_call(
        _bn_relu_conv1x1_kernel,
        out_shape=(jax.ShapeDtypeStruct((NH, W, Cout), MXU_DTYPE),
                   jax.ShapeDtypeStruct((g, 2, Cout), jnp.float32)),
        grid=(g,),
        in_specs=[
            pl.BlockSpec((row_tile, W, Cin), lambda i: (i, 0, 0)),
            pl.BlockSpec((2, Cin), lambda i: (0, 0)),
            pl.BlockSpec((Cin, Cout), lambda i: (0, 0)),
            pl.BlockSpec((1, Cout), lambda i: (0, 0)),
        ],
        out_specs=(pl.BlockSpec((row_tile, W, Cout), lambda i: (i, 0, 0)),
                   pl.BlockSpec((1, 2, Cout), lambda i: (i, 0, 0))),
        compiler_params=cp12,
        cost_estimate=pl.CostEstimate(
            flops=int(2 * NH * W * Cin * Cout), transcendentals=0,
            bytes_accessed=int(x_rows.size * 4 + NH * W * Cout * 2
                               + w1.size * 2)),
    )(x_rows, bn1, w1, c1b)
    bn2 = _fold_bn(jnp.sum(t3_stats, axis=0), count, params["g2"], params["b2"])

    # ---- halo rows for pass 3 (tiny, already in post-BN2+ReLU space; zero at
    #      the image top/bottom so padding=1 semantics fall out structurally) -
    t3_bands = t3_rows.reshape(N, nb, tile_h, W, Cout)
    scale2 = bn2[0].reshape(1, 1, 1, Cout)
    shift2 = bn2[1].reshape(1, 1, 1, Cout)
    last_t5 = jnp.maximum(t3_bands[:, :, -1].astype(jnp.float32) * scale2
                          + shift2, 0.0)                        # (N, nb, W, Cout)
    first_t5 = jnp.maximum(t3_bands[:, :, 0].astype(jnp.float32) * scale2
                           + shift2, 0.0)
    zrow = jnp.zeros((N, 1, W, Cout), jnp.float32)
    top_halo = jnp.concatenate([zrow, last_t5[:, :-1]], axis=1)  # row r0-1
    bot_halo = jnp.concatenate([first_t5[:, 1:], zrow], axis=1)  # row r0+tile_h

    # ---- pass 3: BN2 + ReLU + 3x3 conv + residual + output stats ------------
    t3_img = t3_rows.reshape(N, H, W, Cout)
    cp3 = pltpu.CompilerParams(dimension_semantics=("parallel", "parallel"),
                               vmem_limit_bytes=vmem_limit)
    kernel3 = functools.partial(_bn_relu_conv3x3_residual_kernel,
                                split_k=bool(split_k3))
    out, out_stats_tiles = pl.pallas_call(
        kernel3,
        out_shape=(jax.ShapeDtypeStruct((N, H, W, Cin), x.dtype),
                   jax.ShapeDtypeStruct((N, nb, 2, Cin), jnp.float32)),
        grid=(N, nb),
        in_specs=[
            pl.BlockSpec((1, tile_h, W, Cout), lambda n, b: (n, b, 0, 0)),
            pl.BlockSpec((1, tile_h, W, Cin), lambda n, b: (n, b, 0, 0)),
            pl.BlockSpec((1, 1, W, Cout), lambda n, b: (n, b, 0, 0)),
            pl.BlockSpec((1, 1, W, Cout), lambda n, b: (n, b, 0, 0)),
            pl.BlockSpec((2, Cout), lambda n, b: (0, 0)),
            pl.BlockSpec((9 * Cout, Cin), lambda n, b: (0, 0)),
            pl.BlockSpec((1, Cin), lambda n, b: (0, 0)),
        ],
        out_specs=(pl.BlockSpec((1, tile_h, W, Cin), lambda n, b: (n, b, 0, 0)),
                   pl.BlockSpec((1, 1, 2, Cin), lambda n, b: (n, b, 0, 0))),
        compiler_params=cp3,
        cost_estimate=pl.CostEstimate(
            flops=int(2 * N * H * W * 9 * Cout * Cin), transcendentals=0,
            bytes_accessed=int(N * H * W * (Cout * 2 + 2 * Cin * 4)
                               + w2.size * 2)),
    )(t3_img, x, top_halo, bot_halo, bn2, w2, c2b)

    if return_out_stats:
        return out, jnp.sum(out_stats_tiles, axis=(0, 1))       # (2, Cin)
    return out


# ---------------------------------------------------------------------------
# parameters & pure-JAX reference
# ---------------------------------------------------------------------------
def make_params(key, in_channels, out_channels):
    """Parameters in kernel-friendly layouts.

    PyTorch correspondence:
      conv_1.weight (Cout,Cin,1,1) -> w1 = weight[:, :, 0, 0].T       (Cin, Cout)
      conv_1.bias   (Cout,)        -> c1b                             (1, Cout)
      conv_2.weight (Cin,Cout,3,3) -> w2 = weight.transpose(2,3,1,0)
                                            .reshape(9, Cout, Cin)    (9, Cout, Cin)
      conv_2.bias   (Cin,)         -> c2b                             (1, Cin)
      batchnorm_i: default init gamma=1, beta=0                       (1, C)
    """
    k1, k2, k3, k4 = jax.random.split(key, 4)
    w1 = 0.1 * jax.random.normal(k1, (in_channels, out_channels), jnp.float32)
    c1b = 0.1 * jax.random.normal(k2, (1, out_channels), jnp.float32)
    w2 = 0.1 * jax.random.normal(k3, (9, out_channels, in_channels), jnp.float32)
    c2b = 0.1 * jax.random.normal(k4, (1, in_channels), jnp.float32)
    return {
        "g1": jnp.ones((1, in_channels), jnp.float32),
        "b1": jnp.zeros((1, in_channels), jnp.float32),
        "w1": w1, "c1b": c1b,
        "g2": jnp.ones((1, out_channels), jnp.float32),
        "b2": jnp.zeros((1, out_channels), jnp.float32),
        "w2": w2, "c2b": c2b,
    }


def reference_nhwc(x, params):
    """Pure-JAX f32 reference mirroring the PyTorch module (NHWC layout)."""
    x = x.astype(jnp.float32)
    Cin = x.shape[-1]
    Cout = params["w1"].shape[1]

    def bn(v, g, b):
        m = jnp.mean(v, axis=(0, 1, 2), keepdims=True)
        var = jnp.mean((v - m) ** 2, axis=(0, 1, 2), keepdims=True)
        return ((v - m) * lax.rsqrt(var + EPS) * g.reshape(1, 1, 1, -1)
                + b.reshape(1, 1, 1, -1))

    t2 = jnp.maximum(bn(x, params["g1"], params["b1"]), 0.0)
    k1 = params["w1"].reshape(1, 1, Cin, Cout)                        # HWIO
    t3 = lax.conv_general_dilated(t2, k1, (1, 1), "VALID",
                                  dimension_numbers=("NHWC", "HWIO", "NHWC"))
    t3 = t3 + params["c1b"].reshape(1, 1, 1, Cout)
    t5 = jnp.maximum(bn(t3, params["g2"], params["b2"]), 0.0)
    k2 = params["w2"].reshape(3, 3, Cout, Cin)                        # HWIO
    t6 = lax.conv_general_dilated(t5, k2, (1, 1), ((1, 1), (1, 1)),
                                  dimension_numbers=("NHWC", "HWIO", "NHWC"))
    t6 = t6 + params["c2b"].reshape(1, 1, 1, Cin)
    return x + t6


if __name__ == "__main__":
    key = jax.random.PRNGKey(0)
    kx, kp = jax.random.split(key)

    N, Cin, Cout, H, W = 2, 4, 8, 16, 16
    # NHWC at the model boundary; a PyTorch NCHW input of shape (2, 4, 16, 16)
    # corresponds to a single jnp.transpose(x, (0, 2, 3, 1)) here.
    x = jax.random.normal(kx, (N, H, W, Cin), jnp.float32)
    params = make_params(kp, Cin, Cout)

    ref = jax.block_until_ready(reference_nhwc(x, params))

    fwd = jax.jit(residual_block_nhwc,
                  static_argnames=("row_tile", "tile_h", "split_k3",
                                   "return_out_stats"))

    # 1) default auto tiling (single band / single row tile at this toy size)
    out1 = jax.block_until_ready(fwd(x, params))
    assert out1.shape == (N, H, W, Cin)
    # bf16 MXU operands + bf16 t3 storage (f32 accumulation) -> bf16 tolerance.
    assert jnp.allclose(out1, ref, rtol=5e-2, atol=5e-2), \
        float(jnp.max(jnp.abs(out1 - ref)))

    # 2) multi-band halo path + split-K 3x3 + producer-supplied x stats +
    #    fused output stats (what a chained next block would consume).
    x_stats = jnp.stack([jnp.sum(x, axis=(0, 1, 2)),
                         jnp.sum(x * x, axis=(0, 1, 2))], axis=0)
    out2, out_stats = fwd(x, params, row_tile=8, tile_h=8, split_k3=True,
                          x_stats=x_stats, return_out_stats=True)
    out2, out_stats = jax.block_until_ready((out2, out_stats))
    assert jnp.allclose(out2, ref, rtol=5e-2, atol=5e-2), \
        float(jnp.max(jnp.abs(out2 - ref)))
    assert jnp.allclose(out_stats[0], jnp.sum(out2, axis=(0, 1, 2)),
                        rtol=1e-4, atol=1e-2)
    assert jnp.allclose(out_stats[1], jnp.sum(out2 * out2, axis=(0, 1, 2)),
                        rtol=1e-4, atol=1e-2)

    print("KERNEL_OK")
</pallas_src>

<mosaic_0001>
module attributes {stable_mosaic.version = 11 : i64} {
  func.func @_stats_kernel(%arg0: i32, %arg1: memref<32x16x4xf32, #tpu.memory_space<vmem>>, %arg2: memref<1x2x4xf32, #tpu.memory_space<vmem>>) attributes {dimension_semantics = [#tpu.dimension_semantics<parallel>], iteration_bounds = array<i64: 1>, scalar_prefetch = 0 : i64, scratch_operands = 0 : i64, tpu.core_type = #tpu.core_type<tc>, window_params = [{transform_indices = @transform_0, window_bounds = array<i64: 32, 16, 4>}, {transform_indices = @transform_1, window_bounds = array<i64: 1, 2, 4>}]} {
    %c0 = arith.constant 0 : index
    %c0_0 = arith.constant 0 : index
    %c0_1 = arith.constant 0 : index
    %0 = vector.load %arg1[%c0, %c0_0, %c0_1] : memref<32x16x4xf32, #tpu.memory_space<vmem>>, vector<32x16x4xf32>
    %1 = vector.shape_cast %0 : vector<32x16x4xf32> to vector<512x4xf32>
    %cst = arith.constant dense<0.000000e+00> : vector<4xf32>
    %2 = vector.multi_reduction <add>, %1, %cst [0] : vector<512x4xf32> to vector<4xf32>
    %3 = vector.shape_cast %2 : vector<4xf32> to vector<1x4xf32>
    %4 = arith.mulf %1, %1 : vector<512x4xf32>
    %cst_2 = arith.constant dense<0.000000e+00> : vector<4xf32>
    %5 = vector.multi_reduction <add>, %4, %cst_2 [0] : vector<512x4xf32> to vector<4xf32>
    %6 = vector.shape_cast %5 : vector<4xf32> to vector<1x4xf32>
    %7 = tpu.concatenate %3, %6 in 0 : vector<1x4xf32>, vector<1x4xf32> -> vector<2x4xf32>
    %c0_3 = arith.constant 0 : index
    %c0_4 = arith.constant 0 : index
    %c0_5 = arith.constant 0 : index
    %8 = vector.load %arg2[%c0_3, %c0_4, %c0_5] : memref<1x2x4xf32, #tpu.memory_space<vmem>>, vector<1x2x4xf32>
    %9 = vector.shape_cast %8 : vector<1x2x4xf32> to vector<2x4xf32>
    %10 = vector.shape_cast %7 : vector<2x4xf32> to vector<1x2x4xf32>
    tpu.vector_store %arg2[%c0_3, %c0_4, %c0_5], %10 {strides = array<i32>} : memref<1x2x4xf32, #tpu.memory_space<vmem>>, vector<1x2x4xf32>,
    return
  }
  func.func @transform_0(%arg0: i32) -> (i32, i32, i32) {
    %c0_i32 = arith.constant 0 : i32
    %c0_i32_0 = arith.constant 0 : i32
    %c0_i32_1 = arith.constant 0 : i32
    return %arg0, %c0_i32, %c0_i32_0 : i32, i32, i32
  }
  func.func @transform_1(%arg0: i32) -> (i32, i32, i32) {
    %c0_i32 = arith.constant 0 : i32
    %c0_i32_0 = arith.constant 0 : i32
    %c0_i32_1 = arith.constant 0 : i32
    return %arg0, %c0_i32, %c0_i32_0 : i32, i32, i32
  }
}

module attributes {stable_mosaic.version = 11 : i64} {
  func.func @_bn_relu_conv1x1_kernel(%arg0: i32, %arg1: memref<32x16x4xf32, #tpu.memory_space<vmem>>, %arg2: memref<2x4xf32, #tpu.memory_space<vmem>>, %arg3: memref<4x8xbf16, #tpu.memory_space<vmem>>, %arg4: memref<1x8xf32, #tpu.memory_space<vmem>>, %arg5: memref<32x16x8xbf16, #tpu.memory_space<vmem>>, %arg6: memref<1x2x8xf32, #tpu.memory_space<vmem>>) attributes {dimension_semantics = [#tpu.dimension_semantics<parallel>], iteration_bounds = array<i64: 1>, scalar_prefetch = 0 : i64, scratch_operands = 0 : i64, tpu.core_type = #tpu.core_type<tc>, window_params = [{transform_indices = @transform_0, window_bounds = array<i64: 32, 16, 4>}, {pipeline_mode = #tpu.pipeline_mode<synchronous>, transform_indices = @transform_1, window_bounds = array<i64: 2, 4>}, {pipeline_mode = #tpu.pipeline_mode<synchronous>, transform_indices = @transform_2, window_bounds = array<i64: 4, 8>}, {pipeline_mode = #tpu.pipeline_mode<synchronous>, transform_indices = @transform_3, window_bounds = array<i64: 1, 8>}, {transform_indices = @transform_4, window_bounds = array<i64: 32, 16, 8>}, {transform_indices = @transform_5, window_bounds = array<i64: 1, 2, 8>}]} {
    %c0 = arith.constant 0 : index
    %c0_0 = arith.constant 0 : index
    %c0_1 = arith.constant 0 : index
    %0 = vector.load %arg1[%c0, %c0_0, %c0_1] : memref<32x16x4xf32, #tpu.memory_space<vmem>>, vector<32x16x4xf32>
    %1 = vector.shape_cast %0 : vector<32x16x4xf32> to vector<512x4xf32>
    %c0_2 = arith.constant 0 : index
    %c0_3 = arith.constant 0 : index
    %2 = vector.load %arg2[%c0_2, %c0_3] : memref<2x4xf32, #tpu.memory_space<vmem>>, vector<1x4xf32>
    %3 = vector.broadcast %2 : vector<1x4xf32> to vector<512x4xf32>
    %4 = arith.mulf %1, %3 : vector<512x4xf32>
    %c1 = arith.constant 1 : index
    %c0_4 = arith.constant 0 : index
    %5 = vector.load %arg2[%c1, %c0_4] : memref<2x4xf32, #tpu.memory_space<vmem>>, vector<1x4xf32>
    %6 = vector.broadcast %5 : vector<1x4xf32> to vector<512x4xf32>
    %7 = arith.addf %4, %6 : vector<512x4xf32>
    %cst = arith.constant 0.000000e+00 : f32
    %8 = vector.broadcast %cst : f32 to vector<512x4xf32>
    %9 = arith.maximumf %7, %8 : vector<512x4xf32>
    %10 = arith.truncf %9 : vector<512x4xf32> to vector<512x4xbf16>
    %c0_5 = arith.constant 0 : index
    %c0_6 = arith.constant 0 : index
    %11 = vector.load %arg3[%c0_5, %c0_6] : memref<4x8xbf16, #tpu.memory_space<vmem>>, vector<4x8xbf16>
    %cst_7 = arith.constant dense<0.000000e+00> : vector<512x8xf32>
    %12 = tpu.matmul %10, %11, %cst_7 {dimension_numbers = #tpu.dot_dimension_numbers<[1], [0], [0], [1], [0, 0, 1, 1], [], []>} : vector<512x4xbf16>, vector<4x8xbf16>, vector<512x8xf32> -> vector<512x8xf32>
    %c0_8 = arith.constant 0 : index
    %c0_9 = arith.constant 0 : index
    %13 = vector.load %arg4[%c0_8, %c0_9] : memref<1x8xf32, #tpu.memory_space<vmem>>, vector<1x8xf32>
    %14 = vector.broadcast %13 : vector<1x8xf32> to vector<512x8xf32>
    %15 = arith.addf %12, %14 : vector<512x8xf32>
    %cst_10 = arith.constant dense<0.000000e+00> : vector<8xf32>
    %16 = vector.multi_reduction <add>, %15, %cst_10 [0] : vector<512x8xf32> to vector<8xf32>
    %17 = vector.shape_cast %16 : vector<8xf32> to vector<1x8xf32>
    %18 = arith.mulf %15, %15 : vector<512x8xf32>
    %cst_11 = arith.constant dense<0.000000e+00> : vector<8xf32>
    %19 = vector.multi_reduction <add>, %18, %cst_11 [0] : vector<512x8xf32> to vector<8xf32>
    %20 = vector.shape_cast %19 : vector<8xf32> to vector<1x8xf32>
    %21 = tpu.concatenate %17, %20 in 0 : vector<1x8xf32>, vector<1x8xf32> -> vector<2x8xf32>
    %c0_12 = arith.constant 0 : index
    %c0_13 = arith.constant 0 : index
    %c0_14 = arith.constant 0 : index
    %22 = vector.load %arg6[%c0_12, %c0_13, %c0_14] : memref<1x2x8xf32, #tpu.memory_space<vmem>>, vector<1x2x8xf32>
    %23 = vector.shape_cast %22 : vector<1x2x8xf32> to vector<2x8xf32>
    %24 = vector.shape_cast %21 : vector<2x8xf32> to vector<1x2x8xf32>
    tpu.vector_store %arg6[%c0_12, %c0_13, %c0_14], %24 {strides = array<i32>} : memref<1x2x8xf32, #tpu.memory_space<vmem>>, vector<1x2x8xf32>,
    %25 = vector.shape_cast %15 : vector<512x8xf32> to vector<32x16x8xf32>
    %26 = arith.truncf %25 : vector<32x16x8xf32> to vector<32x16x8xbf16>
    %c0_15 = arith.constant 0 : index
    %c0_16 = arith.constant 0 : index
    %c0_17 = arith.constant 0 : index
    %27 = vector.load %arg5[%c0_15, %c0_16, %c0_17] : memref<32x16x8xbf16, #tpu.memory_space<vmem>>, vector<32x16x8xbf16>
    tpu.vector_store %arg5[%c0_15, %c0_16, %c0_17], %26 {strides = array<i32>} : memref<32x16x8xbf16, #tpu.memory_space<vmem>>, vector<32x16x8xbf16>,
    return
  }
  func.func @transform_0(%arg0: i32) -> (i32, i32, i32) {
    %c0_i32 = arith.constant 0 : i32
    %c0_i32_0 = arith.constant 0 : i32
    %c0_i32_1 = arith.constant 0 : i32
    return %arg0, %c0_i32, %c0_i32_0 : i32, i32, i32
  }
  func.func @transform_1(%arg0: i32) -> (i32, i32) {
    %c0_i32 = arith.constant 0 : i32
    %c0_i32_0 = arith.constant 0 : i32
    %c0_i32_1 = arith.constant 0 : i32
    return %c0_i32, %c0_i32_0 : i32, i32
  }
  func.func @transform_2(%arg0: i32) -> (i32, i32) {
    %c0_i32 = arith.constant 0 : i32
    %c0_i32_0 = arith.constant 0 : i32
    %c0_i32_1 = arith.constant 0 : i32
    return %c0_i32, %c0_i32_0 : i32, i32
  }
  func.func @transform_3(%arg0: i32) -> (i32, i32) {
    %c0_i32 = arith.constant 0 : i32
    %c0_i32_0 = arith.constant 0 : i32
    %c0_i32_1 = arith.constant 0 : i32
    return %c0_i32, %c0_i32_0 : i32, i32
  }
  func.func @transform_4(%arg0: i32) -> (i32, i32, i32) {
    %c0_i32 = arith.constant 0 : i32
    %c0_i32_0 = arith.constant 0 : i32
    %c0_i32_1 = arith.constant 0 : i32
    return %arg0, %c0_i32, %c0_i32_0 : i32, i32, i32
  }
  func.func @transform_5(%arg0: i32) -> (i32, i32, i32) {
    %c0_i32 = arith.constant 0 : i32
    %c0_i32_0 = arith.constant 0 : i32
    %c0_i32_1 = arith.constant 0 : i32
    return %arg0, %c0_i32, %c0_i32_0 : i32, i32, i32
  }
}

module attributes {stable_mosaic.version = 11 : i64} {
  func.func @_bn_relu_conv3x3_residual_kernel(%arg0: i32, %arg1: i32, %arg2: memref<1x16x16x8xbf16, #tpu.memory_space<vmem>>, %arg3: memref<1x16x16x4xf32, #tpu.memory_space<vmem>>, %arg4: memref<1x1x16x8xf32, #tpu.memory_space<vmem>>, %arg5: memref<1x1x16x8xf32, #tpu.memory_space<vmem>>, %arg6: memref<2x8xf32, #tpu.memory_space<vmem>>, %arg7: memref<72x4xbf16, #tpu.memory_space<vmem>>, %arg8: memref<1x4xf32, #tpu.memory_space<vmem>>, %arg9: memref<1x16x16x4xf32, #tpu.memory_space<vmem>>, %arg10: memref<1x1x2x4xf32, #tpu.memory_space<vmem>>) attributes {dimension_semantics = [#tpu.dimension_semantics<parallel>, #tpu.dimension_semantics<parallel>], iteration_bounds = array<i64: 2, 1>, scalar_prefetch = 0 : i64, scratch_operands = 0 : i64, tpu.core_type = #tpu.core_type<tc>, window_params = [{transform_indices = @transform_0, window_bounds = array<i64: 1, 16, 16, 8>}, {transform_indices = @transform_1, window_bounds = array<i64: 1, 16, 16, 4>}, {transform_indices = @transform_2, window_bounds = array<i64: 1, 1, 16, 8>}, {transform_indices = @transform_3, window_bounds = array<i64: 1, 1, 16, 8>}, {pipeline_mode = #tpu.pipeline_mode<synchronous>, transform_indices = @transform_4, window_bounds = array<i64: 2, 8>}, {pipeline_mode = #tpu.pipeline_mode<synchronous>, transform_indices = @transform_5, window_bounds = array<i64: 72, 4>}, {pipeline_mode = #tpu.pipeline_mode<synchronous>, transform_indices = @transform_6, window_bounds = array<i64: 1, 4>}, {transform_indices = @transform_7, window_bounds = array<i64: 1, 16, 16, 4>}, {transform_indices = @transform_8, window_bounds = array<i64: 1, 1, 2, 4>}]} {
    %c0 = arith.constant 0 : index
    %c0_0 = arith.constant 0 : index
    %0 = vector.load %arg6[%c0, %c0_0] : memref<2x8xf32, #tpu.memory_space<vmem>>, vector<1x8xf32>
    %1 = vector.shape_cast %0 : vector<1x8xf32> to vector<1x1x8xf32>
    %c1 = arith.constant 1 : index
    %c0_1 = arith.constant 0 : index
    %2 = vector.load %arg6[%c1, %c0_1] : memref<2x8xf32, #tpu.memory_space<vmem>>, vector<1x8xf32>
    %3 = vector.shape_cast %2 : vector<1x8xf32> to vector<1x1x8xf32>
    %c0_2 = arith.constant 0 : index
    %c0_3 = arith.constant 0 : index
    %c0_4 = arith.constant 0 : index
    %c0_5 = arith.constant 0 : index
    %4 = vector.load %arg2[%c0_2, %c0_3, %c0_4, %c0_5] : memref<1x16x16x8xbf16, #tpu.memory_space<vmem>>, vector<1x16x16x8xbf16>
    %5 = vector.shape_cast %4 : vector<1x16x16x8xbf16> to vector<16x16x8xbf16>
    %6 = arith.extf %5 : vector<16x16x8xbf16> to vector<16x16x8xf32>
    %7 = vector.broadcast %1 : vector<1x1x8xf32> to vector<16x16x8xf32>
    %8 = arith.mulf %6, %7 : vector<16x16x8xf32>
    %9 = vector.broadcast %3 : vector<1x1x8xf32> to vector<16x16x8xf32>
    %10 = arith.addf %8, %9 : vector<16x16x8xf32>
    %cst = arith.constant 0.000000e+00 : f32
    %11 = vector.broadcast %cst : f32 to vector<16x16x8xf32>
    %12 = arith.maximumf %10, %11 : vector<16x16x8xf32>
    %c0_6 = arith.constant 0 : index
    %c0_7 = arith.constant 0 : index
    %c0_8 = arith.constant 0 : index
    %c0_9 = arith.constant 0 : index
    %13 = vector.load %arg4[%c0_6, %c0_7, %c0_8, %c0_9] : memref<1x1x16x8xf32, #tpu.memory_space<vmem>>, vector<1x1x16x8xf32>
    %14 = vector.shape_cast %13 : vector<1x1x16x8xf32> to vector<1x16x8xf32>
    %c0_10 = arith.constant 0 : index
    %c0_11 = arith.constant 0 : index
    %c0_12 = arith.constant 0 : index
    %c0_13 = arith.constant 0 : index
    %15 = vector.load %arg5[%c0_10, %c0_11, %c0_12, %c0_13] : memref<1x1x16x8xf32, #tpu.memory_space<vmem>>, vector<1x1x16x8xf32>
    %16 = vector.shape_cast %15 : vector<1x1x16x8xf32> to vector<1x16x8xf32>
    %17 = tpu.iota {dimensions = array<i32: 0>} : vector<256x1xi32>
    %c16_i32 = arith.constant 16 : i32
    %c0_i32 = arith.constant 0 : i32
    %18 = arith.cmpi eq, %c16_i32, %c0_i32 : i32
    %c1_i32 = arith.constant 1 : i32
    %19 = arith.select %18, %c1_i32, %c16_i32 : i32
    %20 = vector.broadcast %19 : i32 to vector<256x1xi32>
    %21 = arith.remsi %17, %20 : vector<256x1xi32>
    %c0_i32_14 = arith.constant 0 : i32
    %22 = vector.broadcast %c0_i32_14 : i32 to vector<256x1xi32>
    %23 = arith.cmpi ne, %21, %22 : vector<256x1xi32>
    %c0_i32_15 = arith.constant 0 : i32
    %24 = vector.broadcast %c0_i32_15 : i32 to vector<256x1xi32>
    %25 = arith.cmpi slt, %21, %24 : vector<256x1xi32>
    %c0_i32_16 = arith.constant 0 : i32
    %26 = arith.cmpi slt, %19, %c0_i32_16 : i32
    %27 = vector.broadcast %26 : i1 to vector<256x1xi1>
    %28 = vector.broadcast %27 : vector<256x1xi1> to vector<256x1xi1>
    %29 = arith.xori %25, %28 : vector<256x1xi1>
    %30 = arith.andi %29, %23 : vector<256x1xi1>
    %31 = vector.broadcast %19 : i32 to vector<256x1xi32>
    %32 = arith.addi %21, %31 : vector<256x1xi32>
    %33 = arith.select %30, %32, %21 : vector<256x1xi1>, vector<256x1xi32>
    %c1_i32_17 = arith.constant 1 : i32
    %34 = vector.broadcast %c1_i32_17 : i32 to vector<256x1xi32>
    %35 = arith.cmpi sge, %33, %34 : vector<256x1xi32>
    %c15_i32 = arith.constant 15 : i32
    %36 = vector.broadcast %c15_i32 : i32 to vector<256x1xi32>
    %37 = arith.cmpi slt, %33, %36 : vector<256x1xi32>
    %38 = vector.extract_strided_slice %12 {offsets = [0, 0, 0], sizes = [15, 16, 8], strides = [1, 1, 1]} : vector<16x16x8xf32> to vector<15x16x8xf32>
    %39 = tpu.concatenate %14, %38 in 0 : vector<1x16x8xf32>, vector<15x16x8xf32> -> vector<16x16x8xf32>
    %40 = vector.shape_cast %39 : vector<16x16x8xf32> to vector<256x8xf32>
    %c1_i32_18 = arith.constant 1 : i32
    %41 = tpu.dynamic_rotate %40 by %c1_i32_18 dim 0 : vector<256x8xf32>, i32 -> vector<256x8xf32>
    %cst_19 = arith.constant 0.000000e+00 : f32
    %42 = vector.shape_cast %35 : vector<256x1xi1> to vector<256x1xi1>
    %43 = vector.broadcast %42 : vector<256x1xi1> to vector<256x8xi1>
    %44 = vector.broadcast %cst_19 : f32 to vector<256x8xf32>
    %45 = arith.select %43, %41, %44 : vector<256x8xi1>, vector<256x8xf32>
    %46 = arith.truncf %45 : vector<256x8xf32> to vector<256x8xbf16>
    %47 = arith.truncf %40 : vector<256x8xf32> to vector<256x8xbf16>
    %c255_i32 = arith.constant 255 : i32
    %48 = tpu.dynamic_rotate %40 by %c255_i32 dim 0 : vector<256x8xf32>, i32 -> vector<256x8xf32>
    %cst_20 = arith.constant 0.000000e+00 : f32
    %49 = vector.shape_cast %37 : vector<256x1xi1> to vector<256x1xi1>
    %50 = vector.broadcast %49 : vector<256x1xi1> to vector<256x8xi1>
    %51 = vector.broadcast %cst_20 : f32 to vector<256x8xf32>
    %52 = arith.select %50, %48, %51 : vector<256x8xi1>, vector<256x8xf32>
    %53 = arith.truncf %52 : vector<256x8xf32> to vector<256x8xbf16>
    %54 = tpu.concatenate %46, %47, %53 in 1 : vector<256x8xbf16>, vector<256x8xbf16>, vector<256x8xbf16> -> vector<256x24xbf16>
    %55 = vector.shape_cast %12 : vector<16x16x8xf32> to vector<256x8xf32>
    %c1_i32_21 = arith.constant 1 : i32
    %56 = tpu.dynamic_rotate %55 by %c1_i32_21 dim 0 : vector<256x8xf32>, i32 -> vector<256x8xf32>
    %cst_22 = arith.constant 0.000000e+00 : f32
    %57 = vector.shape_cast %35 : vector<256x1xi1> to vector<256x1xi1>
    %58 = vector.broadcast %57 : vector<256x1xi1> to vector<256x8xi1>
    %59 = vector.broadcast %cst_22 : f32 to vector<256x8xf32>
    %60 = arith.select %58, %56, %59 : vector<256x8xi1>, vector<256x8xf32>
    %61 = arith.truncf %60 : vector<256x8xf32> to vector<256x8xbf16>
    %62 = arith.truncf %55 : vector<256x8xf32> to vector<256x8xbf16>
    %c255_i32_23 = arith.constant 255 : i32
    %63 = tpu.dynamic_rotate %55 by %c255_i32_23 dim 0 : vector<256x8xf32>, i32 -> vector<256x8xf32>
    %cst_24 = arith.constant 0.000000e+00 : f32
    %64 = vector.shape_cast %37 : vector<256x1xi1> to vector<256x1xi1>
    %65 = vector.broadcast %64 : vector<256x1xi1> to vector<256x8xi1>
    %66 = vector.broadcast %cst_24 : f32 to vector<256x8xf32>
    %67 = arith.select %65, %63, %66 : vector<256x8xi1>, vector<256x8xf32>
    %68 = arith.truncf %67 : vector<256x8xf32> to vector<256x8xbf16>
    %69 = tpu.concatenate %61, %62, %68 in 1 : vector<256x8xbf16>, vector<256x8xbf16>, vector<256x8xbf16> -> vector<256x24xbf16>
    %70 = vector.extract_strided_slice %12 {offsets = [1, 0, 0], sizes = [15, 16, 8], strides = [1, 1, 1]} : vector<16x16x8xf32> to vector<15x16x8xf32>
    %71 = tpu.concatenate %70, %16 in 0 : vector<15x16x8xf32>, vector<1x16x8xf32> -> vector<16x16x8xf32>
    %72 = vector.shape_cast %71 : vector<16x16x8xf32> to vector<256x8xf32>
    %c1_i32_25 = arith.constant 1 : i32
    %73 = tpu.dynamic_rotate %72 by %c1_i32_25 dim 0 : vector<256x8xf32>, i32 -> vector<256x8xf32>
    %cst_26 = arith.constant 0.000000e+00 : f32
    %74 = vector.shape_cast %35 : vector<256x1xi1> to vector<256x1xi1>
    %75 = vector.broadcast %74 : vector<256x1xi1> to vector<256x8xi1>
    %76 = vector.broadcast %cst_26 : f32 to vector<256x8xf32>
    %77 = arith.select %75, %73, %76 : vector<256x8xi1>, vector<256x8xf32>
    %78 = arith.truncf %77 : vector<256x8xf32> to vector<256x8xbf16>
    %79 = arith.truncf %72 : vector<256x8xf32> to vector<256x8xbf16>
    %c255_i32_27 = arith.constant 255 : i32
    %80 = tpu.dynamic_rotate %72 by %c255_i32_27 dim 0 : vector<256x8xf32>, i32 -> vector<256x8xf32>
    %cst_28 = arith.constant 0.000000e+00 : f32
    %81 = vector.shape_cast %37 : vector<256x1xi1> to vector<256x1xi1>
    %82 = vector.broadcast %81 : vector<256x1xi1> to vector<256x8xi1>
    %83 = vector.broadcast %cst_28 : f32 to vector<256x8xf32>
    %84 = arith.select %82, %80, %83 : vector<256x8xi1>, vector<256x8xf32>
    %85 = arith.truncf %84 : vector<256x8xf32> to vector<256x8xbf16>
    %86 = tpu.concatenate %78, %79, %85 in 1 : vector<256x8xbf16>, vector<256x8xbf16>, vector<256x8xbf16> -> vector<256x24xbf16>
    %87 = tpu.concatenate %54, %69, %86 in 1 : vector<256x24xbf16>, vector<256x24xbf16>, vector<256x24xbf16> -> vector<256x72xbf16>
    %c0_29 = arith.constant 0 : index
    %c0_30 = arith.constant 0 : index
    %88 = vector.load %arg7[%c0_29, %c0_30] : memref<72x4xbf16, #tpu.memory_space<vmem>>, vector<72x4xbf16>
    %cst_31 = arith.constant dense<0.000000e+00> : vector<256x4xf32>
    %89 = tpu.matmul %87, %88, %cst_31 {dimension_numbers = #tpu.dot_dimension_numbers<[1], [0], [0], [1], [0, 0, 1, 1], [], []>} : vector<256x72xbf16>, vector<72x4xbf16>, vector<256x4xf32> -> vector<256x4xf32>
    %c0_32 = arith.constant 0 : index
    %c0_33 = arith.constant 0 : index
    %c0_34 = arith.constant 0 : index
    %c0_35 = arith.constant 0 : index
    %90 = vector.load %arg3[%c0_32, %c0_33, %c0_34, %c0_35] : memref<1x16x16x4xf32, #tpu.memory_space<vmem>>, vector<1x16x16x4xf32>
    %91 = vector.shape_cast %90 : vector<1x16x16x4xf32> to vector<16x16x4xf32>
    %92 = vector.shape_cast %91 : vector<16x16x4xf32> to vector<256x4xf32>
    %93 = arith.addf %92, %89 : vector<256x4xf32>
    %c0_36 = arith.constant 0 : index
    %c0_37 = arith.constant 0 : index
    %94 = vector.load %arg8[%c0_36, %c0_37] : memref<1x4xf32, #tpu.memory_space<vmem>>, vector<1x4xf32>
    %95 = vector.broadcast %94 : vector<1x4xf32> to vector<256x4xf32>
    %96 = arith.addf %93, %95 : vector<256x4xf32>
    %97 = vector.shape_cast %96 : vector<256x4xf32> to vector<16x16x4xf32>
    %c0_38 = arith.constant 0 : index
    %c0_39 = arith.constant 0 : index
    %c0_40 = arith.constant 0 : index
    %c0_41 = arith.constant 0 : index
    %98 = vector.load %arg9[%c0_38, %c0_39, %c0_40, %c0_41] : memref<1x16x16x4xf32, #tpu.memory_space<vmem>>, vector<1x16x16x4xf32>
    %99 = vector.shape_cast %98 : vector<1x16x16x4xf32> to vector<16x16x4xf32>
    %100 = vector.shape_cast %97 : vector<16x16x4xf32> to vector<1x16x16x4xf32>
    tpu.vector_store %arg9[%c0_38, %c0_39, %c0_40, %c0_41], %100 {strides = array<i32>} : memref<1x16x16x4xf32, #tpu.memory_space<vmem>>, vector<1x16x16x4xf32>,
    %cst_42 = arith.constant dense<0.000000e+00> : vector<4xf32>
    %101 = vector.multi_reduction <add>, %96, %cst_42 [0] : vector<256x4xf32> to vector<4xf32>
    %102 = vector.shape_cast %101 : vector<4xf32> to vector<1x4xf32>
    %103 = arith.mulf %96, %96 : vector<256x4xf32>
    %cst_43 = arith.constant dense<0.000000e+00> : vector<4xf32>
    %104 = vector.multi_reduction <add>, %103, %cst_43 [0] : vector<256x4xf32> to vector<4xf32>
    %105 = vector.shape_cast %104 : vector<4xf32> to vector<1x4xf32>
    %106 = tpu.concatenate %102, %105 in 0 : vector<1x4xf32>, vector<1x4xf32> -> vector<2x4xf32>
    %c0_44 = arith.constant 0 : index
    %c0_45 = arith.constant 0 : index
    %c0_46 = arith.constant 0 : index
    %c0_47 = arith.constant 0 : index
    %107 = vector.load %arg10[%c0_44, %c0_45, %c0_46, %c0_47] : memref<1x1x2x4xf32, #tpu.memory_space<vmem>>, vector<1x1x2x4xf32>
    %108 = vector.shape_cast %107 : vector<1x1x2x4xf32> to vector<2x4xf32>
    %109 = vector.shape_cast %106 : vector<2x4xf32> to vector<1x1x2x4xf32>
    tpu.vector_store %arg10[%c0_44, %c0_45, %c0_46, %c0_47], %109 {strides = array<i32>} : memref<1x1x2x4xf32, #tpu.memory_space<vmem>>, vector<1x1x2x4xf32>,
    return
  }
  func.func @transform_0(%arg0: i32, %arg1: i32) -> (i32, i32, i32, i32) {
    %c0_i32 = arith.constant 0 : i32
    %c0_i32_0 = arith.constant 0 : i32
    %c0_i32_1 = arith.constant 0 : i32
    return %arg0, %arg1, %c0_i32, %c0_i32_0 : i32, i32, i32, i32
  }
  func.func @transform_1(%arg0: i32, %arg1: i32) -> (i32, i32, i32, i32) {
    %c0_i32 = arith.constant 0 : i32
    %c0_i32_0 = arith.constant 0 : i32
    %c0_i32_1 = arith.constant 0 : i32
    return %arg0, %arg1, %c0_i32, %c0_i32_0 : i32, i32, i32, i32
  }
  func.func @transform_2(%arg0: i32, %arg1: i32) -> (i32, i32, i32, i32) {
    %c0_i32 = arith.constant 0 : i32
    %c0_i32_0 = arith.constant 0 : i32
    %c0_i32_1 = arith.constant 0 : i32
    return %arg0, %arg1, %c0_i32, %c0_i32_0 : i32, i32, i32, i32
  }
  func.func @transform_3(%arg0: i32, %arg1: i32) -> (i32, i32, i32, i32) {
    %c0_i32 = arith.constant 0 : i32
    %c0_i32_0 = arith.constant 0 : i32
    %c0_i32_1 = arith.constant 0 : i32
    return %arg0, %arg1, %c0_i32, %c0_i32_0 : i32, i32, i32, i32
  }
  func.func @transform_4(%arg0: i32, %arg1: i32) -> (i32, i32) {
    %c0_i32 = arith.constant 0 : i32
    %c0_i32_0 = arith.constant 0 : i32
    %c0_i32_1 = arith.constant 0 : i32
    return %c0_i32, %c0_i32_0 : i32, i32
  }
  func.func @transform_5(%arg0: i32, %arg1: i32) -> (i32, i32) {
    %c0_i32 = arith.constant 0 : i32
    %c0_i32_0 = arith.constant 0 : i32
    %c0_i32_1 = arith.constant 0 : i32
    return %c0_i32, %c0_i32_0 : i32, i32
  }
  func.func @transform_6(%arg0: i32, %arg1: i32) -> (i32, i32) {
    %c0_i32 = arith.constant 0 : i32
    %c0_i32_0 = arith.constant 0 : i32
    %c0_i32_1 = arith.constant 0 : i32
    return %c0_i32, %c0_i32_0 : i32, i32
  }
  func.func @transform_7(%arg0: i32, %arg1: i32) -> (i32, i32, i32, i32) {
    %c0_i32 = arith.constant 0 : i32
    %c0_i32_0 = arith.constant 0 : i32
    %c0_i32_1 = arith.constant 0 : i32
    return %arg0, %arg1, %c0_i32, %c0_i32_0 : i32, i32, i32, i32
  }
  func.func @transform_8(%arg0: i32, %arg1: i32) -> (i32, i32, i32, i32) {
    %c0_i32 = arith.constant 0 : i32
    %c0_i32_0 = arith.constant 0 : i32
    %c0_i32_1 = arith.constant 0 : i32
    return %arg0, %arg1, %c0_i32, %c0_i32_0 : i32, i32, i32, i32
  }
}

</mosaic_0001>

<bundles_post_ra>
// kernel: residual_block_nhwc.3
= control target key start
LH: loop header
LB: loop body
LE: loop exit
PB: predicated region body
PF: predicated region fallthrough
CT: control target
= control target key end

     0   :  { %vm72_vm0 = vcmask 31744   ;;  %vm403_vm1 = vcmask 1040384   ;;  %vm405_vm2 = vcmask 25600   ;;  %s1276_s0 = inlined_call_operand.vmem [shape: f32[32,16,4], index: 0, kind: input, shape index: {}]   ;;  %s1277_s1 = inlined_call_operand.vmem [shape: f32[1,2,4], index: 1, kind: output, shape index: {}]  }
   0x1   :  { %v424_v0 = vld [vmem:[%s1276_s0] sm:$0xff]  ;;  %v429_v1 = vld [vmem:[%s1276_s0 + $0x8] sm:$0xff]  ;;  %v434_v2 = vld [vmem:[%s1276_s0 + $0x10] sm:$0xff] }
   0x2   :  { %v73_v3 = vsel %vm72_vm0, %v424_v0, 0.0  ;;  %v74_v4 = vsel %vm72_vm0, %v429_v1, 0.0  ;;  %v76_v5 = vsel %vm72_vm0, %v434_v2, 0.0  ;;  %v445_v6 = vld [vmem:[%s1276_s0 + $0x18] sm:$0xff]  ;;  %v452_v9 = vld [vmem:[%s1276_s0 + $0x20] sm:$0xff]  ;;  %v459_v12 = vld [vmem:[%s1276_s0 + $0x28] sm:$0xff] }
   0x3   :  { %v75_v7 = vadd.f32 %v74_v4, %v73_v3  ;;  %v78_v8 = vsel %vm72_vm0, %v445_v6, 0.0  ;;  %v80_v11 = vsel %vm72_vm0, %v452_v9, 0.0  ;;  %v82_v14 = vsel %vm72_vm0, %v459_v12, 0.0  ;;  %v466_v15 = vld [vmem:[%s1276_s0 + $0x30] sm:$0xff]  ;;  %v471_v17 = vld [vmem:[%s1276_s0 + $0x38] sm:$0xff]  ;;  %v476_v18 = vld [vmem:[%s1276_s0 + $0x40] sm:$0xff] }
   0x4   :  { %v84_v19 = vsel %vm72_vm0, %v466_v15, 0.0  ;;  %v483_v20 = vld [vmem:[%s1276_s0 + $0x48] sm:$0xff]  ;;  %v488_v21 = vld [vmem:[%s1276_s0 + $0x50] sm:$0xff]  ;;  %v493_v22 = vld [vmem:[%s1276_s0 + $0x58] sm:$0xff]  ;;  %v86_v24 = vsel %vm72_vm0, %v471_v17, 0.0  ;;  %v88_v25 = vsel %vm72_vm0, %v476_v18, 0.0 }
   0x5   :  { %v77_v10 = vadd.f32 %v76_v5, %v75_v7  ;;  %v502_v26 = vld [vmem:[%s1276_s0 + $0x108] sm:$0xff]  ;;  %v507_v27 = vld [vmem:[%s1276_s0 + $0x110] sm:$0xff]  ;;  %v512_v28 = vld [vmem:[%s1276_s0 + $0x118] sm:$0xff]  ;;  %v90_v29 = vsel %vm72_vm0, %v483_v20, 0.0  ;;  %v92_v30 = vsel %vm72_vm0, %v488_v21, 0.0  ;;  %v520_v31 = vsel %vm72_vm0, %v493_v22, 0.0 }
   0x6   :  { %v525_v32 = vld [vmem:[%s1276_s0 + $0x120] sm:$0xff]  ;;  %v530_v33 = vld [vmem:[%s1276_s0 + $0x128] sm:$0xff]  ;;  %v535_v34 = vld [vmem:[%s1276_s0 + $0x130] sm:$0xff]  ;;  %v539_v36 = vsel %vm72_vm0, %v502_v26, 0.0  ;;  %v543_v37 = vsel %vm72_vm0, %v507_v27, 0.0  ;;  %v547_v38 = vsel %vm72_vm0, %v512_v28, 0.0 }
   0x7   :  { %v79_v13 = vadd.f32 %v78_v8, %v77_v10  ;;  %1296 = vst [vmem:[#allocation2_spill] sm:$0xff] %v539_v36  ;;  %1297 = vst [vmem:[#allocation3_spill] sm:$0xff] %v543_v37  ;;  %v552_v39 = vld [vmem:[%s1276_s0 + $0x138] sm:$0xff]  ;;  %v557_v40 = vld [vmem:[%s1276_s0 + $0x140] sm:$0xff]  ;;  %v566_v42 = vsel %vm72_vm0, %v525_v32, 0.0  ;;  %v570_v43 = vsel %vm72_vm0, %v530_v33, 0.0  ;;  %v208_v36 = vmul.f32 %v434_v2, %v434_v2 }
   0x8   :  { %1298 = vst [vmem:[#allocation4_spill] sm:$0xff] %v547_v38  ;;  %v562_v41 = vld [vmem:[%s1276_s0 + $0x148] sm:$0xff]  ;;  %1299 = vst [vmem:[#allocation5_spill] sm:$0xff] %v566_v42  ;;  %v574_v44 = vsel %vm72_vm0, %v535_v34, 0.0  ;;  %v579_v45 = vld [vmem:[%s1276_s0 + $0x150] sm:$0xff]  ;;  %v593_v49 = vsel %vm72_vm0, %v552_v39, 0.0 }
   0x9   :  { %v81_v16 = vadd.f32 %v80_v11, %v79_v13  ;;  %1300 = vst [vmem:[#allocation6_spill] sm:$0xff] %v570_v43  ;;  %1301 = vst [vmem:[#allocation7_spill] sm:$0xff] %v574_v44  ;;  %v584_v46 = vld [vmem:[%s1276_s0 + $0x158] sm:$0xff]  ;;  %v589_v47 = vld [vmem:[%s1276_s0 + $0x160] sm:$0xff]  ;;  %v597_v50 = vsel %vm72_vm0, %v557_v40, 0.0  ;;  %v601_v51 = vsel %vm72_vm0, %v562_v41, 0.0 }
   0xa   :  { %1302 = vst [vmem:[#allocation8_spill] sm:$0xff] %v593_v49  ;;  %1303 = vst [vmem:[#allocation9_spill] sm:$0xff] %v597_v50  ;;  %v606_v52 = vld [vmem:[%s1276_s0 + $0x168] sm:$0xff]  ;;  %v611_v53 = vld [vmem:[%s1276_s0 + $0x170] sm:$0xff]  ;;  %v620_v55 = vsel %vm72_vm0, %v579_v45, 0.0  ;;  %v624_v56 = vsel %vm72_vm0, %v584_v46, 0.0 }
   0xb   :  { %v83_v23 = vadd.f32 %v82_v14, %v81_v16  ;;  %1304 = vst [vmem:[#allocation10_spill] sm:$0xff] %v601_v51  ;;  %v616_v54 = vld [vmem:[%s1276_s0 + $0x178] sm:$0xff]  ;;  %1305 = vst [vmem:[#allocation11_spill] sm:$0xff] %v620_v55  ;;  %v628_v57 = vsel %vm72_vm0, %v589_v47, 0.0  ;;  %v633_v58 = vld [vmem:[%s1276_s0 + $0x180] sm:$0xff]  ;;  %v647_v62 = vsel %vm72_vm0, %v606_v52, 0.0 }
   0xc   :  { %1306 = vst [vmem:[#allocation12_spill] sm:$0xff] %v624_v56  ;;  %1307 = vst [vmem:[#allocation13_spill] sm:$0xff] %v628_v57  ;;  %v638_v59 = vld [vmem:[%s1276_s0 + $0x188] sm:$0xff]  ;;  %v643_v60 = vld [vmem:[%s1276_s0 + $0x190] sm:$0xff]  ;;  %v651_v63 = vsel %vm72_vm0, %v611_v53, 0.0  ;;  %v655_v3 = vsel %vm72_vm0, %v616_v54, 0.0 }
   0xd   :  { %v85_v35 = vadd.f32 %v84_v19, %v83_v23  ;;  %1308 = vst [vmem:[#allocation14_spill] sm:$0xff] %v647_v62  ;;  %1309 = vst [vmem:[#allocation15_spill] sm:$0xff] %v651_v63  ;;  %v660_v4 = vld [vmem:[%s1276_s0 + $0x198] sm:$0xff]  ;;  %v665_v5 = vld [vmem:[%s1276_s0 + $0x1a0] sm:$0xff]  ;;  %v674_v8 = vsel %vm72_vm0, %v633_v58, 0.0  ;;  %v678_v10 = vsel %vm72_vm0, %v638_v59, 0.0 }
   0xe   :  { %1310 = vst [vmem:[#allocation16_spill] sm:$0xff] %v655_v3  ;;  %v670_v7 = vld [vmem:[%s1276_s0 + $0x1a8] sm:$0xff]  ;;  %1311 = vst [vmem:[#allocation17_spill] sm:$0xff] %v674_v8  ;;  %v682_v11 = vsel %vm72_vm0, %v643_v60, 0.0  ;;  %v687_v13 = vld [vmem:[%s1276_s0 + $0x60] sm:$0xff] }
   0xf   :  { %v87_v48 = vadd.f32 %v86_v24, %v85_v35  ;;  %1312 = vst [vmem:[#allocation18_spill] sm:$0xff] %v678_v10  ;;  %1313 = vst [vmem:[#allocation19_spill] sm:$0xff] %v682_v11  ;;  %v692_v14 = vld [vmem:[%s1276_s0 + $0x1b0] sm:$0xff]  ;;  %v697_v16 = vld [vmem:[%s1276_s0 + $0x1b8] sm:$0xff]  ;;  %v706_v24 = vsel %vm72_vm0, %v660_v4, 0.0  ;;  %v714_v35 = vsel %vm72_vm0, %v670_v7, 0.0 }
  0x10   :  { %v702_v19 = vld [vmem:[%s1276_s0 + $0x1c0] sm:$0xff]  ;;  %1314 = vst [vmem:[#allocation20_spill] sm:$0xff] %v706_v24  ;;  %1316 = vst [vmem:[#allocation22_spill] sm:$0xff] %v714_v35  ;;  %v737_v35 = vsel %vm72_vm0, %v697_v16, 0.0  ;;  %v751_v10 = vld [vmem:[%s1276_s0 + $0x1e8] sm:$0xff] }
  0x11   :  { %v89_v61 = vadd.f32 %v88_v25, %v87_v48  ;;  %v710_v25 = vsel %vm72_vm0, %v665_v5, 0.0  ;;  %v719_v48 = vld [vmem:[%s1276_s0 + $0x1c8] sm:$0xff]  ;;  %1318 = vst [vmem:[#allocation24_spill] sm:$0xff] %v737_v35  ;;  %v741_v24 = vsel %vm72_vm0, %v702_v19, 0.0  ;;  %v746_v11 = vld [vmem:[%s1276_s0 + $0x1e0] sm:$0xff]  ;;  %v773_v63 = vld [vmem:[%s1276_s0 + $0x1f8] sm:$0xff] }
  0x12   :  { %1315 = vst [vmem:[#allocation21_spill] sm:$0xff] %v710_v25  ;;  %v733_v25 = vsel %vm72_vm0, %v692_v14, 0.0  ;;  %1319 = vst [vmem:[#allocation25_spill] sm:$0xff] %v741_v24  ;;  %v760_v8 = vsel %vm72_vm0, %v719_v48, 0.0  ;;  %v795_v57 = vsel %vm72_vm0, %v773_v63, 0.0  ;;  %v824_v55 = vld [vmem:[%s1276_s0 + $0x90] sm:$0xff] }
  0x13   :  { %v91_v23 = vadd.f32 %v90_v29, %v89_v61  ;;  %v724_v29 = vld [vmem:[%s1276_s0 + $0x1d0] sm:$0xff]  ;;  %v729_v61 = vld [vmem:[%s1276_s0 + $0x1d8] sm:$0xff]  ;;  %1317 = vst [vmem:[#allocation23_spill] sm:$0xff] %v733_v25  ;;  %1321 = vst [vmem:[#allocation27_spill] sm:$0xff] %v760_v8  ;;  %v783_v8 = vsel %vm72_vm0, %v751_v10, 0.0 }
  0x14   :  { %v756_v25 = vld [vmem:[%s1276_s0 + $0x1f0] sm:$0xff]  ;;  %v764_v24 = vsel %vm72_vm0, %v724_v29, 0.0  ;;  %v768_v3 = vsel %vm72_vm0, %v729_v61, 0.0  ;;  %1324 = vst [vmem:[#allocation30_spill] sm:$0xff] %v773_v63  ;;  %1326 = vst [vmem:[#allocation32_spill] sm:$0xff] %v783_v8  ;;  %v829_v51 = vld [vmem:[%s1276_s0 + $0x98] sm:$0xff] }
  0x15   :  { %1320 = vst [vmem:[#allocation26_spill] sm:$0xff] %v756_v25  ;;  %v93_v35 = vadd.f32 %v92_v30, %v91_v23  ;;  %1322 = vst [vmem:[#allocation28_spill] sm:$0xff] %v764_v24  ;;  %v96_v30 = vsel %vm72_vm0, %v687_v13, 0.0  ;;  %v779_v23 = vsel %vm72_vm0, %v746_v11, 0.0  ;;  %v787_v24 = vsel %vm72_vm0, %v756_v25, 0.0  ;;  %v22_v8 = vld [vmem:[%s1276_s0 + $0x70] sm:$0xff] }
  0x16   :  { %1323 = vst [vmem:[#allocation29_spill] sm:$0xff] %v768_v3  ;;  %1325 = vst [vmem:[#allocation31_spill] sm:$0xff] %v779_v23  ;;  %v21_v3 = vld [vmem:[%s1276_s0 + $0x68] sm:$0xff]  ;;  %v834_v50 = vld [vmem:[%s1276_s0 + $0xa0] sm:$0xff]  ;;  %v110_v38 = vsel %vm72_vm0, %v829_v51, 0.0 }
  0x17   :  { %1327 = vst [vmem:[#allocation33_spill] sm:$0xff] %v787_v24  ;;  %v95_v62 = vadd.f32 %v520_v31, %v93_v35  ;;  %1328 = vst [vmem:[#allocation34_spill] sm:$0xff] %v795_v57  ;;  %v98_v23 = vsel %vm72_vm0, %v21_v3, 0.0  ;;  %v804_v24 = vld [vmem:[%s1276_s0 + $0x78] sm:$0xff]  ;;  %v809_v31 = vld [vmem:[%s1276_s0 + $0x80] sm:$0xff]  ;;  %v100_v57 = vsel %vm72_vm0, %v22_v8, 0.0 }
  0x18   :  { %1329 = vst [vmem:[#allocation35_spill] sm:$0xff] %v804_v24  ;;  %1330 = vst [vmem:[#allocation36_spill] sm:$0xff] %v809_v31  ;;  %v814_v35 = vld [vmem:[%s1276_s0 + $0x88] sm:$0xff]  ;;  %v850_v42 = vld [vmem:[%s1276_s0 + $0xb0] sm:$0xff]  ;;  %v112_v37 = vsel %vm72_vm0, %v834_v50, 0.0 }
  0x19   :  { %v97_v56 = vadd.f32 %v96_v30, %v95_v62  ;;  %1331 = vst [vmem:[#allocation37_spill] sm:$0xff] %v814_v35  ;;  %v206_v62 = vmul.f32 %v424_v0, %v424_v0  ;;  %v207_v30 = vmul.f32 %v429_v1, %v429_v1  ;;  %1332 = vst [vmem:[#allocation38_spill] sm:$0xff] %v824_v55  ;;  %v102_v0 = vsel %vm72_vm0, %v804_v24, 0.0  ;;  %v845_v43 = vld [vmem:[%s1276_s0 + $0xa8] sm:$0xff]  ;;  %v891_v63 = vld [vmem:[%s1276_s0 + $0xd8] sm:$0xff] }
  0x1a   :  { %1333 = vst [vmem:[#allocation39_spill] sm:$0xff] %v829_v51  ;;  %1334 = vst [vmem:[#allocation40_spill] sm:$0xff] %v834_v50  ;;  %v104_v1 = vsel %vm72_vm0, %v809_v31, 0.0  ;;  %v106_v44 = vsel %vm72_vm0, %v814_v35, 0.0  ;;  %v868_v35 = vld [vmem:[%s1276_s0 + $0xc0] sm:$0xff]  ;;  %v873_v31 = vld [vmem:[%s1276_s0 + $0xc8] sm:$0xff]  ;;  %v209_v24 = vmul.f32 %v445_v6, %v445_v6 }
  0x1b   :  { %v99_v49 = vadd.f32 %v98_v23, %v97_v56  ;;  %1335 = vst [vmem:[#allocation41_spill] sm:$0xff] %v845_v43  ;;  %1336 = vst [vmem:[#allocation42_spill] sm:$0xff] %v850_v42  ;;  %v855_v56 = vld [vmem:[%s1276_s0 + $0xb8] sm:$0xff]  ;;  %v108_v23 = vsel %vm72_vm0, %v824_v55, 0.0  ;;  %v878_v51 = vld [vmem:[%s1276_s0 + $0xd0] sm:$0xff]  ;;  %v114_v50 = vsel %vm72_vm0, %v845_v43, 0.0 }
  0x1c   :  { %1337 = vst [vmem:[#allocation43_spill] sm:$0xff] %v855_v56  ;;  %1338 = vst [vmem:[#allocation44_spill] sm:$0xff] %v868_v35  ;;  %v884_v2 = vsel %vm72_vm0, %v850_v42, 0.0  ;;  %v896_v25 = vld [vmem:[%s1276_s0 + $0xe0] sm:$0xff]  ;;  %v908_v6 = vsel %vm72_vm0, %v873_v31, 0.0  ;;  %v912_v42 = vsel %vm72_vm0, %v878_v51, 0.0 }
  0x1d   :  { %1339 = vst [vmem:[#allocation45_spill] sm:$0xff] %v873_v31  ;;  %1340 = vst [vmem:[#allocation46_spill] sm:$0xff] %v878_v51  ;;  %v101_v55 = vadd.f32 %v100_v57, %v99_v49  ;;  %v900_v49 = vsel %vm72_vm0, %v855_v56, 0.0  ;;  %v904_v57 = vsel %vm72_vm0, %v868_v35, 0.0  ;;  %v917_v43 = vld [vmem:[%s1276_s0 + $0xe8] sm:$0xff]  ;;  %v922_v56 = vld [vmem:[%s1276_s0 + $0xf0] sm:$0xff]  ;;  %v210_v51 = vmul.f32 %v452_v9, %v452_v9 }
  0x1e   :  { %1341 = vst [vmem:[#allocation47_spill] sm:$0xff] %v891_v63  ;;  %1342 = vst [vmem:[#allocation48_spill] sm:$0xff] %v896_v25  ;;  %v930_v31 = vsel %vm72_vm0, %v896_v25, 0.0  ;;  %v213_v25 = vmul.f32 %v471_v17, %v471_v17  ;;  %v214_v9 = vmul.f32 %v476_v18, %v476_v18  ;;  %v239_v17 = vmul.f32 %v502_v26, %v502_v26 }
  0x1f   :  { %1343 = vst [vmem:[#allocation49_spill] sm:$0xff] %v904_v57  ;;  %1344 = vst [vmem:[#allocation50_spill] sm:$0xff] %v908_v6  ;;  %v103_v35 = vadd.f32 %v102_v0, %v101_v55  ;;  %v926_v57 = vsel %vm72_vm0, %v891_v63, 0.0  ;;  %v940_v6 = vsel %vm72_vm0, %v922_v56, 0.0  ;;  %v211_v55 = vmul.f32 %v459_v12, %v459_v12 }
  0x20   :  { %1345 = vst [vmem:[#allocation51_spill] sm:$0xff] %v912_v42  ;;  %1346 = vst [vmem:[#allocation52_spill] sm:$0xff] %v917_v43  ;;  %v936_v42 = vsel %vm72_vm0, %v917_v43, 0.0  ;;  %v212_v0 = vmul.f32 %v466_v15, %v466_v15  ;;  %v215_v43 = vmul.f32 %v483_v20, %v483_v20  ;;  %v218_v12 = vmul.f32 %v687_v13, %v687_v13 }
  0x21   :  { %1347 = vst [vmem:[#allocation53_spill] sm:$0xff] %v922_v56  ;;  %1348 = vst [vmem:[#allocation54_spill] sm:$0xff] %v940_v6  ;;  %v105_v63 = vadd.f32 %v104_v1, %v103_v35  ;;  %v216_v56 = vmul.f32 %v488_v21, %v488_v21  ;;  %v217_v6 = vmul.f32 %v493_v22, %v493_v22 }
  0x22   :  { %v958_v15 = vmul.f32 %v21_v3, %v21_v3  ;;  %v960_v1 = vmul.f32 %v22_v8, %v22_v8  ;;  %v240_v18 = vmul.f32 %v507_v27, %v507_v27  ;;  %v241_v20 = vmul.f32 %v512_v28, %v512_v28 }
  0x23   :  { %v107_v35 = vadd.f32 %v106_v44, %v105_v63  ;;  %v242_v21 = vmul.f32 %v525_v32, %v525_v32  ;;  %v243_v22 = vmul.f32 %v530_v33, %v530_v33  ;;  %v244_v44 = vmul.f32 %v535_v34, %v535_v34 }
  0x24   :  { %v245_v3 = vmul.f32 %v552_v39, %v552_v39  ;;  %v246_v26 = vmul.f32 %v557_v40, %v557_v40  ;;  %v247_v27 = vmul.f32 %v562_v41, %v562_v41  ;;  %v248_v28 = vmul.f32 %v579_v45, %v579_v45 }
  0x25   :  { %v109_v63 = vadd.f32 %v108_v23, %v107_v35  ;;  %v249_v32 = vmul.f32 %v584_v46, %v584_v46  ;;  %v270_v33 = vsel %vm72_vm0, %v206_v62, 0.0  ;;  %v271_v34 = vsel %vm72_vm0, %v207_v30, 0.0 }
  0x26   :  { %v250_v39 = vmul.f32 %v589_v47, %v589_v47  ;;  %v272_v13 = vadd.f32 %v271_v34, %v270_v33  ;;  %v273_v40 = vsel %vm72_vm0, %v208_v36, 0.0  ;;  %v251_v41 = vmul.f32 %v606_v52, %v606_v52  ;;  %v1350_v33 = vld [vmem:[#allocation30_spill] sm:$0xff] }
  0x27   :  { %v111_v8 = vadd.f32 %v110_v38, %v109_v63  ;;  %v252_v45 = vmul.f32 %v611_v53, %v611_v53  ;;  %v253_v46 = vmul.f32 %v616_v54, %v616_v54  ;;  %v275_v62 = vsel %vm72_vm0, %v209_v24, 0.0  ;;  %v1349_v63 = vld [vmem:[#allocation26_spill] sm:$0xff] }
  0x28   :  { %v254_v38 = vmul.f32 %v633_v58, %v633_v58  ;;  %v255_v47 = vmul.f32 %v638_v59, %v638_v59  ;;  %v274_v30 = vadd.f32 %v273_v40, %v272_v13  ;;  %v256_v36 = vmul.f32 %v643_v60, %v643_v60  ;;  %v1351_v40 = vld [vmem:[#allocation49_spill] sm:$0xff] }
  0x29   :  { %v113_v23 = vadd.f32 %v112_v37, %v111_v8  ;;  %v257_v52 = vmul.f32 %v660_v4, %v660_v4  ;;  %v258_v53 = vmul.f32 %v665_v5, %v665_v5  ;;  %v277_v54 = vsel %vm72_vm0, %v210_v51, 0.0 }
  0x2a   :  { %v259_v37 = vmul.f32 %v670_v7, %v670_v7  ;;  %v260_v58 = vmul.f32 %v692_v14, %v692_v14  ;;  %v276_v59 = vadd.f32 %v275_v62, %v274_v30  ;;  %v261_v35 = vmul.f32 %v697_v16, %v697_v16 }
  0x2b   :  { %v115_v24 = vadd.f32 %v114_v50, %v113_v23  ;;  %v262_v60 = vmul.f32 %v702_v19, %v702_v19  ;;  %v263_v4 = vmul.f32 %v719_v48, %v719_v48  ;;  %v279_v5 = vsel %vm72_vm0, %v211_v55, 0.0 }
  0x2c   :  { %v264_v51 = vmul.f32 %v724_v29, %v724_v29  ;;  %v265_v7 = vmul.f32 %v729_v61, %v729_v61  ;;  %v278_v14 = vadd.f32 %v277_v54, %v276_v59  ;;  %v266_v16 = vmul.f32 %v746_v11, %v746_v11 }
  0x2d   :  { %v117_v50 = vadd.f32 %v884_v2, %v115_v24  ;;  %v267_v19 = vmul.f32 %v751_v10, %v751_v10  ;;  %v268_v48 = vmul.f32 %v1349_v63, %v1349_v63  ;;  %v281_v55 = vsel %vm72_vm0, %v212_v0, 0.0  ;;  %v1353_v24 = vld [vmem:[#allocation51_spill] sm:$0xff] }
  0x2e   :  { %v269_v29 = vmul.f32 %v1350_v33, %v1350_v33  ;;  %v280_v34 = vadd.f32 %v279_v5, %v278_v14  ;;  %v283_v61 = vsel %vm72_vm0, %v213_v25, 0.0  ;;  %v285_v8 = vsel %vm72_vm0, %v214_v9, 0.0  ;;  %v1355_v33 = vld [vmem:[#allocation54_spill] sm:$0xff] }
  0x2f   :  { %v119_v2 = vadd.f32 %v900_v49, %v117_v50  ;;  %v287_v11 = vsel %vm72_vm0, %v215_v43, 0.0  ;;  %v289_v13 = vsel %vm72_vm0, %v216_v56, 0.0  ;;  %v291_v10 = vsel %vm72_vm0, %v217_v6, 0.0  ;;  %v1352_v6 = vld [vmem:[#allocation50_spill] sm:$0xff] }
  0x30   :  { %v282_v23 = vadd.f32 %v281_v55, %v280_v34  ;;  %v293_v0 = vsel %vm72_vm0, %v218_v12, 0.0  ;;  %v1041_v49 = vsel %vm72_vm0, %v239_v17, 0.0  ;;  %v1044_v30 = vsel %vm72_vm0, %v240_v18, 0.0  ;;  %v1354_v55 = vld [vmem:[#allocation35_spill] sm:$0xff] }
  0x31   :  { %v121_v62 = vadd.f32 %v1351_v40, %v119_v2  ;;  %v1047_v25 = vsel %vm72_vm0, %v241_v20, 0.0  ;;  %v1050_v43 = vsel %vm72_vm0, %v242_v21, 0.0  ;;  %v1053_v56 = vsel %vm72_vm0, %v243_v22, 0.0 }
  0x32   :  { %v284_v54 = vadd.f32 %v283_v61, %v282_v23  ;;  %v1057_v12 = vsel %vm72_vm0, %v244_v44, 0.0  ;;  %v1060_v17 = vsel %vm72_vm0, %v245_v3, 0.0  ;;  %v1063_v18 = vsel %vm72_vm0, %v246_v26, 0.0  ;;  %v1356_v61 = vld [vmem:[#allocation36_spill] sm:$0xff] }
  0x33   :  { %v123_v9 = vadd.f32 %v1352_v6, %v121_v62  ;;  %v1066_v20 = vsel %vm72_vm0, %v247_v27, 0.0  ;;  %v1069_v21 = vsel %vm72_vm0, %v248_v28, 0.0  ;;  %v1072_v22 = vsel %vm72_vm0, %v249_v32, 0.0 }
  0x34   :  { %v286_v5 = vadd.f32 %v285_v8, %v284_v54  ;;  %v1076_v44 = vsel %vm72_vm0, %v250_v39, 0.0  ;;  %v1079_v3 = vsel %vm72_vm0, %v251_v41, 0.0  ;;  %v1082_v26 = vsel %vm72_vm0, %v252_v45, 0.0 }
  0x35   :  { %v125_v59 = vadd.f32 %v1353_v24, %v123_v9  ;;  %v1085_v27 = vsel %vm72_vm0, %v253_v46, 0.0  ;;  %v1088_v28 = vsel %vm72_vm0, %v254_v38, 0.0  ;;  %v1091_v32 = vsel %vm72_vm0, %v255_v47, 0.0  ;;  %v1358_v9 = vld [vmem:[#allocation38_spill] sm:$0xff] }
  0x36   :  { %v288_v14 = vadd.f32 %v287_v11, %v286_v5  ;;  %v1095_v39 = vsel %vm72_vm0, %v256_v36, 0.0  ;;  %v1098_v41 = vsel %vm72_vm0, %v257_v52, 0.0  ;;  %v1101_v45 = vsel %vm72_vm0, %v258_v53, 0.0  ;;  %v1359_v24 = vld [vmem:[#allocation2_spill] sm:$0xff] }
  0x37   :  { %v127_v50 = vadd.f32 %v926_v57, %v125_v59  ;;  %v1104_v46 = vsel %vm72_vm0, %v259_v37, 0.0  ;;  %v1107_v38 = vsel %vm72_vm0, %v260_v58, 0.0  ;;  %v1110_v47 = vsel %vm72_vm0, %v261_v35, 0.0 }
  0x38   :  { %v290_v63 = vadd.f32 %v289_v13, %v288_v14  ;;  %v1114_v36 = vsel %vm72_vm0, %v262_v60, 0.0  ;;  %v1117_v52 = vsel %vm72_vm0, %v263_v4, 0.0  ;;  %v1120_v53 = vsel %vm72_vm0, %v264_v51, 0.0 }
  0x39   :  { %v129_v57 = vadd.f32 %v930_v31, %v127_v50  ;;  %v1123_v37 = vsel %vm72_vm0, %v265_v7, 0.0  ;;  %v1126_v58 = vsel %vm72_vm0, %v266_v16, 0.0  ;;  %v1129_v35 = vsel %vm72_vm0, %v267_v19, 0.0  ;;  %v1134_v31 = vld [vmem:[%s1276_s0 + $0xf8] sm:$0xff]  ;;  %v1360_v50 = vld [vmem:[#allocation39_spill] sm:$0xff] }
  0x3a   :  { %v292_v4 = vadd.f32 %v291_v10, %v290_v63  ;;  %v1138_v51 = vsel %vm72_vm0, %v268_v48, 0.0  ;;  %v1141_v7 = vsel %vm72_vm0, %v269_v29, 0.0  ;;  %v134_v16 = vsel %vm72_vm0, %v1134_v31, 0.0 }
  0x3b   :  { %v131_v60 = vadd.f32 %v936_v42, %v129_v57  ;;  %v221_v19 = vmul.f32 %v1354_v55, %v1354_v55  ;;  %v295_v2 = vsel %vm72_vm0, %v958_v15, 0.0  ;;  %v1152_v42 = vld [vmem:[%s1276_s0 + $0x100] sm:$0xff]  ;;  %v222_v8 = vmul.f32 %v1356_v61, %v1356_v61  ;;  %v1357_v15 = vld [vmem:[#allocation37_spill] sm:$0xff]  ;;  %v1361_v57 = vld [vmem:[#allocation3_spill] sm:$0xff] }
  0x3c   :  { %v294_v34 = vadd.f32 %v293_v0, %v292_v4  ;;  %v136_v29 = vsel %vm72_vm0, %v1152_v42, 0.0  ;;  %v297_v11 = vsel %vm72_vm0, %v960_v1, 0.0  ;;  %v223_v40 = vmul.f32 %v1357_v15, %v1357_v15  ;;  %v1362_v4 = vld [vmem:[#allocation40_spill] sm:$0xff]  ;;  %v1365_v61 = vld [vmem:[#allocation5_spill] sm:$0xff] }
  0x3d   :  { %v133_v48 = vadd.f32 %v1355_v33, %v131_v60  ;;  %v299_v62 = vsel %vm72_vm0, %v221_v19, 0.0  ;;  %v224_v0 = vmul.f32 %v1358_v9, %v1358_v9  ;;  %v301_v54 = vsel %vm72_vm0, %v222_v8, 0.0  ;;  %v1363_v19 = vld [vmem:[#allocation4_spill] sm:$0xff] }
  0x3e   :  { %v296_v10 = vadd.f32 %v295_v2, %v294_v34  ;;  %v225_v1 = vmul.f32 %v1360_v50, %v1360_v50  ;;  %v303_v14 = vsel %vm72_vm0, %v223_v40, 0.0  ;;  %v1367_v40 = vld [vmem:[#allocation6_spill] sm:$0xff] }
  0x3f   :  { %v135_v13 = vadd.f32 %v134_v16, %v133_v48  ;;  %v226_v16 = vmul.f32 %v1362_v4, %v1362_v4  ;;  %v305_v55 = vsel %vm72_vm0, %v224_v0, 0.0  ;;  %v1364_v48 = vld [vmem:[#allocation41_spill] sm:$0xff] }
  0x40   :  { %v298_v6 = vadd.f32 %v297_v11, %v296_v10  ;;  %v227_v34 = vmul.f32 %v1364_v48, %v1364_v48 }
  0x41   :  { %v137_v23 = vadd.f32 %v136_v29, %v135_v13  ;;  %v307_v29 = vsel %vm72_vm0, %v225_v1, 0.0  ;;  %v1366_v13 = vld [vmem:[#allocation42_spill] sm:$0xff]  ;;  %v309_v15 = vsel %vm72_vm0, %v226_v16, 0.0 }
  0x42   :  { %v300_v5 = vadd.f32 %v299_v62, %v298_v6  ;;  %v228_v10 = vmul.f32 %v1366_v13, %v1366_v13  ;;  %v1368_v6 = vld [vmem:[#allocation43_spill] sm:$0xff]  ;;  %v311_v0 = vsel %vm72_vm0, %v227_v34, 0.0 }
  0x43   :  { %v139_v59 = vadd.f32 %v1359_v24, %v137_v23  ;;  %v229_v9 = vmul.f32 %v1368_v6, %v1368_v6 }
  0x44   :  { %v302_v60 = vadd.f32 %v301_v54, %v300_v5  ;;  %v1369_v54 = vld [vmem:[#allocation7_spill] sm:$0xff]  ;;  %v1370_v5 = vld [vmem:[#allocation44_spill] sm:$0xff]  ;;  %v313_v1 = vsel %vm72_vm0, %v228_v10, 0.0 }
  0x45   :  { %v141_v63 = vadd.f32 %v1361_v57, %v139_v59  ;;  %v230_v50 = vmul.f32 %v1370_v5, %v1370_v5  ;;  %v315_v16 = vsel %vm72_vm0, %v229_v9, 0.0 }
  0x46   :  { %v304_v33 = vadd.f32 %v303_v14, %v302_v60  ;;  %v1371_v14 = vld [vmem:[#allocation8_spill] sm:$0xff]  ;;  %v1372_v60 = vld [vmem:[#allocation45_spill] sm:$0xff] }
  0x47   :  { %v143_v2 = vadd.f32 %v1363_v19, %v141_v63  ;;  %v231_v4 = vmul.f32 %v1372_v60, %v1372_v60  ;;  %v317_v34 = vsel %vm72_vm0, %v230_v50, 0.0 }
  0x48   :  { %v306_v11 = vadd.f32 %v305_v55, %v304_v33  ;;  %v1373_v55 = vld [vmem:[#allocation9_spill] sm:$0xff]  ;;  %v1374_v33 = vld [vmem:[#allocation46_spill] sm:$0xff] }
  0x49   :  { %v145_v8 = vadd.f32 %v1365_v61, %v143_v2  ;;  %v232_v48 = vmul.f32 %v1374_v33, %v1374_v33  ;;  %v319_v10 = vsel %vm72_vm0, %v231_v4, 0.0 }
  0x4a   :  { %v308_v23 = vadd.f32 %v307_v29, %v306_v11  ;;  %v1375_v29 = vld [vmem:[#allocation10_spill] sm:$0xff]  ;;  %v1376_v11 = vld [vmem:[#allocation47_spill] sm:$0xff] }
  0x4b   :  { %v147_v62 = vadd.f32 %v1367_v40, %v145_v8  ;;  %v233_v13 = vmul.f32 %v1376_v11, %v1376_v11  ;;  %v321_v9 = vsel %vm72_vm0, %v232_v48, 0.0  ;;  %v1384_v48 = vld [vmem:[#allocation15_spill] sm:$0xff]  ;;  %v1385_v11 = vld [vmem:[#allocation16_spill] sm:$0xff] }
  0x4c   :  { %v310_v59 = vadd.f32 %v309_v15, %v308_v23  ;;  %v1377_v15 = vld [vmem:[#allocation11_spill] sm:$0xff]  ;;  %v1378_v23 = vld [vmem:[#allocation48_spill] sm:$0xff] }
  0x4d   :  { %v149_v24 = vadd.f32 %v1369_v54, %v147_v62  ;;  %v234_v6 = vmul.f32 %v1378_v23, %v1378_v23  ;;  %v323_v50 = vsel %vm72_vm0, %v233_v13, 0.0 }
  0x4e   :  { %v312_v63 = vadd.f32 %v311_v0, %v310_v59  ;;  %v1379_v0 = vld [vmem:[#allocation12_spill] sm:$0xff] }
  0x4f   :  { %v151_v57 = vadd.f32 %v1371_v14, %v149_v24  ;;  %v1380_v59 = vld [vmem:[#allocation52_spill] sm:$0xff]  ;;  %v325_v4 = vsel %vm72_vm0, %v234_v6, 0.0  ;;  %v1387_v6 = vld [vmem:[#allocation18_spill] sm:$0xff] }
  0x50   :  { %v314_v2 = vadd.f32 %v313_v1, %v312_v63  ;;  %v235_v5 = vmul.f32 %v1380_v59, %v1380_v59  ;;  %v1381_v1 = vld [vmem:[#allocation13_spill] sm:$0xff] }
  0x51   :  { %v153_v19 = vadd.f32 %v1373_v55, %v151_v57  ;;  %v1382_v63 = vld [vmem:[#allocation53_spill] sm:$0xff] }
  0x52   :  { %v316_v8 = vadd.f32 %v315_v16, %v314_v2  ;;  %v236_v60 = vmul.f32 %v1382_v63, %v1382_v63  ;;  %v1383_v16 = vld [vmem:[#allocation14_spill] sm:$0xff]  ;;  %v237_v2 = vmul.f32 %v1134_v31, %v1134_v31  ;;  %v327_v33 = vsel %vm72_vm0, %v235_v5, 0.0  ;;  %v1389_v5 = vld [vmem:[#allocation20_spill] sm:$0xff] }
  0x53   :  { %v155_v61 = vadd.f32 %v1375_v29, %v153_v19  ;;  %v1391_v63 = vld [vmem:[#allocation22_spill] sm:$0xff] }
  0x54   :  { %v318_v62 = vadd.f32 %v317_v34, %v316_v8  ;;  %v329_v8 = vsel %vm72_vm0, %v236_v60, 0.0 }
  0x55   :  { %v157_v40 = vadd.f32 %v1377_v15, %v155_v61  ;;  %v238_v61 = vmul.f32 %v1152_v42, %v1152_v42  ;;  %v331_v15 = vsel %vm72_vm0, %v237_v2, 0.0  ;;  %v1393_v2 = vld [vmem:[#allocation24_spill] sm:$0xff] }
  0x56   :  { %v320_v24 = vadd.f32 %v319_v10, %v318_v62 }
  0x57   :  { %v159_v54 = vadd.f32 %v1379_v0, %v157_v40  ;;  %v1386_v40 = vld [vmem:[#allocation17_spill] sm:$0xff]  ;;  %v333_v31 = vsel %vm72_vm0, %v238_v61, 0.0  ;;  %v1395_v61 = vld [vmem:[#allocation27_spill] sm:$0xff] }
  0x58   :  { %v322_v57 = vadd.f32 %v321_v9, %v320_v24 }
  0x59   :  { %v161_v14 = vadd.f32 %v1381_v1, %v159_v54  ;;  %v1388_v54 = vld [vmem:[#allocation19_spill] sm:$0xff]  ;;  %v1390_v1 = vld [vmem:[#allocation21_spill] sm:$0xff] }
  0x5a   :  { %v324_v19 = vadd.f32 %v323_v50, %v322_v57 }
  0x5b   :  { %v163_v55 = vadd.f32 %v1383_v16, %v161_v14  ;;  %v1392_v16 = vld [vmem:[#allocation23_spill] sm:$0xff] }
  0x5c   :  { %v326_v29 = vadd.f32 %v325_v4, %v324_v19 }
  0x5d   :  { %v165_v34 = vadd.f32 %v1384_v48, %v163_v55 }
  0x5e   :  { %v328_v10 = vadd.f32 %v327_v33, %v326_v29 }
  0x5f   :  { %v167_v13 = vadd.f32 %v1385_v11, %v165_v34  ;;  %v1394_v34 = vld [vmem:[#allocation25_spill] sm:$0xff]  ;;  %v1396_v11 = vld [vmem:[#allocation28_spill] sm:$0xff] }
  0x60   :  { %v330_v23 = vadd.f32 %v329_v8, %v328_v10  ;;  %v1397_v10 = vld [vmem:[#allocation29_spill] sm:$0xff] }
  0x61   :  { %v169_v62 = vadd.f32 %v1386_v40, %v167_v13  ;;  %v1398_v40 = vld [vmem:[#allocation31_spill] sm:$0xff] }
  0x62   :  { %v332_v0 = vadd.f32 %v331_v15, %v330_v23  ;;  %v1399_v23 = vld [vmem:[#allocation32_spill] sm:$0xff] }
  0x63   :  { %v171_v9 = vadd.f32 %v1387_v6, %v169_v62  ;;  %v1400_v6 = vld [vmem:[#allocation33_spill] sm:$0xff] }
  0x64   :  { %v334_v59 = vadd.f32 %v333_v31, %v332_v0  ;;  %v1401_v0 = vld [vmem:[#allocation34_spill] sm:$0xff] }
  0x65   :  { %v173_v24 = vadd.f32 %v1388_v54, %v171_v9 }
  0x66   :  { %v336_v50 = vadd.f32 %v1041_v49, %v334_v59 }
  0x67   :  { %v175_v42 = vadd.f32 %v1389_v5, %v173_v24 }
  0x68   :  { %v338_v57 = vadd.f32 %v1044_v30, %v336_v50 }
  0x69   :  { %v177_v14 = vadd.f32 %v1390_v1, %v175_v42 }
  0x6a   :  { %v340_v4 = vadd.f32 %v1047_v25, %v338_v57 }
  0x6b   :  { %v179_v60 = vadd.f32 %v1391_v63, %v177_v14 }
  0x6c   :  { %v342_v19 = vadd.f32 %v1050_v43, %v340_v4 }
  0x6d   :  { %v181_v55 = vadd.f32 %v1392_v16, %v179_v60 }
  0x6e   :  { %v344_v48 = vadd.f32 %v1053_v56, %v342_v19 }
  0x6f   :  { %v183_v33 = vadd.f32 %v1393_v2, %v181_v55 }
  0x70   :  { %v346_v49 = vadd.f32 %v1057_v12, %v344_v48 }
  0x71   :  { %v185_v29 = vadd.f32 %v1394_v34, %v183_v33 }
  0x72   :  { %v348_v30 = vadd.f32 %v1060_v17, %v346_v49 }
  0x73   :  { %v187_v8 = vadd.f32 %v1395_v61, %v185_v29 }
  0x74   :  { %v350_v25 = vadd.f32 %v1063_v18, %v348_v30 }
  0x75   :  { %v189_v13 = vadd.f32 %v1396_v11, %v187_v8 }
  0x76   :  { %v352_v43 = vadd.f32 %v1066_v20, %v350_v25 }
  0x77   :  { %v191_v15 = vadd.f32 %v1397_v10, %v189_v13 }
  0x78   :  { %v354_v56 = vadd.f32 %v1069_v21, %v352_v43 }
  0x79   :  { %v193_v62 = vadd.f32 %v1398_v40, %v191_v15 }
  0x7a   :  { %v356_v12 = vadd.f32 %v1072_v22, %v354_v56 }
  0x7b   :  { %v195_v31 = vadd.f32 %v1399_v23, %v193_v62 }
  0x7c   :  { %v358_v17 = vadd.f32 %v1076_v44, %v356_v12 }
  0x7d   :  { %v197_v9 = vadd.f32 %v1400_v6, %v195_v31 }
  0x7e   :  { %v360_v18 = vadd.f32 %v1079_v3, %v358_v17 }
  0x7f   :  { %v199_v54 = vadd.f32 %v1401_v0, %v197_v9 }
  0x80   :  { %v362_v24 = vadd.f32 %v1082_v26, %v360_v18 }
  0x81   :  { %v200_v1 = vrot.slane %v199_v54, 4 }
  0x82   :  { %v364_v20 = vadd.f32 %v1085_v27, %v362_v24 }
  0x84   :  { %v366_v59 = vadd.f32 %v1088_v28, %v364_v20 }
  0x86   :  { %v368_v21 = vadd.f32 %v1091_v32, %v366_v59 }
  0x88   :  { %v370_v5 = vadd.f32 %v1095_v39, %v368_v21  ;;  %v201_v39 = vadd.f32 %v200_v1, %v199_v54 }
  0x8a   :  { %v372_v22 = vadd.f32 %v1098_v41, %v370_v5  ;;  %v202_v14 = vrot.slane %v201_v39, 2 }
  0x8c   :  { %v374_v42 = vadd.f32 %v1101_v45, %v372_v22 }
  0x8e   :  { %v376_v44 = vadd.f32 %v1104_v46, %v374_v42 }
  0x90   :  { %v378_v50 = vadd.f32 %v1107_v38, %v376_v44 }
  0x92   :  { %v380_v3 = vadd.f32 %v1110_v47, %v378_v50  ;;  %v203_v47 = vadd.f32 %v202_v14, %v201_v39 }
  0x94   :  { %v382_v26 = vadd.f32 %v1114_v36, %v380_v3  ;;  %v204_v63 = vrot.slane %v203_v47, 1 }
  0x96   :  { %v384_v27 = vadd.f32 %v1117_v52, %v382_v26  ;;  %v205_v4 = vadd.f32 %v204_v63, %v203_v47 }
  0x98   :  { %v386_v28 = vadd.f32 %v1120_v53, %v384_v27 }
  0x9a   :  { %v388_v32 = vadd.f32 %v1123_v37, %v386_v28 }
  0x9c   :  { %v390_v41 = vadd.f32 %v1126_v58, %v388_v32 }
  0x9e   :  { %v392_v45 = vadd.f32 %v1129_v35, %v390_v41 }
  0xa0   :  { %v394_v46 = vadd.f32 %v1138_v51, %v392_v45 }
  0xa2   :  { %v396_v38 = vadd.f32 %v1141_v7, %v394_v46 }
  0xa4   :  { %v397_v57 = vrot.slane %v396_v38, 4 }
  0xa6   :  { %v398_v36 = vadd.f32 %v397_v57, %v396_v38 }
  0xa8   :  { %v399_v52 = vrot.slane %v398_v36, 2 }
  0xaa   :  { %v400_v60 = vadd.f32 %v399_v52, %v398_v36 }
  0xac   :  { %v401_v53 = vrot.slane %v400_v60, 1 }
  0xae   :  { %v402_v37 = vadd.f32 %v401_v53, %v400_v60 }
  0xb0   :  { %v404_v16 = vsel %vm403_vm1, %v205_v4, %v402_v37 }
  0xb1   :  { %406 = vst.msk [vmem:[%s1277_s1] sm:$0x3] %vm405_vm2, %v404_v16 }

// kernel: residual_block_nhwc.4
= control target key start
LH: loop header
LB: loop body
LE: loop exit
PB: predicated region body
PF: predicated region fallthrough
CT: control target
= control target key end

     0   :  { %vm423_vm0 = vcmask 1041408   ;;  %vm326_vm1 = vcmask 31744   ;;  %vm1307_vm2 = vcmask 60416   ;;  %vm716_vm3 = vcmask 64512   ;;  %s2841_s2 = inlined_call_operand.vmem [shape: bf16[4,8], index: 2, kind: input, shape index: {}]   ;;  %s2842_s0 = inlined_call_operand.vmem [shape: f32[32,16,4], index: 0, kind: input, shape index: {}]   ;;  %s2843_s1 = inlined_call_operand.vmem [shape: f32[2,4], index: 1, kind: input, shape index: {}]   ;;  %s2844_s3 = inlined_call_operand.vmem [shape: f32[1,8], index: 3, kind: input, shape index: {}]   ;;  %s2845_s4 = inlined_call_operand.vmem [shape: bf16[32,16,8], index: 4, kind: output, shape index: {0}]   ;;  %s2846_s5 = inlined_call_operand.vmem [shape: f32[1,2,8], index: 5, kind: output, shape index: {1}]  }
   0x1   :  { %v318_v0 = vld [vmem:[%s2841_s2] sm:$0x3]  ;;  %v21_v2 = vld [vmem:[%s2842_s0 + $0x8] sm:$0xff]  ;;  %v22_v6 = vld [vmem:[%s2842_s0 + $0x10] sm:$0xff]  ;;  %vm1047_vm4 = vcmask 1040384   ;;  %vm1049_vm5 = vcmask 58368  }
   0x2   :  { %v20_v1 = vld [vmem:[%s2842_s0] sm:$0xff]  ;;  %1644 = vmatprep.subr.msk.bf16.mxu0 %vm423_vm0, %v318_v0  ;;  %v425_v3 = vsel %vm423_vm0, %v318_v0, 0  ;;  %1645 = vmatprep.subr.msk.bf16.mxu1 %vm423_vm0, %v318_v0  ;;  %v23_v9 = vld [vmem:[%s2842_s0 + $0x18] sm:$0xff]  ;;  %v25_v12 = vld [vmem:[%s2842_s0 + $0x28] sm:$0xff] }
   0x3   :  { %v1689_v4 = vld [vmem:[%s2843_s1] ss:$0 sm:$0xff]  ;;  %v1694_v5 = vld [vmem:[%s2843_s1 + $0x1] ss:$0 sm:$0xff]  ;;  %1577 = vmatpush3.bf16.msra.mxu0 %v425_v3  ;;  %1643 = vmatpush3.bf16.msra.mxu1 %v425_v3  ;;  %v26_v16 = vld [vmem:[%s2842_s0 + $0x30] sm:$0xff] }
   0x4   :  { %v89_v7 = vmul.f32 %v1689_v4, %v20_v1  ;;  %v90_v8 = vmul.f32 %v1689_v4, %v21_v2  ;;  %v91_v10 = vmul.f32 %v1689_v4, %v22_v6  ;;  %v24_v11 = vld [vmem:[%s2842_s0 + $0x20] sm:$0xff]  ;;  %v92_v13 = vmul.f32 %v1689_v4, %v23_v9  ;;  %v27_v17 = vld [vmem:[%s2842_s0 + $0x38] sm:$0xff]  ;;  %v29_v27 = vld [vmem:[%s2842_s0 + $0x48] sm:$0xff] }
   0x5   :  { %v93_v14 = vmul.f32 %v1689_v4, %v24_v11  ;;  %v94_v15 = vmul.f32 %v1689_v4, %v25_v12  ;;  %v95_v21 = vmul.f32 %v1689_v4, %v26_v16  ;;  %v96_v25 = vmul.f32 %v1689_v4, %v27_v17  ;;  %v28_v26 = vld [vmem:[%s2842_s0 + $0x40] sm:$0xff]  ;;  %v30_v32 = vld [vmem:[%s2842_s0 + $0x50] sm:$0xff]  ;;  %v31_v37 = vld [vmem:[%s2842_s0 + $0x58] sm:$0xff] }
   0x6   :  { %v158_v18 = vadd.f32 %v1694_v5, %v89_v7  ;;  %v159_v19 = vadd.f32 %v1694_v5, %v90_v8  ;;  %v160_v20 = vadd.f32 %v1694_v5, %v91_v10  ;;  %v161_v22 = vadd.f32 %v1694_v5, %v92_v13  ;;  %v32_v38 = vld [vmem:[%s2842_s0 + $0x60] sm:$0xff]  ;;  %v33_v42 = vld [vmem:[%s2842_s0 + $0x68] sm:$0xff]  ;;  %v34_v46 = vld [vmem:[%s2842_s0 + $0x70] sm:$0xff] }
   0x7   :  { %v162_v23 = vadd.f32 %v1694_v5, %v93_v14  ;;  %v163_v24 = vadd.f32 %v1694_v5, %v94_v15  ;;  %v164_v31 = vadd.f32 %v1694_v5, %v95_v21  ;;  %v165_v36 = vadd.f32 %v1694_v5, %v96_v25  ;;  %v35_v55 = vld [vmem:[%s2842_s0 + $0x78] sm:$0xff]  ;;  %v36_v56 = vld [vmem:[%s2842_s0 + $0x80] sm:$0xff]  ;;  %v37_v60 = vld [vmem:[%s2842_s0 + $0x88] sm:$0xff] }
   0x8   :  { %v222_v28 = vmax.f32 %v158_v18, 0.0  ;;  %v223_v29 = vmax.f32 %v159_v19, 0.0  ;;  %v224_v30 = vmax.f32 %v160_v20, 0.0  ;;  %v225_v33 = vmax.f32 %v161_v22, 0.0  ;;  %v38_v0 = vld [vmem:[%s2842_s0 + $0x90] sm:$0xff]  ;;  %v39_v1 = vld [vmem:[%s2842_s0 + $0x98] sm:$0xff] }
   0x9   :  { %v226_v34 = vmax.f32 %v162_v23, 0.0  ;;  %v227_v35 = vmax.f32 %v163_v24, 0.0  ;;  %v97_v40 = vmul.f32 %v1689_v4, %v28_v26  ;;  %v98_v41 = vmul.f32 %v1689_v4, %v29_v27  ;;  %v40_v6 = vld [vmem:[%s2842_s0 + $0xa0] sm:$0xff]  ;;  %v41_v10 = vld [vmem:[%s2842_s0 + $0xa8] sm:$0xff]  ;;  %v42_v15 = vld [vmem:[%s2842_s0 + $0xb0] sm:$0xff] }
   0xa   :  { %v286_v39 = vpack.c.bf16 %v223_v29, %v222_v28  ;;  %v287_v43 = vpack.c.bf16 %v225_v33, %v224_v30  ;;  %v99_v45 = vmul.f32 %v1689_v4, %v30_v32  ;;  %v100_v49 = vmul.f32 %v1689_v4, %v31_v37  ;;  %v43_v20 = vld [vmem:[%s2842_s0 + $0xb8] sm:$0xff]  ;;  %v44_v25 = vld [vmem:[%s2842_s0 + $0xc0] sm:$0xff]  ;;  %v45_v29 = vld [vmem:[%s2842_s0 + $0xc8] sm:$0xff] }
   0xb   :  { %v288_v44 = vpack.c.bf16 %v227_v35, %v226_v34  ;;  %v166_v47 = vadd.f32 %v1694_v5, %v97_v40  ;;  %v167_v48 = vadd.f32 %v1694_v5, %v98_v41  ;;  %v101_v50 = vmul.f32 %v1689_v4, %v32_v38  ;;  %v46_v33 = vld [vmem:[%s2842_s0 + $0xd0] sm:$0xff] }
   0xc   :  { %1578 = vmatprep.mubr.msk.bf16.mxu0 %vm326_vm1, %v286_v39  ;;  %v228_v51 = vmax.f32 %v164_v31, 0.0  ;;  %v229_v52 = vmax.f32 %v165_v36, 0.0  ;;  %v168_v53 = vadd.f32 %v1694_v5, %v99_v45  ;;  %v102_v54 = vmul.f32 %v1689_v4, %v33_v42  ;;  %v47_v42 = vld [vmem:[%s2842_s0 + $0xd8] sm:$0xff] }
   0xd   :  { %1579 = vmatmul.mubr.msk.bf16.vlgmr.msra.gmra.mxu0 %vm326_vm1, %v287_v43  ;;  %v230_v57 = vmax.f32 %v166_v47, 0.0  ;;  %v231_v58 = vmax.f32 %v167_v48, 0.0  ;;  %v103_v59 = vmul.f32 %v1689_v4, %v34_v46  ;;  %v169_v61 = vadd.f32 %v1694_v5, %v100_v49  ;;  %v48_v47 = vld [vmem:[%s2842_s0 + $0xe0] sm:$0xff] }
   0xe   :  { %1582 = vmatprep.mubr.msk.bf16.mxu0 %vm326_vm1, %v288_v44  ;;  %v170_v62 = vadd.f32 %v1694_v5, %v101_v50  ;;  %v171_v63 = vadd.f32 %v1694_v5, %v102_v54  ;;  %v104_v2 = vmul.f32 %v1689_v4, %v35_v55  ;;  %v105_v3 = vmul.f32 %v1689_v4, %v36_v56  ;;  %v52_v54 = vld [vmem:[%s2842_s0 + $0x100] sm:$0xff]  ;;  %v49_v56 = vld [vmem:[%s2842_s0 + $0xe8] sm:$0xff] }
   0xf   :  { %v289_v7 = vpack.c.bf16 %v229_v52, %v228_v51  ;;  %v232_v8 = vmax.f32 %v168_v53, 0.0  ;;  %v106_v9 = vmul.f32 %v1689_v4, %v37_v60  ;;  %v290_v11 = vpack.c.bf16 %v231_v58, %v230_v57  ;;  %v53_v58 = vld [vmem:[%s2842_s0 + $0x108] sm:$0xff] }
  0x10   :  { %v172_v12 = vadd.f32 %v1694_v5, %v103_v59  ;;  %v107_v13 = vmul.f32 %v1689_v4, %v38_v0  ;;  %v108_v14 = vmul.f32 %v1689_v4, %v39_v1  ;;  %v233_v16 = vmax.f32 %v169_v61, 0.0  ;;  %v55_v0 = vld [vmem:[%s2842_s0 + $0x118] sm:$0xff] }
  0x11   :  { %v234_v17 = vmax.f32 %v170_v62, 0.0  ;;  %v235_v18 = vmax.f32 %v171_v63, 0.0  ;;  %v109_v19 = vmul.f32 %v1689_v4, %v40_v6  ;;  %v173_v21 = vadd.f32 %v1694_v5, %v104_v2  ;;  %v54_v63 = vld [vmem:[%s2842_s0 + $0x110] sm:$0xff] }
  0x12   :  { %v174_v22 = vadd.f32 %v1694_v5, %v105_v3  ;;  %v175_v23 = vadd.f32 %v1694_v5, %v106_v9  ;;  %v110_v24 = vmul.f32 %v1689_v4, %v41_v10  ;;  %v176_v26 = vadd.f32 %v1694_v5, %v107_v13  ;;  %v50_v6 = vld [vmem:[%s2842_s0 + $0xf0] sm:$0xff]  ;;  %v57_v13 = vld [vmem:[%s2842_s0 + $0x128] sm:$0xff] }
  0x13   :  { %v177_v27 = vadd.f32 %v1694_v5, %v108_v14  ;;  %v111_v28 = vmul.f32 %v1689_v4, %v42_v15  ;;  %v178_v30 = vadd.f32 %v1694_v5, %v109_v19  ;;  %v112_v32 = vmul.f32 %v1689_v4, %v43_v20 }
  0x14   :  { %v179_v31 = vadd.f32 %v1694_v5, %v110_v24  ;;  %v291_v34 = vpack.c.bf16 %v233_v16, %v232_v8  ;;  %v292_v35 = vpack.c.bf16 %v235_v18, %v234_v17  ;;  %v236_v36 = vmax.f32 %v172_v12, 0.0  ;;  %v56_v8 = vld [vmem:[%s2842_s0 + $0x120] sm:$0xff]  ;;  %v58_v18 = vld [vmem:[%s2842_s0 + $0x130] sm:$0xff] }
  0x15   :  { %1583 = vmatmul.mubr.msk.bf16.gmra.mxu0 %vm326_vm1, %v289_v7  ;;  %v113_v37 = vmul.f32 %v1689_v4, %v44_v25  ;;  %v237_v38 = vmax.f32 %v173_v21, 0.0  ;;  %v238_v39 = vmax.f32 %v174_v22, 0.0  ;;  %v239_v40 = vmax.f32 %v175_v23, 0.0  ;;  %v59_v23 = vld [vmem:[%s2842_s0 + $0x138] sm:$0xff] }
  0x16   :  { %1586 = vmatprep.mubr.msk.bf16.mxu0 %vm326_vm1, %v290_v11  ;;  %v114_v41 = vmul.f32 %v1689_v4, %v45_v29  ;;  %v240_v43 = vmax.f32 %v176_v26, 0.0  ;;  %v241_v44 = vmax.f32 %v177_v27, 0.0  ;;  %v1828_v45 = vadd.f32 %v1694_v5, %v111_v28  ;;  %v60_v28 = vld [vmem:[%s2842_s0 + $0x140] sm:$0xff] }
  0x17   :  { %v115_v46 = vmul.f32 %v1689_v4, %v46_v33  ;;  %v242_v48 = vmax.f32 %v178_v30, 0.0  ;;  %v243_v49 = vmax.f32 %v179_v31, 0.0  ;;  %v1835_v50 = vadd.f32 %v1694_v5, %v112_v32  ;;  %v61_v33 = vld [vmem:[%s2842_s0 + $0x148] sm:$0xff] }
  0x18   :  { %v1838_v51 = vadd.f32 %v1694_v5, %v113_v37  ;;  %v1841_v52 = vadd.f32 %v1694_v5, %v114_v41  ;;  %v116_v53 = vmul.f32 %v1689_v4, %v47_v42  ;;  %v293_v55 = vpack.c.bf16 %v237_v38, %v236_v36  ;;  %v62_v38 = vld [vmem:[%s2842_s0 + $0x150] sm:$0xff] }
  0x19   :  { %v117_v57 = vmul.f32 %v1689_v4, %v48_v47  ;;  %v294_v59 = vpack.c.bf16 %v239_v40, %v238_v39  ;;  %v1855_v60 = vpack.c.bf16 %v241_v44, %v240_v43  ;;  %v244_v61 = vmax.f32 %v1828_v45, 0.0  ;;  %v63_v39 = vld [vmem:[%s2842_s0 + $0x158] sm:$0xff]  ;;  %v64_v44 = vld [vmem:[%s2842_s0 + $0x160] sm:$0xff] }
  0x1a   :  { %v1859_v62 = vadd.f32 %v1694_v5, %v115_v46  ;;  %v1868_v1 = vpack.c.bf16 %v243_v49, %v242_v48  ;;  %v245_v2 = vmax.f32 %v1835_v50, 0.0  ;;  %v246_v3 = vmax.f32 %v1838_v51, 0.0  ;;  %v75_v45 = vld [vmem:[%s2842_s0 + $0x1b8] sm:$0xff] }
  0x1b   :  { %v121_v7 = vmul.f32 %v1689_v4, %v52_v54  ;;  %v247_v9 = vmax.f32 %v1841_v52, 0.0  ;;  %v1881_v10 = vadd.f32 %v1694_v5, %v116_v53  ;;  %v118_v11 = vmul.f32 %v1689_v4, %v49_v56  ;;  %v65_v53 = vld [vmem:[%s2842_s0 + $0x168] sm:$0xff] }
  0x1c   :  { %v122_v12 = vmul.f32 %v1689_v4, %v53_v58  ;;  %v1889_v14 = vadd.f32 %v1694_v5, %v117_v57  ;;  %v123_v16 = vmul.f32 %v1689_v4, %v54_v63  ;;  %v124_v17 = vmul.f32 %v1689_v4, %v55_v0  ;;  %v66_v58 = vld [vmem:[%s2842_s0 + $0x170] sm:$0xff] }
  0x1d   :  { %1587 = vmatmul.mubr.msk.bf16.gmra.mxu0 %vm326_vm1, %v291_v34  ;;  %v190_v15 = vadd.f32 %v1694_v5, %v121_v7  ;;  %v248_v19 = vmax.f32 %v1859_v62, 0.0  ;;  %v119_v20 = vmul.f32 %v1689_v4, %v50_v6  ;;  %v125_v22 = vmul.f32 %v1689_v4, %v56_v8  ;;  %v67_v8 = vld [vmem:[%s2842_s0 + $0x178] sm:$0xff]  ;;  %v72_v62 = vld [vmem:[%s2842_s0 + $0x1a0] sm:$0xff] }
  0x1e   :  { %1590 = vmatprep.mubr.msk.bf16.mxu0 %vm326_vm1, %v292_v35  ;;  %v191_v21 = vadd.f32 %v1694_v5, %v122_v12  ;;  %v192_v25 = vadd.f32 %v1694_v5, %v123_v16  ;;  %v193_v26 = vadd.f32 %v1694_v5, %v124_v17  ;;  %v126_v27 = vmul.f32 %v1689_v4, %v57_v13  ;;  %v68_v16 = vld [vmem:[%s2842_s0 + $0x180] sm:$0xff] }
  0x1f   :  { %v254_v24 = vmax.f32 %v190_v15, 0.0  ;;  %v1911_v29 = vadd.f32 %v1694_v5, %v118_v11  ;;  %v194_v31 = vadd.f32 %v1694_v5, %v125_v22  ;;  %v127_v32 = vmul.f32 %v1689_v4, %v58_v18 }
  0x20   :  { %v255_v30 = vmax.f32 %v191_v21, 0.0  ;;  %v256_v34 = vmax.f32 %v192_v25, 0.0  ;;  %v257_v35 = vmax.f32 %v193_v26, 0.0  ;;  %v195_v36 = vadd.f32 %v1694_v5, %v126_v27  ;;  %v69_v27 = vld [vmem:[%s2842_s0 + $0x188] sm:$0xff] }
  0x21   :  { %v128_v37 = vmul.f32 %v1689_v4, %v59_v23  ;;  %v258_v41 = vmax.f32 %v194_v31, 0.0  ;;  %v196_v42 = vadd.f32 %v1694_v5, %v127_v32  ;;  %v129_v43 = vmul.f32 %v1689_v4, %v60_v28 }
  0x22   :  { %v302_v40 = vpack.c.bf16 %v255_v30, %v254_v24  ;;  %v303_v46 = vpack.c.bf16 %v257_v35, %v256_v34  ;;  %v259_v47 = vmax.f32 %v195_v36, 0.0  ;;  %v130_v49 = vmul.f32 %v1689_v4, %v61_v33  ;;  %v70_v36 = vld [vmem:[%s2842_s0 + $0x190] sm:$0xff] }
  0x23   :  { %v197_v48 = vadd.f32 %v1694_v5, %v128_v37  ;;  %v260_v54 = vmax.f32 %v196_v42, 0.0  ;;  %v131_v56 = vmul.f32 %v1689_v4, %v62_v38  ;;  %v132_v57 = vmul.f32 %v1689_v4, %v63_v39 }
  0x24   :  { %1610 = vmatprep.mubr.msk.bf16.mxu1 %vm326_vm1, %v302_v40  ;;  %v304_v63 = vpack.c.bf16 %v259_v47, %v258_v41  ;;  %v199_v6 = vadd.f32 %v1694_v5, %v130_v49  ;;  %v133_v7 = vmul.f32 %v1689_v4, %v64_v44  ;;  %v134_v15 = vmul.f32 %v1689_v4, %v65_v53  ;;  %v71_v40 = vld [vmem:[%s2842_s0 + $0x198] sm:$0xff]  ;;  %v73_v41 = vld [vmem:[%s2842_s0 + $0x1a8] sm:$0xff]  ;;  %v78_v49 = vld [vmem:[%s2842_s0 + $0x1d0] sm:$0xff] }
  0x25   :  { %1591 = vmatmul.mubr.msk.bf16.gmra.mxu0 %vm326_vm1, %v293_v55  ;;  %v198_v55 = vadd.f32 %v1694_v5, %v129_v43  ;;  %1611 = vmatmul.mubr.msk.bf16.vlgmr.msra.gmra.mxu1 %vm326_vm1, %v303_v46  ;;  %v261_v0 = vmax.f32 %v197_v48, 0.0  ;;  %v200_v12 = vadd.f32 %v1694_v5, %v131_v56  ;;  %v201_v13 = vadd.f32 %v1694_v5, %v132_v57  ;;  %v77_v43 = vld [vmem:[%s2842_s0 + $0x1c8] sm:$0xff]  ;;  %v79_v53 = vld [vmem:[%s2842_s0 + $0x1d8] sm:$0xff] }
  0x26   :  { %1594 = vmatprep.mubr.msk.bf16.mxu0 %vm326_vm1, %v294_v59  ;;  %v51_v59 = vld [vmem:[%s2842_s0 + $0xf8] sm:$0xff]  ;;  %v249_v17 = vmax.f32 %v1881_v10, 0.0  ;;  %1614 = vmatprep.mubr.msk.bf16.mxu1 %vm326_vm1, %v304_v63  ;;  %v263_v18 = vmax.f32 %v199_v6, 0.0  ;;  %v202_v21 = vadd.f32 %v1694_v5, %v133_v7  ;;  %v135_v22 = vmul.f32 %v1689_v4, %v66_v58  ;;  %v80_v58 = vld [vmem:[%s2842_s0 + $0x1e0] sm:$0xff]  ;;  %v81_v7 = vld [vmem:[%s2842_s0 + $0x1e8] sm:$0xff] }
  0x27   :  { %v262_v11 = vmax.f32 %v198_v55, 0.0  ;;  %v250_v23 = vmax.f32 %v1889_v14, 0.0  ;;  %v120_v24 = vmul.f32 %v1689_v4, %v51_v59  ;;  %v203_v25 = vadd.f32 %v1694_v5, %v134_v15  ;;  %v82_v15 = vld [vmem:[%s2842_s0 + $0x1f0] sm:$0xff] }
  0x28   :  { %v136_v26 = vmul.f32 %v1689_v4, %v67_v8  ;;  %v251_v10 = vmax.f32 %v1911_v29, 0.0  ;;  %v1973_v28 = vadd.f32 %v1694_v5, %v119_v20  ;;  %v305_v30 = vpack.c.bf16 %v261_v0, %v260_v54 }
  0x29   :  { %v137_v31 = vmul.f32 %v1689_v4, %v68_v16  ;;  %v306_v14 = vpack.c.bf16 %v263_v18, %v262_v11  ;;  %v264_v32 = vmax.f32 %v200_v12, 0.0  ;;  %v265_v33 = vmax.f32 %v201_v13, 0.0 }
  0x2a   :  { %v1979_v34 = vadd.f32 %v1694_v5, %v135_v22  ;;  %v266_v35 = vmax.f32 %v202_v21, 0.0  ;;  %v267_v29 = vmax.f32 %v203_v25, 0.0  ;;  %v138_v20 = vmul.f32 %v1689_v4, %v69_v27  ;;  %v83_v22 = vld [vmem:[%s2842_s0 + $0x1f8] sm:$0xff] }
  0x2b   :  { %v297_v37 = vpack.c.bf16 %v245_v2, %v244_v61  ;;  %v2000_v38 = vpack.c.bf16 %v249_v17, %v248_v19  ;;  %v2003_v39 = vadd.f32 %v1694_v5, %v136_v26  ;;  %v2011_v50 = vpack.c.bf16 %v251_v10, %v250_v23  ;;  %v76_v2 = vld [vmem:[%s2842_s0 + $0x1c0] sm:$0xff] }
  0x2c   :  { %v2014_v51 = vadd.f32 %v1694_v5, %v120_v24  ;;  %v252_v52 = vmax.f32 %v1973_v28, 0.0  ;;  %v2019_v61 = vadd.f32 %v1694_v5, %v137_v31  ;;  %v139_v19 = vmul.f32 %v1689_v4, %v70_v36  ;;  %v2108_v28 = vld [vmem:[%s2844_s3] ss:$0 sm:$0xff] }
  0x2d   :  { %1595 = vmatmul.mubr.msk.bf16.gmra.mxu0 %vm326_vm1, %v1855_v60  ;;  %v74_v60 = vld [vmem:[%s2842_s0 + $0x1b0] sm:$0xff]  ;;  %1615 = vmatmul.mubr.msk.bf16.gmra.mxu1 %vm326_vm1, %v305_v30  ;;  %v308_v44 = vpack.c.bf16 %v267_v29, %v266_v35  ;;  %v207_v46 = vadd.f32 %v1694_v5, %v138_v20  ;;  %v140_v47 = vmul.f32 %v1689_v4, %v71_v40  ;;  %v269_v54 = vmax.f32 %v2003_v39, 0.0 }
  0x2e   :  { %1598 = vmatprep.mubr.msk.bf16.mxu0 %vm326_vm1, %v1868_v1  ;;  %v298_v1 = vpack.c.bf16 %v247_v9, %v246_v3  ;;  %1618 = vmatprep.mubr.msk.bf16.mxu1 %vm326_vm1, %v306_v14  ;;  %v307_v3 = vpack.c.bf16 %v265_v33, %v264_v32  ;;  %v268_v9 = vmax.f32 %v1979_v34, 0.0  ;;  %v143_v42 = vmul.f32 %v1689_v4, %v74_v60 }
  0x2f   :  { %v144_v48 = vmul.f32 %v1689_v4, %v75_v45  ;;  %v141_v55 = vmul.f32 %v1689_v4, %v72_v62  ;;  %v145_v57 = vmul.f32 %v1689_v4, %v76_v2  ;;  %v270_v59 = vmax.f32 %v2019_v61, 0.0 }
  0x30   :  { %v212_v56 = vadd.f32 %v1694_v5, %v143_v42  ;;  %v142_v63 = vmul.f32 %v1689_v4, %v73_v41  ;;  %v146_v6 = vmul.f32 %v1689_v4, %v77_v43  ;;  %v147_v12 = vmul.f32 %v1689_v4, %v78_v49 }
  0x31   :  { %v213_v0 = vadd.f32 %v1694_v5, %v144_v48  ;;  %v214_v11 = vadd.f32 %v1694_v5, %v145_v57  ;;  %v148_v13 = vmul.f32 %v1689_v4, %v79_v53  ;;  %v271_v16 = vmax.f32 %v207_v46, 0.0 }
  0x32   :  { %v276_v8 = vmax.f32 %v212_v56, 0.0  ;;  %v215_v18 = vadd.f32 %v1694_v5, %v146_v6  ;;  %v149_v21 = vmul.f32 %v1689_v4, %v80_v58  ;;  %v216_v24 = vadd.f32 %v1694_v5, %v147_v12 }
  0x33   :  { %v277_v17 = vmax.f32 %v213_v0, 0.0  ;;  %v278_v23 = vmax.f32 %v214_v11, 0.0  ;;  %v217_v25 = vadd.f32 %v1694_v5, %v148_v13  ;;  %v150_v26 = vmul.f32 %v1689_v4, %v81_v7 }
  0x34   :  { %v279_v10 = vmax.f32 %v215_v18, 0.0  ;;  %v218_v30 = vadd.f32 %v1694_v5, %v149_v21  ;;  %v151_v31 = vmul.f32 %v1689_v4, %v82_v15  ;;  %v280_v14 = vmax.f32 %v216_v24, 0.0 }
  0x35   :  { %1599 = vmatmul.mubr.msk.bf16.gmra.mxu0 %vm326_vm1, %v297_v37  ;;  %1619 = vmatmul.mubr.msk.bf16.gmra.mxu1 %vm326_vm1, %v307_v3  ;;  %v313_v27 = vpack.c.bf16 %v277_v17, %v276_v8  ;;  %v281_v32 = vmax.f32 %v217_v25, 0.0  ;;  %v219_v33 = vadd.f32 %v1694_v5, %v150_v26  ;;  %v152_v34 = vmul.f32 %v1689_v4, %v83_v22 }
  0x36   :  { %1602 = vmatprep.mubr.msk.bf16.mxu0 %vm326_vm1, %v298_v1  ;;  %1622 = vmatprep.mubr.msk.bf16.mxu1 %vm326_vm1, %v308_v44  ;;  %v253_v35 = vmax.f32 %v2014_v51, 0.0  ;;  %v314_v29 = vpack.c.bf16 %v279_v10, %v278_v23  ;;  %v282_v20 = vmax.f32 %v218_v30, 0.0  ;;  %v220_v36 = vadd.f32 %v1694_v5, %v151_v31 }
  0x37   :  { %v208_v60 = vadd.f32 %v1694_v5, %v139_v19  ;;  %v315_v37 = vpack.c.bf16 %v281_v32, %v280_v14  ;;  %v283_v1 = vmax.f32 %v219_v33, 0.0  ;;  %v221_v39 = vadd.f32 %v1694_v5, %v152_v34 }
  0x38   :  { %v309_v40 = vpack.c.bf16 %v269_v54, %v268_v9  ;;  %v209_v45 = vadd.f32 %v1694_v5, %v140_v47  ;;  %v210_v61 = vadd.f32 %v1694_v5, %v141_v55  ;;  %v284_v62 = vmax.f32 %v220_v36, 0.0 }
  0x39   :  { %v310_v4 = vpack.c.bf16 %v271_v16, %v270_v59  ;;  %v211_v51 = vadd.f32 %v1694_v5, %v142_v63  ;;  %v316_v2 = vpack.c.bf16 %v283_v1, %v282_v20  ;;  %v285_v3 = vmax.f32 %v221_v39, 0.0 }
  0x3a   :  { %v272_v9 = vmax.f32 %v208_v60, 0.0  ;;  %v273_v41 = vmax.f32 %v209_v45, 0.0  ;;  %v301_v42 = vpack.c.bf16 %v253_v35, %v252_v52  ;;  %v274_v43 = vmax.f32 %v210_v61, 0.0 }
  0x3b   :  { %v317_v19 = vpack.c.bf16 %v285_v3, %v284_v62 }
  0x3c   :  { %v311_v44 = vpack.c.bf16 %v273_v41, %v272_v9 }
  0x3d   :  { %1603 = vmatmul.mubr.msk.bf16.gmra.mxu0 %vm326_vm1, %v2000_v38  ;;  %1623 = vmatmul.mubr.msk.bf16.gmra.mxu1 %vm326_vm1, %v309_v40  ;;  %v275_v38 = vmax.f32 %v211_v51, 0.0 }
  0x3e   :  { %1606 = vmatprep.mubr.msk.bf16.mxu0 %vm326_vm1, %v2011_v50  ;;  %1626 = vmatprep.mubr.msk.bf16.mxu1 %vm326_vm1, %v310_v4 }
  0x3f   :  { %v312_v5 = vpack.c.bf16 %v275_v38, %v274_v43 }
  0x45   :  { %1607 = vmatmul.mubr.msk.bf16.gmra.mxu0 %vm326_vm1, %v301_v42  ;;  %1627 = vmatmul.mubr.msk.bf16.gmra.mxu1 %vm326_vm1, %v311_v44 }
  0x46   :  { %1630 = vmatprep.mubr.msk.bf16.mxu1 %vm326_vm1, %v312_v5 }
  0x4d   :  { %1631 = vmatmul.mubr.msk.bf16.gmra.mxu1 %vm326_vm1, %v313_v27 }
  0x4e   :  { %1634 = vmatprep.mubr.msk.bf16.mxu1 %vm326_vm1, %v314_v29 }
  0x55   :  { %1635 = vmatmul.mubr.msk.bf16.gmra.mxu1 %vm326_vm1, %v315_v37 }
  0x56   :  { %1638 = vmatprep.mubr.msk.bf16.mxu1 %vm326_vm1, %v316_v2 }
  0x5d   :  { %1639 = vmatmul.mubr.msk.bf16.gmra.mxu1 %vm326_vm1, %v317_v19 }
  0xcd   :  { %v1580_v50 = vpop.f32.mrf.mxu0 }
  0xce   :  { %v470_v52 = vadd.f32 %v1580_v50, %v2108_v28 }
  0xcf   :  { %v461_v46 = vpop.f32.mrf.mxu0 }
  0xd0   :  { %v1481_v47 = vpack.c.bf16 %v470_v52, %v470_v52  ;;  %v462_v48 = vadd.f32 %v2108_v28, %v461_v46  ;;  %v852_v58 = vmul.f32 %v470_v52, %v470_v52  ;;  %v720_v12 = vsel %vm716_vm3, %v470_v52, 0.0 }
  0xd1   :  { %v1581_v49 = vpop.f32.mrf.mxu0 }
  0xd2   :  { %1310 = vst.msk [vmem:[%s2845_s4 + $0x8] sm:$0xf] %vm1307_vm2, %v1481_v47  ;;  %v1479_v53 = vpack.c.bf16 %v462_v48, %v462_v48  ;;  %v473_v54 = vadd.f32 %v1581_v49, %v2108_v28  ;;  %v850_v56 = vmul.f32 %v462_v48, %v462_v48  ;;  %v717_v59 = vsel %vm716_vm3, %v462_v48, 0.0 }
  0xd3   :  { %v464_v55 = vpop.f32.mrf.mxu0  ;;  %v917_v26 = vsel %vm716_vm3, %v852_v58, 0.0 }
  0xd4   :  { %1308 = vst.msk [vmem:[%s2845_s4] sm:$0xf] %vm1307_vm2, %v1479_v53  ;;  %v465_v57 = vadd.f32 %v2108_v28, %v464_v55  ;;  %v1482_v63 = vpack.c.bf16 %v473_v54, %v473_v54  ;;  %v914_v16 = vsel %vm716_vm3, %v850_v56, 0.0  ;;  %v853_v17 = vmul.f32 %v473_v54, %v473_v54 }
  0xd5   :  { %v1584_v0 = vpop.f32.mrf.mxu0  ;;  %v722_v27 = vsel %vm716_vm3, %v473_v54, 0.0 }
  0xd6   :  { %v718_v6 = vsel %vm716_vm3, %v465_v57, 0.0  ;;  %v851_v7 = vmul.f32 %v465_v57, %v465_v57  ;;  %v1480_v8 = vpack.c.bf16 %v465_v57, %v465_v57  ;;  %v486_v11 = vadd.f32 %v1584_v0, %v2108_v28  ;;  %1311 = vst.msk [vmem:[%s2845_s4 + $0xc] sm:$0xf] %vm1307_vm2, %v1482_v63 }
  0xd7   :  { %v719_v13 = vadd.f32 %v718_v6, %v717_v59  ;;  %v477_v15 = vpop.f32.mrf.mxu0  ;;  %v919_v33 = vsel %vm716_vm3, %v853_v17, 0.0 }
  0xd8   :  { %v915_v18 = vsel %vm716_vm3, %v851_v7, 0.0  ;;  %1309 = vst.msk [vmem:[%s2845_s4 + $0x4] sm:$0xf] %vm1307_vm2, %v1480_v8  ;;  %v1485_v21 = vpack.c.bf16 %v486_v11, %v486_v11  ;;  %v478_v24 = vadd.f32 %v2108_v28, %v477_v15  ;;  %v856_v1 = vmul.f32 %v486_v11, %v486_v11 }
  0xd9   :  { %v721_v22 = vadd.f32 %v720_v12, %v719_v13  ;;  %v916_v23 = vadd.f32 %v915_v18, %v914_v16  ;;  %v1585_v25 = vpop.f32.mrf.mxu0  ;;  %v728_v19 = vsel %vm716_vm3, %v486_v11, 0.0 }
  0xda   :  { %1314 = vst.msk [vmem:[%s2845_s4 + $0x18] sm:$0xf] %vm1307_vm2, %v1485_v21  ;;  %v489_v10 = vadd.f32 %v1585_v25, %v2108_v28  ;;  %v854_v14 = vmul.f32 %v478_v24, %v478_v24  ;;  %v724_v34 = vsel %vm716_vm3, %v478_v24, 0.0  ;;  %v1483_v35 = vpack.c.bf16 %v478_v24, %v478_v24 }
  0xdb   :  { %v918_v30 = vadd.f32 %v917_v26, %v916_v23  ;;  %v723_v31 = vadd.f32 %v722_v27, %v721_v22  ;;  %v480_v32 = vpop.f32.mrf.mxu0  ;;  %v925_v50 = vsel %vm716_vm3, %v856_v1, 0.0 }
  0xdc   :  { %v1486_v29 = vpack.c.bf16 %v489_v10, %v489_v10  ;;  %v481_v60 = vadd.f32 %v2108_v28, %v480_v32  ;;  %v921_v39 = vsel %vm716_vm3, %v854_v14, 0.0  ;;  %1312 = vst.msk [vmem:[%s2845_s4 + $0x10] sm:$0xf] %vm1307_vm2, %v1483_v35  ;;  %v857_v9 = vmul.f32 %v489_v10, %v489_v10 }
  0xdd   :  { %v725_v20 = vadd.f32 %v724_v34, %v723_v31  ;;  %v920_v36 = vadd.f32 %v919_v33, %v918_v30  ;;  %v1588_v37 = vpop.f32.mrf.mxu0  ;;  %v730_v52 = vsel %vm716_vm3, %v489_v10, 0.0 }
  0xde   :  { %1315 = vst.msk [vmem:[%s2845_s4 + $0x1c] sm:$0xf] %vm1307_vm2, %v1486_v29  ;;  %v502_v40 = vadd.f32 %v1588_v37, %v2108_v28  ;;  %v726_v61 = vsel %vm716_vm3, %v481_v60, 0.0  ;;  %v855_v62 = vmul.f32 %v481_v60, %v481_v60  ;;  %v1484_v4 = vpack.c.bf16 %v481_v60, %v481_v60 }
  0xdf   :  { %v922_v45 = vadd.f32 %v921_v39, %v920_v36  ;;  %v493_v51 = vpop.f32.mrf.mxu0  ;;  %v727_v2 = vadd.f32 %v726_v61, %v725_v20  ;;  %v927_v54 = vsel %vm716_vm3, %v857_v9, 0.0 }
  0xe0   :  { %v1489_v3 = vpack.c.bf16 %v502_v40, %v502_v40  ;;  %v923_v41 = vsel %vm716_vm3, %v855_v62, 0.0  ;;  %1313 = vst.msk [vmem:[%s2845_s4 + $0x14] sm:$0xf] %vm1307_vm2, %v1484_v4  ;;  %v494_v42 = vadd.f32 %v2108_v28, %v493_v51  ;;  %v860_v59 = vmul.f32 %v502_v40, %v502_v40 }
  0xe1   :  { %v1589_v43 = vpop.f32.mrf.mxu0  ;;  %v729_v38 = vadd.f32 %v728_v19, %v727_v2  ;;  %v924_v44 = vadd.f32 %v923_v41, %v922_v45  ;;  %v736_v21 = vsel %vm716_vm3, %v502_v40, 0.0 }
  0xe2   :  { %1318 = vst.msk [vmem:[%s2845_s4 + $0x28] sm:$0xf] %vm1307_vm2, %v1489_v3  ;;  %v505_v5 = vadd.f32 %v1589_v43, %v2108_v28  ;;  %v858_v46 = vmul.f32 %v494_v42, %v494_v42  ;;  %v1487_v47 = vpack.c.bf16 %v494_v42, %v494_v42  ;;  %v732_v55 = vsel %vm716_vm3, %v494_v42, 0.0 }
  0xe3   :  { %v496_v48 = vpop.f32.mrf.mxu0  ;;  %v926_v49 = vadd.f32 %v925_v50, %v924_v44  ;;  %v731_v53 = vadd.f32 %v730_v52, %v729_v38  ;;  %v933_v31 = vsel %vm716_vm3, %v860_v59, 0.0 }
  0xe4   :  { %1316 = vst.msk [vmem:[%s2845_s4 + $0x20] sm:$0xf] %vm1307_vm2, %v1487_v47  ;;  %v1490_v56 = vpack.c.bf16 %v505_v5, %v505_v5  ;;  %v497_v57 = vadd.f32 %v2108_v28, %v496_v48  ;;  %v929_v7 = vsel %vm716_vm3, %v858_v46, 0.0  ;;  %v861_v16 = vmul.f32 %v505_v5, %v505_v5 }
  0xe5   :  { %v1592_v58 = vpop.f32.mrf.mxu0  ;;  %v733_v63 = vadd.f32 %v732_v55, %v731_v53  ;;  %v928_v0 = vadd.f32 %v927_v54, %v926_v49  ;;  %v1612_v18 = vpop.f32.mrf.mxu1  ;;  %v738_v14 = vsel %vm716_vm3, %v505_v5, 0.0 }
  0xe6   :  { %v518_v6 = vadd.f32 %v1592_v58, %v2108_v28  ;;  %1319 = vst.msk [vmem:[%s2845_s4 + $0x2c] sm:$0xf] %vm1307_vm2, %v1490_v56  ;;  %v734_v8 = vsel %vm716_vm3, %v497_v57, 0.0  ;;  %v859_v11 = vmul.f32 %v497_v57, %v497_v57  ;;  %v1488_v12 = vpack.c.bf16 %v497_v57, %v497_v57 }
  0xe7   :  { %v509_v13 = vpop.f32.mrf.mxu0  ;;  %v930_v15 = vadd.f32 %v929_v7, %v928_v0  ;;  %v735_v17 = vadd.f32 %v734_v8, %v733_v63  ;;  %v2194_v30 = vpop.f32.mrf.mxu1  ;;  %v935_v35 = vsel %vm716_vm3, %v861_v16, 0.0  ;;  %v2212_v40 = vadd.f32 %v1612_v18, %v2108_v28 }
  0xe8   :  { %v931_v22 = vsel %vm716_vm3, %v859_v11, 0.0  ;;  %1317 = vst.msk [vmem:[%s2845_s4 + $0x24] sm:$0xf] %vm1307_vm2, %v1488_v12  ;;  %v1493_v23 = vpack.c.bf16 %v518_v6, %v518_v6  ;;  %v510_v24 = vadd.f32 %v2108_v28, %v509_v13  ;;  %v864_v45 = vmul.f32 %v518_v6, %v518_v6 }
  0xe9   :  { %v1593_v25 = vpop.f32.mrf.mxu0  ;;  %v737_v26 = vadd.f32 %v736_v21, %v735_v17  ;;  %v932_v27 = vadd.f32 %v931_v22, %v930_v15  ;;  %v2203_v36 = vpop.f32.mrf.mxu1  ;;  %v744_v42 = vsel %vm716_vm3, %v518_v6, 0.0  ;;  %v1513_v48 = vpack.c.bf16 %v2212_v40, %v2212_v40 }
  0xea   :  { %v521_v10 = vadd.f32 %v1593_v25, %v2108_v28  ;;  %1322 = vst.msk [vmem:[%s2845_s4 + $0x38] sm:$0xf] %vm1307_vm2, %v1493_v23  ;;  %v862_v32 = vmul.f32 %v510_v24, %v510_v24  ;;  %v1491_v33 = vpack.c.bf16 %v510_v24, %v510_v24  ;;  %v740_v60 = vsel %vm716_vm3, %v510_v24, 0.0 }
  0xeb   :  { %v512_v34 = vpop.f32.mrf.mxu0  ;;  %v934_v29 = vadd.f32 %v933_v31, %v932_v27  ;;  %v739_v20 = vadd.f32 %v738_v14, %v737_v26  ;;  %v2215_v51 = vpop.f32.mrf.mxu1  ;;  %v941_v56 = vsel %vm716_vm3, %v864_v45, 0.0  ;;  %1342 = vst.msk [vmem:[%s2845_s4 + $0x88] sm:$0xf] %vm1307_vm2, %v1513_v48  ;;  %v2259_v22 = vadd.f32 %v2108_v28, %v2194_v30 }
  0xec   :  { %1320 = vst.msk [vmem:[%s2845_s4 + $0x30] sm:$0xf] %vm1307_vm2, %v1491_v33  ;;  %v1494_v37 = vpack.c.bf16 %v521_v10, %v521_v10  ;;  %v513_v1 = vadd.f32 %v2108_v28, %v512_v34  ;;  %v937_v2 = vsel %vm716_vm3, %v862_v32, 0.0  ;;  %v865_v38 = vmul.f32 %v521_v10, %v521_v10 }
  0xed   :  { %v1596_v39 = vpop.f32.mrf.mxu0  ;;  %v741_v61 = vadd.f32 %v740_v60, %v739_v20  ;;  %v936_v62 = vadd.f32 %v935_v35, %v934_v29  ;;  %v2224_v5 = vpop.f32.mrf.mxu1  ;;  %v746_v57 = vsel %vm716_vm3, %v521_v10, 0.0 }
  0xee   :  { %v534_v4 = vadd.f32 %v1596_v39, %v2108_v28  ;;  %1323 = vst.msk [vmem:[%s2845_s4 + $0x3c] sm:$0xf] %vm1307_vm2, %v1494_v37  ;;  %v742_v3 = vsel %vm716_vm3, %v513_v1, 0.0  ;;  %v863_v19 = vmul.f32 %v513_v1, %v513_v1  ;;  %v1492_v9 = vpack.c.bf16 %v513_v1, %v513_v1 }
  0xef   :  { %v525_v41 = vpop.f32.mrf.mxu0  ;;  %v938_v43 = vadd.f32 %v937_v2, %v936_v62  ;;  %v743_v44 = vadd.f32 %v742_v3, %v741_v61  ;;  %v2235_v55 = vpop.f32.mrf.mxu1  ;;  %v943_v0 = vsel %vm716_vm3, %v865_v38, 0.0  ;;  %v1511_v3 = vpack.c.bf16 %v2259_v22, %v2259_v22 }
  0xf0   :  { %v939_v50 = vsel %vm716_vm3, %v863_v19, 0.0  ;;  %1321 = vst.msk [vmem:[%s2845_s4 + $0x34] sm:$0xf] %vm1307_vm2, %v1492_v9  ;;  %v1497_v52 = vpack.c.bf16 %v534_v4, %v534_v4  ;;  %v526_v46 = vadd.f32 %v2108_v28, %v525_v41  ;;  %v868_v11 = vmul.f32 %v534_v4, %v534_v4 }
  0xf1   :  { %v1597_v47 = vpop.f32.mrf.mxu0  ;;  %v745_v49 = vadd.f32 %v744_v42, %v743_v44  ;;  %v940_v53 = vadd.f32 %v939_v50, %v938_v43  ;;  %v2248_v8 = vpop.f32.mrf.mxu1  ;;  %v752_v31 = vsel %vm716_vm3, %v534_v4, 0.0  ;;  %1340 = vst.msk [vmem:[%s2845_s4 + $0x80] sm:$0xf] %vm1307_vm2, %v1511_v3 }
  0xf2   :  { %v537_v54 = vadd.f32 %v1597_v47, %v2108_v28  ;;  %1326 = vst.msk [vmem:[%s2845_s4 + $0x48] sm:$0xf] %vm1307_vm2, %v1497_v52  ;;  %v866_v58 = vmul.f32 %v526_v46, %v526_v46  ;;  %v1495_v59 = vpack.c.bf16 %v526_v46, %v526_v46  ;;  %v748_v12 = vsel %vm716_vm3, %v526_v46, 0.0 }
  0xf3   :  { %v528_v63 = vpop.f32.mrf.mxu0  ;;  %v942_v6 = vadd.f32 %v941_v56, %v940_v53  ;;  %v747_v7 = vadd.f32 %v746_v57, %v745_v49  ;;  %v2261_v23 = vpop.f32.mrf.mxu1  ;;  %v949_v60 = vsel %vm716_vm3, %v868_v11, 0.0 }
  0xf4   :  { %1324 = vst.msk [vmem:[%s2845_s4 + $0x40] sm:$0xf] %vm1307_vm2, %v1495_v59  ;;  %v1498_v13 = vpack.c.bf16 %v537_v54, %v537_v54  ;;  %v529_v15 = vadd.f32 %v2108_v28, %v528_v63  ;;  %v945_v24 = vsel %vm716_vm3, %v866_v58, 0.0  ;;  %v869_v33 = vmul.f32 %v537_v54, %v537_v54 }
  0xf5   :  { %v1600_v16 = vpop.f32.mrf.mxu0  ;;  %v749_v17 = vadd.f32 %v748_v12, %v747_v7  ;;  %v944_v18 = vadd.f32 %v943_v0, %v942_v6  ;;  %v2270_v30 = vpop.f32.mrf.mxu1  ;;  %v754_v61 = vsel %vm716_vm3, %v537_v54, 0.0 }
  0xf6   :  { %v550_v21 = vadd.f32 %v1600_v16, %v2108_v28  ;;  %1327 = vst.msk [vmem:[%s2845_s4 + $0x4c] sm:$0xf] %vm1307_vm2, %v1498_v13  ;;  %v750_v25 = vsel %vm716_vm3, %v529_v15, 0.0  ;;  %v867_v26 = vmul.f32 %v529_v15, %v529_v15  ;;  %v1496_v27 = vpack.c.bf16 %v529_v15, %v529_v15 }
  0xf7   :  { %v541_v10 = vpop.f32.mrf.mxu0  ;;  %v946_v14 = vadd.f32 %v945_v24, %v944_v18  ;;  %v751_v32 = vadd.f32 %v750_v25, %v749_v17  ;;  %v2280_v45 = vpop.f32.mrf.mxu1  ;;  %v951_v42 = vsel %vm716_vm3, %v869_v33, 0.0  ;;  %v2322_v16 = vadd.f32 %v2203_v36, %v2108_v28 }
  0xf8   :  { %v947_v34 = vsel %vm716_vm3, %v867_v26, 0.0  ;;  %1325 = vst.msk [vmem:[%s2845_s4 + $0x44] sm:$0xf] %vm1307_vm2, %v1496_v27  ;;  %v1501_v35 = vpack.c.bf16 %v550_v21, %v550_v21  ;;  %v542_v29 = vadd.f32 %v2108_v28, %v541_v10  ;;  %v872_v52 = vmul.f32 %v550_v21, %v550_v21 }
  0xf9   :  { %v1601_v20 = vpop.f32.mrf.mxu0  ;;  %v753_v37 = vadd.f32 %v752_v31, %v751_v32  ;;  %v948_v1 = vadd.f32 %v947_v34, %v946_v14  ;;  %v2289_v41 = vpop.f32.mrf.mxu1  ;;  %v760_v59 = vsel %vm716_vm3, %v550_v21, 0.0 }
  0xfa   :  { %v553_v39 = vadd.f32 %v1601_v20, %v2108_v28  ;;  %1330 = vst.msk [vmem:[%s2845_s4 + $0x58] sm:$0xf] %vm1307_vm2, %v1501_v35  ;;  %v870_v62 = vmul.f32 %v542_v29, %v542_v29  ;;  %v1499_v4 = vpack.c.bf16 %v542_v29, %v542_v29  ;;  %v756_v43 = vsel %vm716_vm3, %v542_v29, 0.0 }
  0xfb   :  { %v544_v2 = vpop.f32.mrf.mxu0  ;;  %v950_v19 = vadd.f32 %v949_v60, %v948_v1  ;;  %v755_v9 = vadd.f32 %v754_v61, %v753_v37  ;;  %v2303_v49 = vpop.f32.mrf.mxu1  ;;  %v957_v25 = vsel %vm716_vm3, %v872_v52, 0.0  ;;  %v1514_v60 = vpack.c.bf16 %v2322_v16, %v2322_v16 }
  0xfc   :  { %1328 = vst.msk [vmem:[%s2845_s4 + $0x50] sm:$0xf] %vm1307_vm2, %v1499_v4  ;;  %v1502_v38 = vpack.c.bf16 %v553_v39, %v553_v39  ;;  %v545_v44 = vadd.f32 %v2108_v28, %v544_v2  ;;  %v953_v53 = vsel %vm716_vm3, %v870_v62, 0.0  ;;  %v873_v0 = vmul.f32 %v553_v39, %v553_v39 }
  0xfd   :  { %v1604_v50 = vpop.f32.mrf.mxu0  ;;  %v757_v46 = vadd.f32 %v756_v43, %v755_v9  ;;  %v952_v47 = vadd.f32 %v951_v42, %v950_v19  ;;  %v2312_v7 = vpop.f32.mrf.mxu1  ;;  %v762_v26 = vsel %vm716_vm3, %v553_v39, 0.0  ;;  %1343 = vst.msk [vmem:[%s2845_s4 + $0x8c] sm:$0xf] %vm1307_vm2, %v1514_v60  ;;  %v606_v60 = vadd.f32 %v2108_v28, %v2235_v55 }
  0xfe   :  { %v566_v48 = vadd.f32 %v1604_v50, %v2108_v28  ;;  %1331 = vst.msk [vmem:[%s2845_s4 + $0x5c] sm:$0xf] %vm1307_vm2, %v1502_v38  ;;  %v758_v54 = vsel %vm716_vm3, %v545_v44, 0.0  ;;  %v871_v56 = vmul.f32 %v545_v44, %v545_v44  ;;  %v1500_v57 = vpack.c.bf16 %v545_v44, %v545_v44 }
  0xff   :  { %v557_v58 = vpop.f32.mrf.mxu0  ;;  %v954_v63 = vadd.f32 %v953_v53, %v952_v47  ;;  %v759_v6 = vadd.f32 %v758_v54, %v757_v46  ;;  %v2325_v24 = vpop.f32.mrf.mxu1  ;;  %v959_v36 = vsel %vm716_vm3, %v873_v0, 0.0  ;;  %v882_v55 = vmul.f32 %v2259_v22, %v2259_v22 }
 0x100   :  { %v955_v11 = vsel %vm716_vm3, %v871_v56, 0.0  ;;  %1329 = vst.msk [vmem:[%s2845_s4 + $0x54] sm:$0xf] %vm1307_vm2, %v1500_v57  ;;  %v1505_v12 = vpack.c.bf16 %v566_v48, %v566_v48  ;;  %v558_v13 = vadd.f32 %v2108_v28, %v557_v58  ;;  %v876_v37 = vmul.f32 %v566_v48, %v566_v48 }
 0x101   :  { %v1605_v15 = vpop.f32.mrf.mxu0  ;;  %v761_v17 = vadd.f32 %v760_v59, %v759_v6  ;;  %v956_v18 = vadd.f32 %v955_v11, %v954_v63  ;;  %v2334_v33 = vpop.f32.mrf.mxu1  ;;  %v768_v50 = vsel %vm716_vm3, %v566_v48, 0.0  ;;  %v2369_v58 = vadd.f32 %v2108_v28, %v2215_v51 }
 0x102   :  { %v569_v21 = vadd.f32 %v1605_v15, %v2108_v28  ;;  %1334 = vst.msk [vmem:[%s2845_s4 + $0x68] sm:$0xf] %vm1307_vm2, %v1505_v12  ;;  %v874_v27 = vmul.f32 %v558_v13, %v558_v13  ;;  %v1503_v10 = vpack.c.bf16 %v558_v13, %v558_v13  ;;  %v764_v34 = vsel %vm716_vm3, %v558_v13, 0.0 }
 0x103   :  { %v560_v31 = vpop.f32.mrf.mxu0  ;;  %v958_v14 = vadd.f32 %v957_v25, %v956_v18  ;;  %v763_v32 = vadd.f32 %v762_v26, %v761_v17  ;;  %v2345_v62 = vpop.f32.mrf.mxu1  ;;  %v965_v59 = vsel %vm716_vm3, %v876_v37, 0.0  ;;  %v2410_v37 = vadd.f32 %v2248_v8, %v2108_v28 }
 0x104   :  { %1332 = vst.msk [vmem:[%s2845_s4 + $0x60] sm:$0xf] %vm1307_vm2, %v1503_v10  ;;  %v1506_v35 = vpack.c.bf16 %v569_v21, %v569_v21  ;;  %v561_v29 = vadd.f32 %v2108_v28, %v560_v31  ;;  %v961_v4 = vsel %vm716_vm3, %v874_v27, 0.0  ;;  %v877_v43 = vmul.f32 %v569_v21, %v569_v21 }
 0x105   :  { %v1608_v20 = vpop.f32.mrf.mxu0  ;;  %v765_v1 = vadd.f32 %v764_v34, %v763_v32  ;;  %v960_v39 = vadd.f32 %v959_v36, %v958_v14  ;;  %v2357_v44 = vpop.f32.mrf.mxu1  ;;  %v770_v63 = vsel %vm716_vm3, %v569_v21, 0.0  ;;  %v1512_v31 = vpack.c.bf16 %v2369_v58, %v2369_v58 }
 0x106   :  { %v582_v61 = vadd.f32 %v1608_v20, %v2108_v28  ;;  %1335 = vst.msk [vmem:[%s2845_s4 + $0x6c] sm:$0xf] %vm1307_vm2, %v1506_v35  ;;  %v766_v2 = vsel %vm716_vm3, %v561_v29, 0.0  ;;  %v875_v3 = vmul.f32 %v561_v29, %v561_v29  ;;  %v1504_v19 = vpack.c.bf16 %v561_v29, %v561_v29 }
 0x107   :  { %v573_v9 = vpop.f32.mrf.mxu0  ;;  %v962_v42 = vadd.f32 %v961_v4, %v960_v39  ;;  %v767_v38 = vadd.f32 %v766_v2, %v765_v1  ;;  %v2371_v48 = vpop.f32.mrf.mxu1  ;;  %v967_v12 = vsel %vm716_vm3, %v877_v43, 0.0  ;;  %v2400_v35 = vadd.f32 %v2224_v5, %v2108_v28  ;;  %1341 = vst.msk [vmem:[%s2845_s4 + $0x84] sm:$0xf] %vm1307_vm2, %v1512_v31 }
 0x108   :  { %v963_v52 = vsel %vm716_vm3, %v875_v3, 0.0  ;;  %1333 = vst.msk [vmem:[%s2845_s4 + $0x64] sm:$0xf] %vm1307_vm2, %v1504_v19  ;;  %v1509_v46 = vpack.c.bf16 %v582_v61, %v582_v61  ;;  %v574_v47 = vadd.f32 %v2108_v28, %v573_v9  ;;  %v880_v17 = vmul.f32 %v582_v61, %v582_v61 }
 0x109   :  { %v1609_v53 = vpop.f32.mrf.mxu0  ;;  %v769_v54 = vadd.f32 %v768_v50, %v767_v38  ;;  %v964_v56 = vadd.f32 %v963_v52, %v962_v42  ;;  %v2380_v51 = vpop.f32.mrf.mxu1  ;;  %v776_v39 = vsel %vm716_vm3, %v582_v61, 0.0  ;;  %v1517_v2 = vpack.c.bf16 %v2400_v35, %v2400_v35 }
 0x10a   :  { %v585_v57 = vadd.f32 %v1609_v53, %v2108_v28  ;;  %1338 = vst.msk [vmem:[%s2845_s4 + $0x78] sm:$0xf] %vm1307_vm2, %v1509_v46  ;;  %v878_v0 = vmul.f32 %v574_v47, %v574_v47  ;;  %v1507_v6 = vpack.c.bf16 %v574_v47, %v574_v47  ;;  %v772_v18 = vsel %vm716_vm3, %v574_v47, 0.0 }
 0x10b   :  { %v576_v11 = vpop.f32.mrf.mxu0  ;;  %v966_v13 = vadd.f32 %v965_v59, %v964_v56  ;;  %v771_v15 = vadd.f32 %v770_v63, %v769_v54  ;;  %v2391_v36 = vpop.f32.mrf.mxu1  ;;  %v973_v61 = vsel %vm716_vm3, %v880_v17, 0.0  ;;  %v780_v42 = vsel %vm716_vm3, %v2259_v22, 0.0  ;;  %1346 = vst.msk [vmem:[%s2845_s4 + $0x98] sm:$0xf] %vm1307_vm2, %v1517_v2 }
 0x10c   :  { %1336 = vst.msk [vmem:[%s2845_s4 + $0x70] sm:$0xf] %vm1307_vm2, %v1507_v6  ;;  %v1510_v21 = vpack.c.bf16 %v585_v57, %v585_v57  ;;  %v577_v25 = vadd.f32 %v2108_v28, %v576_v11  ;;  %v969_v10 = vsel %vm716_vm3, %v878_v0, 0.0  ;;  %v881_v5 = vmul.f32 %v585_v57, %v585_v57 }
 0x10d   :  { %v773_v26 = vadd.f32 %v772_v18, %v771_v15  ;;  %v968_v27 = vadd.f32 %v967_v12, %v966_v13  ;;  %v2412_v1 = vpop.f32.mrf.mxu1  ;;  %v778_v9 = vsel %vm716_vm3, %v585_v57, 0.0  ;;  %v1515_v43 = vpack.c.bf16 %v606_v60, %v606_v60 }
 0x10e   :  { %1339 = vst.msk [vmem:[%s2845_s4 + $0x7c] sm:$0xf] %vm1307_vm2, %v1510_v21  ;;  %v774_v14 = vsel %vm716_vm3, %v577_v25, 0.0  ;;  %v879_v32 = vmul.f32 %v577_v25, %v577_v25  ;;  %v1508_v34 = vpack.c.bf16 %v577_v25, %v577_v25  ;;  %v883_v52 = vmul.f32 %v2369_v58, %v2369_v58 }
 0x10f   :  { %v970_v29 = vadd.f32 %v969_v10, %v968_v27  ;;  %v775_v20 = vadd.f32 %v774_v14, %v773_v26  ;;  %v2424_v19 = vpop.f32.mrf.mxu1  ;;  %v1518_v46 = vpack.c.bf16 %v2410_v37, %v2410_v37  ;;  %v975_v47 = vsel %vm716_vm3, %v881_v5, 0.0  ;;  %1344 = vst.msk [vmem:[%s2845_s4 + $0x90] sm:$0xf] %vm1307_vm2, %v1515_v43 }
 0x110   :  { %v971_v4 = vsel %vm716_vm3, %v879_v32, 0.0  ;;  %1337 = vst.msk [vmem:[%s2845_s4 + $0x74] sm:$0xf] %vm1307_vm2, %v1508_v34  ;;  %v609_v22 = vadd.f32 %v2108_v28, %v2261_v23  ;;  %v2447_v53 = vadd.f32 %v2270_v30, %v2108_v28  ;;  %v2451_v54 = vadd.f32 %v2108_v28, %v2280_v45 }
 0x111   :  { %v777_v8 = vadd.f32 %v776_v39, %v775_v20  ;;  %v972_v3 = vadd.f32 %v971_v4, %v970_v29  ;;  %v884_v56 = vmul.f32 %v2212_v40, %v2212_v40  ;;  %v977_v57 = vsel %vm716_vm3, %v882_v55, 0.0  ;;  %1347 = vst.msk [vmem:[%s2845_s4 + $0x9c] sm:$0xf] %vm1307_vm2, %v1518_v46  ;;  %v2460_v23 = vpop.f32.mrf.mxu1 }
 0x112   :  { %v885_v30 = vmul.f32 %v2322_v16, %v2322_v16  ;;  %v782_v45 = vsel %vm716_vm3, %v2369_v58, 0.0  ;;  %v1516_v0 = vpack.c.bf16 %v609_v22, %v609_v22  ;;  %v2468_v6 = vadd.f32 %v2289_v41, %v2108_v28 }
 0x113   :  { %v974_v38 = vadd.f32 %v973_v61, %v972_v3  ;;  %v779_v50 = vadd.f32 %v778_v9, %v777_v8  ;;  %v1521_v13 = vpack.c.bf16 %v2447_v53, %v2447_v53  ;;  %v2474_v15 = vadd.f32 %v2108_v28, %v2303_v49 }
 0x114   :  { %v784_v17 = vsel %vm716_vm3, %v2212_v40, 0.0  ;;  %v979_v18 = vsel %vm716_vm3, %v883_v52, 0.0  ;;  %1345 = vst.msk [vmem:[%s2845_s4 + $0x94] sm:$0xf] %vm1307_vm2, %v1516_v0  ;;  %v1519_v41 = vpack.c.bf16 %v2451_v54, %v2451_v54  ;;  %v981_v58 = vsel %vm716_vm3, %v884_v56, 0.0  ;;  %v2490_v40 = vpop.f32.mrf.mxu1 }
 0x115   :  { %v781_v59 = vadd.f32 %v780_v42, %v779_v50  ;;  %v976_v63 = vadd.f32 %v975_v47, %v974_v38  ;;  %1350 = vst.msk [vmem:[%s2845_s4 + $0xa8] sm:$0xf] %vm1307_vm2, %v1521_v13  ;;  %v786_v49 = vsel %vm716_vm3, %v2322_v16, 0.0  ;;  %v983_v26 = vsel %vm716_vm3, %v885_v30, 0.0 }
 0x116   :  { %v886_v27 = vmul.f32 %v606_v60, %v606_v60  ;;  %1348 = vst.msk [vmem:[%s2845_s4 + $0xa0] sm:$0xf] %vm1307_vm2, %v1519_v41  ;;  %v1522_v10 = vpack.c.bf16 %v2468_v6, %v2468_v6  ;;  %v788_v32 = vsel %vm716_vm3, %v606_v60, 0.0  ;;  %v1520_v34 = vpack.c.bf16 %v2474_v15, %v2474_v15 }
 0x117   :  { %v783_v11 = vadd.f32 %v782_v45, %v781_v59  ;;  %v978_v12 = vadd.f32 %v977_v57, %v976_v63  ;;  %v887_v29 = vmul.f32 %v609_v22, %v609_v22  ;;  %v2510_v16 = vadd.f32 %v2312_v7, %v2108_v28  ;;  %v2526_v7 = vpop.f32.mrf.mxu1 }
 0x118   :  { %1351 = vst.msk [vmem:[%s2845_s4 + $0xac] sm:$0xf] %vm1307_vm2, %v1522_v10  ;;  %v2514_v20 = vadd.f32 %v2108_v28, %v2325_v24  ;;  %v2518_v60 = vadd.f32 %v2334_v33, %v2108_v28  ;;  %v888_v39 = vmul.f32 %v2400_v35, %v2400_v35  ;;  %1349 = vst.msk [vmem:[%s2845_s4 + $0xa4] sm:$0xf] %vm1307_vm2, %v1520_v34  ;;  %v985_v2 = vsel %vm716_vm3, %v886_v27, 0.0 }
 0x119   :  { %v785_v21 = vadd.f32 %v784_v17, %v783_v11  ;;  %v980_v25 = vadd.f32 %v979_v18, %v978_v12  ;;  %v790_v24 = vsel %vm716_vm3, %v609_v22, 0.0  ;;  %v1525_v33 = vpack.c.bf16 %v2510_v16, %v2510_v16 }
 0x11a   :  { %v2534_v55 = vadd.f32 %v2108_v28, %v2345_v62  ;;  %v1523_v61 = vpack.c.bf16 %v2514_v20, %v2514_v20  ;;  %v792_v9 = vsel %vm716_vm3, %v2400_v35, 0.0  ;;  %v889_v42 = vmul.f32 %v2410_v37, %v2410_v37  ;;  %v2554_v35 = vpop.f32.mrf.mxu1 }
 0x11b   :  { %v982_v31 = vadd.f32 %v981_v58, %v980_v25  ;;  %v787_v14 = vadd.f32 %v786_v49, %v785_v21  ;;  %v987_v43 = vsel %vm716_vm3, %v887_v29, 0.0  ;;  %1354 = vst.msk [vmem:[%s2845_s4 + $0xb8] sm:$0xf] %vm1307_vm2, %v1525_v33  ;;  %v1526_v62 = vpack.c.bf16 %v2518_v60, %v2518_v60 }
 0x11c   :  { %v989_v38 = vsel %vm716_vm3, %v888_v39, 0.0  ;;  %1352 = vst.msk [vmem:[%s2845_s4 + $0xb0] sm:$0xf] %vm1307_vm2, %v1523_v61  ;;  %v794_v46 = vsel %vm716_vm3, %v2410_v37, 0.0  ;;  %v890_v47 = vmul.f32 %v2451_v54, %v2451_v54  ;;  %v1524_v22 = vpack.c.bf16 %v2534_v55, %v2534_v55  ;;  %v1637_v12 = vpop.f32.mrf.mxu1 }
 0x11d   :  { %v789_v5 = vadd.f32 %v788_v32, %v787_v14  ;;  %v984_v4 = vadd.f32 %v983_v26, %v982_v31  ;;  %1355 = vst.msk [vmem:[%s2845_s4 + $0xbc] sm:$0xf] %vm1307_vm2, %v1526_v62  ;;  %v2568_v56 = vadd.f32 %v2357_v44, %v2108_v28  ;;  %v2572_v37 = vadd.f32 %v2108_v28, %v2371_v48 }
 0x11e   :  { %v2576_v63 = vadd.f32 %v2380_v51, %v2108_v28  ;;  %v991_v30 = vsel %vm716_vm3, %v889_v42, 0.0  ;;  %v796_v45 = vsel %vm716_vm3, %v2451_v54, 0.0  ;;  %v891_v0 = vmul.f32 %v2474_v15, %v2474_v15  ;;  %1353 = vst.msk [vmem:[%s2845_s4 + $0xb4] sm:$0xf] %vm1307_vm2, %v1524_v22  ;;  %v688_v14 = vpop.f32.mrf.mxu1 }
 0x11f   :  { %v986_v8 = vadd.f32 %v985_v2, %v984_v4  ;;  %v791_v3 = vadd.f32 %v790_v24, %v789_v5  ;;  %v1529_v44 = vpack.c.bf16 %v2568_v56, %v2568_v56  ;;  %v892_v48 = vmul.f32 %v2447_v53, %v2447_v53 }
 0x120   :  { %v800_v54 = vsel %vm716_vm3, %v2447_v53, 0.0  ;;  %v993_v13 = vsel %vm716_vm3, %v890_v47, 0.0  ;;  %v798_v17 = vsel %vm716_vm3, %v2474_v15, 0.0  ;;  %v1527_v18 = vpack.c.bf16 %v2572_v37, %v2572_v37 }
 0x121   :  { %v793_v50 = vadd.f32 %v792_v9, %v791_v3  ;;  %v988_v52 = vadd.f32 %v987_v43, %v986_v8  ;;  %1358 = vst.msk [vmem:[%s2845_s4 + $0xc8] sm:$0xf] %vm1307_vm2, %v1529_v44  ;;  %v893_v58 = vmul.f32 %v2468_v6, %v2468_v6  ;;  %v1530_v53 = vpack.c.bf16 %v2576_v63, %v2576_v63 }
 0x122   :  { %v995_v25 = vsel %vm716_vm3, %v891_v0, 0.0  ;;  %1356 = vst.msk [vmem:[%s2845_s4 + $0xc0] sm:$0xf] %vm1307_vm2, %v1527_v18  ;;  %v2613_v15 = vadd.f32 %v2108_v28, %v2391_v36  ;;  %v2617_v49 = vadd.f32 %v2412_v1, %v2108_v28  ;;  %v2621_v26 = vadd.f32 %v2108_v28, %v2424_v19 }
 0x123   :  { %v990_v57 = vadd.f32 %v989_v38, %v988_v52  ;;  %v795_v59 = vadd.f32 %v794_v46, %v793_v50  ;;  %v997_v27 = vsel %vm716_vm3, %v892_v48, 0.0  ;;  %1359 = vst.msk [vmem:[%s2845_s4 + $0xcc] sm:$0xf] %vm1307_vm2, %v1530_v53  ;;  %v802_v36 = vsel %vm716_vm3, %v2468_v6, 0.0 }
 0x124   :  { %v894_v1 = vmul.f32 %v2514_v20, %v2514_v20  ;;  %v1528_v19 = vpack.c.bf16 %v2613_v15, %v2613_v15  ;;  %v2636_v32 = vadd.f32 %v2460_v23, %v2108_v28  ;;  %v1533_v39 = vpack.c.bf16 %v2617_v49, %v2617_v49 }
 0x125   :  { %v797_v51 = vadd.f32 %v796_v45, %v795_v59  ;;  %v992_v11 = vadd.f32 %v991_v30, %v990_v57  ;;  %v2642_v5 = vadd.f32 %v2108_v28, %v2490_v40  ;;  %v999_v6 = vsel %vm716_vm3, %v893_v58, 0.0 }
 0x126   :  { %v804_v4 = vsel %vm716_vm3, %v2514_v20, 0.0  ;;  %v895_v2 = vmul.f32 %v2534_v55, %v2534_v55  ;;  %1357 = vst.msk [vmem:[%s2845_s4 + $0xc4] sm:$0xf] %vm1307_vm2, %v1528_v19  ;;  %v1531_v23 = vpack.c.bf16 %v2621_v26, %v2621_v26  ;;  %v896_v40 = vmul.f32 %v2510_v16, %v2510_v16  ;;  %1362 = vst.msk [vmem:[%s2845_s4 + $0xd8] sm:$0xf] %vm1307_vm2, %v1533_v39  ;;  %v1640_v20 = vpop.f32.mrf.mxu1 }
 0x127   :  { %v994_v41 = vadd.f32 %v993_v13, %v992_v11  ;;  %v799_v21 = vadd.f32 %v798_v17, %v797_v51  ;;  %v808_v8 = vsel %vm716_vm3, %v2510_v16, 0.0  ;;  %v1001_v3 = vsel %vm716_vm3, %v894_v1, 0.0 }
 0x128   :  { %v806_v61 = vsel %vm716_vm3, %v2534_v55, 0.0  ;;  %1360 = vst.msk [vmem:[%s2845_s4 + $0xd0] sm:$0xf] %vm1307_vm2, %v1531_v23  ;;  %v1534_v9 = vpack.c.bf16 %v2636_v32, %v2636_v32  ;;  %v897_v43 = vmul.f32 %v2518_v60, %v2518_v60  ;;  %v1532_v16 = vpack.c.bf16 %v2642_v5, %v2642_v5  ;;  %v701_v57 = vpop.f32.mrf.mxu1 }
 0x129   :  { %v801_v10 = vadd.f32 %v800_v54, %v799_v21  ;;  %v996_v31 = vadd.f32 %v995_v25, %v994_v41  ;;  %v1003_v38 = vsel %vm716_vm3, %v895_v2, 0.0  ;;  %v2683_v55 = vadd.f32 %v2526_v7, %v2108_v28 }
 0x12a   :  { %1363 = vst.msk [vmem:[%s2845_s4 + $0xdc] sm:$0xf] %vm1307_vm2, %v1534_v9  ;;  %v2687_v50 = vadd.f32 %v2108_v28, %v2554_v35  ;;  %v2690_v52 = vadd.f32 %v1637_v12, %v2108_v28  ;;  %v1005_v46 = vsel %vm716_vm3, %v896_v40, 0.0  ;;  %1361 = vst.msk [vmem:[%s2845_s4 + $0xd4] sm:$0xf] %vm1307_vm2, %v1532_v16  ;;  %v810_v7 = vsel %vm716_vm3, %v2518_v60, 0.0 }
 0x12b   :  { %v998_v34 = vadd.f32 %v997_v27, %v996_v31  ;;  %v803_v29 = vadd.f32 %v802_v36, %v801_v10  ;;  %v898_v35 = vmul.f32 %v2572_v37, %v2572_v37  ;;  %v1537_v59 = vpack.c.bf16 %v2683_v55, %v2683_v55  ;;  %v1646_v40 = vld [vmem:[%s2844_s3] ss:$0 sm:$0xff] }
 0x12c   :  { %v2704_v30 = vadd.f32 %v2108_v28, %v688_v14  ;;  %v1535_v44 = vpack.c.bf16 %v2687_v50, %v2687_v50  ;;  %v1007_v48 = vsel %vm716_vm3, %v897_v43, 0.0  ;;  %v812_v51 = vsel %vm716_vm3, %v2572_v37, 0.0  ;;  %v1641_v37 = vpop.f32.mrf.mxu1 }
 0x12d   :  { %v805_v24 = vadd.f32 %v804_v4, %v803_v29  ;;  %v1000_v33 = vadd.f32 %v999_v6, %v998_v34  ;;  %v899_v60 = vmul.f32 %v2613_v15, %v2613_v15  ;;  %1366 = vst.msk [vmem:[%s2845_s4 + $0xe8] sm:$0xf] %vm1307_vm2, %v1537_v59  ;;  %v1538_v11 = vpack.c.bf16 %v2690_v52, %v2690_v52 }
 0x12e   :  { %v900_v12 = vmul.f32 %v2568_v56, %v2568_v56  ;;  %1364 = vst.msk [vmem:[%s2845_s4 + $0xe0] sm:$0xf] %vm1307_vm2, %v1535_v44  ;;  %v1009_v17 = vsel %vm716_vm3, %v898_v35, 0.0  ;;  %v814_v18 = vsel %vm716_vm3, %v2613_v15, 0.0  ;;  %v1536_v41 = vpack.c.bf16 %v2704_v30, %v2704_v30 }
 0x12f   :  { %v1002_v42 = vadd.f32 %v1001_v3, %v1000_v33  ;;  %v807_v62 = vadd.f32 %v806_v61, %v805_v24  ;;  %1367 = vst.msk [vmem:[%s2845_s4 + $0xec] sm:$0xf] %vm1307_vm2, %v1538_v11  ;;  %v2735_v58 = vadd.f32 %v1640_v20, %v2108_v28  ;;  %v2738_v25 = vadd.f32 %v2108_v28, %v701_v57 }
 0x130   :  { %v2741_v27 = vadd.f32 %v1641_v37, %v2108_v28  ;;  %v816_v15 = vsel %vm716_vm3, %v2568_v56, 0.0  ;;  %v901_v10 = vmul.f32 %v2576_v63, %v2576_v63  ;;  %v1011_v31 = vsel %vm716_vm3, %v899_v60, 0.0  ;;  %1365 = vst.msk [vmem:[%s2845_s4 + $0xe4] sm:$0xf] %vm1307_vm2, %v1536_v41  ;;  %v704_v28 = vpop.f32.mrf.mxu1 }
 0x131   :  { %v809_v47 = vadd.f32 %v808_v8, %v807_v62  ;;  %v1004_v22 = vadd.f32 %v1003_v38, %v1002_v42  ;;  %v1541_v14 = vpack.c.bf16 %v2735_v58, %v2735_v58  ;;  %v1013_v19 = vsel %vm716_vm3, %v900_v12, 0.0 }
 0x132   :  { %v818_v56 = vsel %vm716_vm3, %v2576_v63, 0.0  ;;  %v902_v34 = vmul.f32 %v2621_v26, %v2621_v26  ;;  %v1539_v29 = vpack.c.bf16 %v2738_v25, %v2738_v25  ;;  %v1542_v4 = vpack.c.bf16 %v2741_v27, %v2741_v27 }
 0x133   :  { %v1006_v45 = vadd.f32 %v1005_v46, %v1004_v22  ;;  %v811_v0 = vadd.f32 %v810_v7, %v809_v47  ;;  %1370 = vst.msk [vmem:[%s2845_s4 + $0xf8] sm:$0xf] %vm1307_vm2, %v1541_v14  ;;  %v1015_v2 = vsel %vm716_vm3, %v901_v10, 0.0  ;;  %v820_v63 = vsel %vm716_vm3, %v2621_v26, 0.0 }
 0x134   :  { %v903_v23 = vmul.f32 %v2642_v5, %v2642_v5  ;;  %1368 = vst.msk [vmem:[%s2845_s4 + $0xf0] sm:$0xf] %vm1307_vm2, %v1539_v29  ;;  %v705_v24 = vadd.f32 %v1646_v40, %v704_v28  ;;  %1371 = vst.msk [vmem:[%s2845_s4 + $0xfc] sm:$0xf] %vm1307_vm2, %v1542_v4  ;;  %v904_v26 = vmul.f32 %v2617_v49, %v2617_v49  ;;  %v1017_v8 = vsel %vm716_vm3, %v902_v34, 0.0 }
 0x135   :  { %v813_v54 = vadd.f32 %v812_v51, %v811_v0  ;;  %v1008_v13 = vadd.f32 %v1007_v48, %v1006_v45  ;;  %v822_v3 = vsel %vm716_vm3, %v2642_v5, 0.0  ;;  %v824_v43 = vsel %vm716_vm3, %v2617_v49, 0.0 }
 0x136   :  { %v1540_v61 = vpack.c.bf16 %v705_v24, %v705_v24  ;;  %v905_v62 = vmul.f32 %v2636_v32, %v2636_v32  ;;  %v1019_v16 = vsel %vm716_vm3, %v903_v23, 0.0  ;;  %v1021_v5 = vsel %vm716_vm3, %v904_v26, 0.0 }
 0x137   :  { %v1010_v21 = vadd.f32 %v1009_v17, %v1008_v13  ;;  %v815_v53 = vadd.f32 %v814_v18, %v813_v54  ;;  %v826_v47 = vsel %vm716_vm3, %v2636_v32, 0.0  ;;  %v906_v49 = vmul.f32 %v2687_v50, %v2687_v50 }
 0x138   :  { %1369 = vst.msk [vmem:[%s2845_s4 + $0xf4] sm:$0xf] %vm1307_vm2, %v1540_v61  ;;  %v1023_v7 = vsel %vm716_vm3, %v905_v62, 0.0  ;;  %v828_v35 = vsel %vm716_vm3, %v2687_v50, 0.0  ;;  %v907_v59 = vmul.f32 %v2704_v30, %v2704_v30  ;;  %v908_v44 = vmul.f32 %v2683_v55, %v2683_v55 }
 0x139   :  { %v817_v36 = vadd.f32 %v816_v15, %v815_v53  ;;  %v1012_v1 = vadd.f32 %v1011_v31, %v1010_v21  ;;  %v1025_v32 = vsel %vm716_vm3, %v906_v49, 0.0  ;;  %v830_v48 = vsel %vm716_vm3, %v2704_v30, 0.0 }
 0x13a   :  { %v832_v11 = vsel %vm716_vm3, %v2683_v55, 0.0  ;;  %v909_v50 = vmul.f32 %v2690_v52, %v2690_v52  ;;  %v1027_v12 = vsel %vm716_vm3, %v907_v59, 0.0  ;;  %v1029_v37 = vsel %vm716_vm3, %v908_v44, 0.0 }
 0x13b   :  { %v1014_v39 = vadd.f32 %v1013_v19, %v1012_v1  ;;  %v819_v6 = vadd.f32 %v818_v56, %v817_v36  ;;  %v834_v17 = vsel %vm716_vm3, %v2690_v52, 0.0  ;;  %v910_v30 = vmul.f32 %v2738_v25, %v2738_v25 }
 0x13c   :  { %v1031_v21 = vsel %vm716_vm3, %v909_v50, 0.0  ;;  %v836_v55 = vsel %vm716_vm3, %v2738_v25, 0.0  ;;  %v911_v53 = vmul.f32 %v705_v24, %v705_v24  ;;  %v912_v31 = vmul.f32 %v2735_v58, %v2735_v58 }
 0x13d   :  { %v821_v33 = vadd.f32 %v820_v63, %v819_v6  ;;  %v1016_v20 = vadd.f32 %v1015_v2, %v1014_v39  ;;  %v1033_v14 = vsel %vm716_vm3, %v910_v30, 0.0  ;;  %v838_v52 = vsel %vm716_vm3, %v705_v24, 0.0 }
 0x13e   :  { %v840_v28 = vsel %vm716_vm3, %v2735_v58, 0.0  ;;  %v913_v19 = vmul.f32 %v2741_v27, %v2741_v27  ;;  %v1035_v25 = vsel %vm716_vm3, %v911_v53, 0.0  ;;  %v1037_v29 = vsel %vm716_vm3, %v912_v31, 0.0 }
 0x13f   :  { %v1018_v9 = vadd.f32 %v1017_v8, %v1016_v20  ;;  %v823_v42 = vadd.f32 %v822_v3, %v821_v33  ;;  %v842_v39 = vsel %vm716_vm3, %v2741_v27, 0.0 }
 0x140   :  { %v1039_v2 = vsel %vm716_vm3, %v913_v19, 0.0 }
 0x141   :  { %v825_v38 = vadd.f32 %v824_v43, %v823_v42  ;;  %v1020_v46 = vadd.f32 %v1019_v16, %v1018_v9 }
 0x143   :  { %v1022_v22 = vadd.f32 %v1021_v5, %v1020_v46  ;;  %v827_v57 = vadd.f32 %v826_v47, %v825_v38 }
 0x145   :  { %v829_v45 = vadd.f32 %v828_v35, %v827_v57  ;;  %v1024_v0 = vadd.f32 %v1023_v7, %v1022_v22 }
 0x147   :  { %v1026_v51 = vadd.f32 %v1025_v32, %v1024_v0  ;;  %v831_v60 = vadd.f32 %v830_v48, %v829_v45 }
 0x149   :  { %v833_v54 = vadd.f32 %v832_v11, %v831_v60  ;;  %v1028_v13 = vadd.f32 %v1027_v12, %v1026_v51 }
 0x14b   :  { %v1030_v18 = vadd.f32 %v1029_v37, %v1028_v13  ;;  %v835_v41 = vadd.f32 %v834_v17, %v833_v54 }
 0x14d   :  { %v837_v15 = vadd.f32 %v836_v55, %v835_v41  ;;  %v1032_v10 = vadd.f32 %v1031_v21, %v1030_v18 }
 0x14f   :  { %v1034_v36 = vadd.f32 %v1033_v14, %v1032_v10  ;;  %v839_v1 = vadd.f32 %v838_v52, %v837_v15 }
 0x151   :  { %v841_v56 = vadd.f32 %v840_v28, %v839_v1  ;;  %v1036_v34 = vadd.f32 %v1035_v25, %v1034_v36 }
 0x153   :  { %v843_v6 = vadd.f32 %v842_v39, %v841_v56  ;;  %v1038_v4 = vadd.f32 %v1037_v29, %v1036_v34 }
 0x155   :  { %v844_v63 = vrot.slane %v843_v6, 4  ;;  %v1040_v23 = vadd.f32 %v1039_v2, %v1038_v4 }
 0x157   :  { %v845_v40 = vadd.f32 %v844_v63, %v843_v6  ;;  %v1041_v58 = vrot.slane %v1040_v23, 4 }
 0x159   :  { %v846_v24 = vrot.slane %v845_v40, 2  ;;  %v1042_v33 = vadd.f32 %v1041_v58, %v1040_v23 }
 0x15b   :  { %v847_v20 = vadd.f32 %v846_v24, %v845_v40  ;;  %v1043_v26 = vrot.slane %v1042_v33, 2 }
 0x15d   :  { %v848_v8 = vrot.slane %v847_v20, 1  ;;  %v1044_v3 = vadd.f32 %v1043_v26, %v1042_v33 }
 0x15f   :  { %v1045_v61 = vrot.slane %v1044_v3, 1  ;;  %v849_v9 = vadd.f32 %v848_v8, %v847_v20 }
 0x161   :  { %v1046_v42 = vadd.f32 %v1045_v61, %v1044_v3 }
 0x163   :  { %v1048_v27 = vsel %vm1047_vm4, %v849_v9, %v1046_v42 }
 0x164   :  { %1050 = vst.msk [vmem:[%s2846_s5] sm:$0x3] %vm1049_vm5, %v1048_v27 }

// kernel: residual_block_nhwc.5
= control target key start
LH: loop header
LB: loop body
LE: loop exit
PB: predicated region body
PF: predicated region fallthrough
CT: control target
= control target key end

     0   :  { %14 = vsyncpa [#allocation3], 0  ;;  %s5318_s0 = inlined_call_operand.vmem [shape: bf16[2,16,16,8], index: 0, kind: input, shape index: {}]   ;;  %s5319_s1 = inlined_call_operand.vmem [shape: f32[2,16,16,4], index: 1, kind: input, shape index: {}]   ;;  %s5320_s2 = inlined_call_operand.vmem [shape: f32[2,1,16,8], index: 2, kind: input, shape index: {}, may-alias: {2,3}]   ;;  %s5321_s3 = inlined_call_operand.vmem [shape: f32[2,1,16,8], index: 3, kind: input, shape index: {}, may-alias: {2,3}]   ;;  %s5322_s4 = inlined_call_operand.vmem [shape: f32[2,8], index: 4, kind: input, shape index: {}]   ;;  %s5323_s5 = inlined_call_operand.vmem [shape: bf16[72,4], index: 5, kind: input, shape index: {}]   ;;  %s5324_s6 = inlined_call_operand.vmem [shape: f32[1,4], index: 6, kind: input, shape index: {}]   ;;  %s5325_s7 = inlined_call_operand.vmem [shape: f32[2,16,16,4], index: 7, kind: output, shape index: {0}]   ;;  %s5326_s8 = inlined_call_operand.hbm [shape: f32[2,1,2,4], index: 8, kind: output, shape index: {1}]  }
   0x1   :  { %16 = vsyncpa [#allocation3 + $0x1], 0  ;;  %s3432_s27 = smov 0   ;;  %s3434_s28 = smov 0  }
   0x2   :  { %s3436_s29 = smov 0   ;;  %s3438_s30 = smov 0  }
   0x3   :  { %s3440_s9 = smov 0   ;;  %s3442_s10 = smov 0  }
   0x4 LB: > { %s3037_s11 = sadd.s32 4294967295, %s3380_s10   ;;  %s3038_s12 = sadd.s32 4294967294, %s3380_s10   ;;  %s3380_s10 = sphi %s3442_s10, %s22_s10   ;;  %s3376_s9 = sphi %s3440_s9, %s5595_s9   ;;  %s3372_s30 = sphi %s3438_s30, %s5594_s30   ;;  %s3368_s29 = sphi %s3436_s29, %s5593_s29   ;;  %s3364_s28 = sphi %s3434_s28, %s5592_s28   ;;  %s3360_s27 = sphi %s3432_s27, %s5591_s27  }
   0x5   : > { %s34_s13 = sadd.s32 1, %s3376_s9  ;;  %s246_s14 = sadd.s32 1, %s3368_s29 }
   0x6   : > { %p36_p0 = scmp.ge.s32.totalorder %s34_s13, 2  ;;  %p256_p1 = scmp.ne.s32.totalorder %s3368_s29, %s3364_s28 }
   0x7   : > { %p257_p2 = scmp.eq.s32.totalorder %s3037_s11, 1  ;;  %p262_p3 = scmp.ne.s32.totalorder %s3364_s28, %s3360_s27 }
   0x8   : > { %s5597_s13 = smov (%p36_p0, %s34_s13), 0  ;;  %p263_p5 = scmp.eq.s32.totalorder %s3038_s12, 1 }
   0x9   : > { %p3472_p4 = por %p257_p2, %p256_p1  ;;  %s241_s16 = ssub.s32 %s3376_s9, %s5597_s13 }
   0xa   : > { %p3041_p6 = scmp.ge.s32.totalorder %s3380_s10, 1  ;;  %p244_p7 = scmp.eq.s32.totalorder %s241_s16, 0 }
   0xb   : > { %p3479_p8 = por %p263_p5, %p262_p3  ;;  %p342_p9 = scmp.lt.s32.totalorder %s3380_s10, 3 }
   0xc   : > { %s3485_s18 = scalar_select %p244_p7, %s3368_s29, %s246_s14  }
   0xd   : > { %p343_p10 = pnand %p3041_p6, %p342_p9 }
   0xf   : > { %346 = sbr.rel (%p343_p10) target bundleno = 614 (0x266), region = 48 }
  0x14   : > { %p420_p11 = scmp.lt.s32.totalorder %s3372_s30, 1  ;;  %v645_v0 = vlaneseq  ;;  %v3502_v2 = vld [vmem:[%s5322_s4] ss:$0 sm:$0xff]  ;;  %v3516_v14 = vld [vmem:[%s5322_s4 + $0x1] ss:$0 sm:$0xff]  ;;  %s3382_s12 = smov 8  }
  0x15   : > { %s3383_s14 = smov 16   ;;  %s3384_s26 = smov 24  }
  0x16   : > { %s3489_s19 = scalar_select %p420_p11, %s3372_s30, 1  ;;  %v3491_v1 = vshrl.u32 %v645_v0, 7 }
  0x17   : > { %s3385_s11 = smov 48  }
  0x18   : > { %s3081_s20 = sshll.u32 %s3489_s19, 7  ;;  %v649_v6 = vadd.s32 24, %v3491_v1  ;;  %v647_v7 = vadd.s32 8, %v3491_v1  ;;  %v3510_v8 = vadd.s32 40, %v3491_v1  ;;  %vm1351_vm0 = vcmp.lt.s32.totalorder %v3491_v1, 7  ;;  %s3083_s16 = sshll.u32 %s3489_s19, 4 }
  0x19   : > { %s3497_s23 = scalar_lea.vmem %s5318_s0, %s3081_s20  ;;  %v653_v50 = vadd.s32 56, %v3491_v1  ;;  %s449_s22 = scalar_lea.vmem %s5320_s2, %s3083_s16 }
  0x1a   : > { %v3151_v3 = vld [vmem:[%s3497_s23 + $0x10] sm:$0xff]   ;;  %v3087_v4 = vld [vmem:[%s3497_s23] sm:$0xff]   ;;  %v3152_v5 = vld [vmem:[%s3497_s23 + $0x18] sm:$0xff]   ;;  %v703_v45 = vand.u32 15, %v649_v6  ;;  %v689_v47 = vand.u32 15, %v647_v7  ;;  %v717_v54 = vand.u32 15, %v3510_v8  ;;  %s458_s25 = scalar_lea.vmem %s5321_s3, %s3083_s16 }
  0x1b   : > { %v3096_v9 = vunpack.c.l.bf16 %v3151_v3  ;;  %v3097_v10 = vunpack.c.h.bf16 %v3151_v3  ;;  %v3088_v11 = vunpack.c.l.bf16 %v3087_v4  ;;  %v3089_v12 = vunpack.c.h.bf16 %v3087_v4  ;;  %v3150_v13 = vld [vmem:[%s3497_s23 + $0x8] sm:$0xff]   ;;  %v3153_v44 = vld [vmem:[%s3497_s23 + $0x20] sm:$0xff]   ;;  %s3078_s16 = sshll.u32 %s3372_s30, 5  ;;  %s3386_s30 = smov [#allocation2]  }
  0x1c   : > { %v3100_v15 = vunpack.c.l.bf16 %v3152_v5  ;;  %v3101_v16 = vunpack.c.h.bf16 %v3152_v5  ;;  %v3092_v17 = vunpack.c.l.bf16 %v3150_v13  ;;  %v3093_v18 = vunpack.c.h.bf16 %v3150_v13  ;;  %s5278_s21 = scalar_lea.hbm %s5326_s8, %s3078_s16 }
  0x1d   : > { %v545_v19 = vmul.f32 %v3096_v9, %v3502_v2  ;;  %v546_v20 = vmul.f32 %v3097_v10, %v3502_v2  ;;  %v541_v21 = vmul.f32 %v3088_v11, %v3502_v2  ;;  %v542_v22 = vmul.f32 %v3089_v12, %v3502_v2 }
  0x1e   : > { %v547_v23 = vmul.f32 %v3100_v15, %v3502_v2  ;;  %v548_v24 = vmul.f32 %v3101_v16, %v3502_v2  ;;  %v543_v25 = vmul.f32 %v3092_v17, %v3502_v2  ;;  %v544_v26 = vmul.f32 %v3093_v18, %v3502_v2 }
  0x1f   : > { %v581_v27 = vadd.f32 %v3516_v14, %v545_v19  ;;  %v582_v28 = vadd.f32 %v3516_v14, %v546_v20  ;;  %v577_v29 = vadd.f32 %v3516_v14, %v541_v21  ;;  %v578_v30 = vadd.f32 %v3516_v14, %v542_v22  ;;  %v3154_v22 = vld [vmem:[%s3497_s23 + $0x28] sm:$0xff]  }
  0x20   : > { %v583_v31 = vadd.f32 %v3516_v14, %v547_v23  ;;  %v584_v32 = vadd.f32 %v3516_v14, %v548_v24  ;;  %v579_v33 = vadd.f32 %v3516_v14, %v543_v25  ;;  %v580_v34 = vadd.f32 %v3516_v14, %v544_v26  ;;  %v3155_v26 = vld [vmem:[%s3497_s23 + $0x30] sm:$0xff]  }
  0x21   : > { %v3534_v35 = vmax.f32 %v581_v27, 0.0  ;;  %v3536_v36 = vmax.f32 %v582_v28, 0.0  ;;  %v3538_v37 = vmax.f32 %v577_v29, 0.0  ;;  %v3540_v38 = vmax.f32 %v578_v30, 0.0 }
  0x22   : > { %v3542_v39 = vmax.f32 %v583_v31, 0.0  ;;  %v3544_v40 = vmax.f32 %v584_v32, 0.0  ;;  %v3546_v41 = vmax.f32 %v579_v33, 0.0  ;;  %v3548_v42 = vmax.f32 %v580_v34, 0.0 }
  0x23   : > { %v1306_v43 = vpack.c.bf16 %v3536_v36, %v3534_v35  ;;  %v1304_v46 = vpack.c.bf16 %v3540_v38, %v3538_v37  ;;  %v1325_v48 = vrot.slane %v3534_v35, 1  ;;  %v3104_v52 = vunpack.c.l.bf16 %v3153_v44 }
  0x24   : > { %v1307_v49 = vpack.c.bf16 %v3544_v40, %v3542_v39  ;;  %v1305_v51 = vpack.c.bf16 %v3548_v42, %v3546_v41  ;;  %v3105_v53 = vunpack.c.h.bf16 %v3153_v44  ;;  %v1326_v55 = vrot.slane %v3536_v36, 1 }
  0x25   : > { %1518 = vrot.lane.b32.xlu1 %v1306_v43, %s3382_s12  ;;  %1514 = vrot.lane.b32.xlu0 %v1304_v46, %s3382_s12  ;;  %vm3566_vm1 = vcmp.lt.s32.totalorder %v703_v45, 15  ;;  %v3571_v57 = vrot.slane %v3546_v41, 1  ;;  %v1324_v58 = vrot.slane %v3548_v42, 1  ;;  %v549_v59 = vmul.f32 %v3104_v52, %v3502_v2  ;;  %v3156_v52 = vld [vmem:[%s3497_s23 + $0x38] sm:$0xff]  }
  0x26   : > { %v550_v60 = vmul.f32 %v3105_v53, %v3502_v2  ;;  %vm3576_vm2 = vcmp.lt.s32.totalorder %v689_v47, 15  ;;  %v1322_v62 = vrot.slane %v3540_v38, 1  ;;  %v3592_v3 = vrot.slane %v3538_v37, 1 }
  0x27   : > { %v3584_v63 = vsel %vm1351_vm0, %v1324_v58, %v1325_v48  ;;  %v3589_v0 = vsel %vm1351_vm0, %v3571_v57, %v1324_v58  ;;  %v1327_v4 = vrot.slane %v3542_v39, 1  ;;  %v585_v5 = vadd.f32 %v3516_v14, %v549_v59 }
  0x28   : > { %v586_v6 = vadd.f32 %v3516_v14, %v550_v60  ;;  %v1736_v7 = vsel %vm3566_vm1, %v3584_v63, 0.0  ;;  %v3604_v8 = vsel %vm1351_vm0, %v1322_v62, %v3571_v57  ;;  %v3613_v11 = vsel %vm1351_vm0, %v1325_v48, %v1326_v55 }
  0x29   : > { %1520 = vrot.lane.b32.xlu1 %v1307_v49, %s3382_s12  ;;  %1516 = vrot.lane.b32.xlu0 %v1305_v51, %s3382_s12  ;;  %v1766_v9 = vpack.c.bf16 %v1736_v7, %v3589_v0  ;;  %v3609_v10 = vsel %vm1351_vm0, %v1326_v55, %v1327_v4  ;;  %v655_v12 = vadd.s32 72, %v3491_v1  ;;  %v3616_v13 = vmax.f32 %v585_v5, 0.0 }
  0x2a   : > { %v3618_v15 = vmax.f32 %v586_v6, 0.0  ;;  %v1959_v16 = vsel %vm3566_vm1, %v3609_v10, 0.0  ;;  %v3624_v17 = vadd.s32 88, %v3491_v1  ;;  %v3629_v18 = vsel %vm1351_vm0, %v3592_v3, %v1322_v62 }
  0x2b   : > { %5386 = vst [vmem:[#allocation5_spill] sm:$0xff] %v3616_v13  ;;  %v1734_v19 = vsel %vm3576_vm2, %v3604_v8, 0.0  ;;  %vm3634_vm3 = vcmp.lt.s32.totalorder %v717_v54, 15  ;;  %v1328_v21 = vrot.slane %v3544_v40, 1  ;;  %v1989_v25 = vpack.c.bf16 %v1959_v16, %v3613_v11 }
  0x2c   : > { %5387 = vst [vmem:[#allocation6_spill] sm:$0xff] %v3618_v15  ;;  %v1308_v24 = vpack.c.bf16 %v3618_v15, %v3616_v13  ;;  %v3647_v27 = vadd.s32 104, %v3491_v1  ;;  %v1738_v29 = vsel %vm3634_vm3, %v3609_v10, 0.0  ;;  %v1329_v30 = vrot.slane %v3616_v13, 1  ;;  %v3160_v13 = vld [vmem:[%s3497_s23 + $0x58] sm:$0xff]  }
  0x2d   : > { %1802 = vrot.lane.b32.xlu0 %v1766_v9, %s3383_s14  ;;  %v731_v31 = vand.u32 15, %v653_v50  ;;  %v1765_v32 = vpack.c.bf16 %v1734_v19, %v3629_v18  ;;  %v1957_v33 = vsel %vm3576_vm2, %v3584_v63, 0.0  ;;  %v3108_v34 = vunpack.c.l.bf16 %v3154_v22 }
  0x2e   : > { %1522 = vrot.lane.b32.xlu1 %v1308_v24, %s3382_s12  ;;  %v3109_v43 = vunpack.c.h.bf16 %v3154_v22  ;;  %v3661_v44 = vsel %vm1351_vm0, %v1328_v21, %v1329_v30  ;;  %v3112_v46 = vunpack.c.l.bf16 %v3155_v26  ;;  %v3113_v47 = vunpack.c.h.bf16 %v3155_v26 }
  0x2f   : > { %vm3663_vm4 = vcmp.lt.s32.totalorder %v731_v31, 15  ;;  %v1767_v49 = vpack.c.bf16 %v1738_v29, %v3613_v11  ;;  %v551_v50 = vmul.f32 %v3108_v34, %v3502_v2  ;;  %v1988_v53 = vpack.c.bf16 %v1957_v33, %v3589_v0 }
  0x30   : > { %v552_v51 = vmul.f32 %v3109_v43, %v3502_v2  ;;  %v3676_v54 = vsel %vm1351_vm0, %v1327_v4, %v1328_v21  ;;  %v1740_v55 = vsel %vm3663_vm4, %v3661_v44, 0.0  ;;  %v553_v58 = vmul.f32 %v3112_v46, %v3502_v2  ;;  %v3157_v46 = vld [vmem:[%s3497_s23 + $0x40] sm:$0xff]  }
  0x31   : > { %2025 = vrot.lane.b32.xlu0 %v1989_v25, %s3383_s14  ;;  %5392 = vst [vmem:[#allocation7_spill] sm:$0xff] %v3676_v54  ;;  %v587_v59 = vadd.f32 %v3516_v14, %v551_v50  ;;  %v554_v62 = vmul.f32 %v3113_v47, %v3502_v2  ;;  %v745_v5 = vand.u32 15, %v655_v12  ;;  %v1961_v4 = vsel %vm3634_vm3, %v3661_v44, 0.0 }
  0x32   : > { %1800 = vrot.lane.b32.xlu1 %v1765_v32, %s3383_s14  ;;  %v588_v60 = vadd.f32 %v3516_v14, %v552_v51  ;;  %v1330_v6 = vrot.slane %v3618_v15, 1  ;;  %v589_v7 = vadd.f32 %v3516_v14, %v553_v58  ;;  %v3116_v9 = vunpack.c.l.bf16 %v3156_v52 }
  0x33   : > { %v3692_v16 = vrot.slane %v3538_v37, 7  ;;  %v1768_v19 = vpack.c.bf16 %v1740_v55, %v3676_v54  ;;  %v3696_v21 = vmax.f32 %v587_v59, 0.0  ;;  %v3117_v12 = vunpack.c.h.bf16 %v3156_v52 }
  0x34   : > { %v3698_v22 = vmax.f32 %v588_v60, 0.0  ;;  %v3700_v24 = vmax.f32 %v589_v7, 0.0  ;;  %v759_v25 = vand.u32 15, %v3624_v17  ;;  %v555_v26 = vmul.f32 %v3116_v9, %v3502_v2 }
  0x35   : > { %1804 = vrot.lane.b32.xlu0 %v1767_v49, %s3383_s14  ;;  %5393 = vst [vmem:[#allocation8_spill] sm:$0xff] %v3696_v21  ;;  %v1990_v37 = vpack.c.bf16 %v1961_v4, %v3676_v54  ;;  %v1331_v29 = vrot.slane %v3696_v21, 1  ;;  %v590_v31 = vadd.f32 %v3516_v14, %v554_v62  ;;  %vm3708_vm5 = vcmp.lt.s32.totalorder %v745_v5, 15 }
  0x36   : > { %5394 = vst [vmem:[#allocation9_spill] sm:$0xff] %v3698_v22  ;;  %5395 = vst [vmem:[#allocation10_spill] sm:$0xff] %v3700_v24  ;;  %2023 = vrot.lane.b32.xlu1 %v1988_v53, %s3383_s14  ;;  %v3715_v34 = vsel %vm1351_vm0, %v1329_v30, %v1330_v6  ;;  %v1332_v17 = vrot.slane %v3698_v22, 1  ;;  %v1333_v43 = vrot.slane %v3700_v24, 1  ;;  %v556_v50 = vmul.f32 %v3117_v12, %v3502_v2 }
  0x37   : > { %v3724_v49 = vsel %vm1351_vm0, %v1330_v6, %v1331_v29  ;;  %v591_v51 = vadd.f32 %v3516_v14, %v555_v26  ;;  %v1309_v30 = vpack.c.bf16 %v3698_v22, %v3696_v21  ;;  %vm3736_vm6 = vcmp.lt.s32.totalorder %v759_v25, 15  ;;  %v3158_v26 = vld [vmem:[%s3497_s23 + $0x48] sm:$0xff]  }
  0x38   : > { %v1963_v52 = vsel %vm3663_vm4, %v3724_v49, 0.0  ;;  %v1742_v53 = vsel %vm3708_vm5, %v3724_v49, 0.0  ;;  %v3742_v59 = vmax.f32 %v590_v31, 0.0  ;;  %v3746_v60 = vsel %vm1351_vm0, %v1332_v17, %v1333_v43 }
  0x39   : > { %1806 = vrot.lane.b32.xlu0 %v1768_v19, %s3383_s14  ;;  %v1991_v58 = vpack.c.bf16 %v1963_v52, %v3715_v34  ;;  %v3120_v62 = vunpack.c.l.bf16 %v3157_v46  ;;  %v3749_v5 = vrot.slane %v3546_v41, 7  ;;  %v3753_v7 = vmax.f32 %v591_v51, 0.0 }
  0x3a   : > { %2027 = vrot.lane.b32.xlu1 %v1990_v37, %s3383_s14  ;;  %5400 = vst [vmem:[#allocation11_spill] sm:$0xff] %v3742_v59  ;;  %v1769_v9 = vpack.c.bf16 %v1742_v53, %v3715_v34  ;;  %v592_v19 = vadd.f32 %v3516_v14, %v556_v50  ;;  %v1334_v12 = vrot.slane %v3742_v59, 1  ;;  %v3121_v25 = vunpack.c.h.bf16 %v3157_v46 }
  0x3b   : > { %5401 = vst [vmem:[#allocation12_spill] sm:$0xff] %v3749_v5  ;;  %5402 = vst [vmem:[#allocation13_spill] sm:$0xff] %v3753_v7  ;;  %v3762_v41 = vsel %vm1351_vm0, %v1331_v29, %v1332_v17  ;;  %v1965_v37 = vsel %vm3708_vm5, %v3746_v60, 0.0  ;;  %v1744_v31 = vsel %vm3736_vm6, %v3746_v60, 0.0  ;;  %v1335_v51 = vrot.slane %v3753_v7, 1 }
  0x3c   : > { %v1310_v46 = vpack.c.bf16 %v3742_v59, %v3700_v24  ;;  %v557_v50 = vmul.f32 %v3120_v62, %v3502_v2  ;;  %v558_v29 = vmul.f32 %v3121_v25, %v3502_v2  ;;  %v773_v17 = vand.u32 15, %v3647_v27  ;;  %v3159_v27 = vld [vmem:[%s3497_s23 + $0x50] sm:$0xff]  }
  0x3d   : > { %2029 = vrot.lane.b32.xlu0 %v1991_v58, %s3383_s14  ;;  %v3780_v53 = vsel %vm1351_vm0, %v1334_v12, %v1335_v51  ;;  %v661_v58 = vadd.s32 120, %v3491_v1  ;;  %v3124_v6 = vunpack.c.l.bf16 %v3158_v26  ;;  %v1770_v33 = vpack.c.bf16 %v1744_v31, %v3762_v41 }
  0x3e   : > { %1524 = vrot.lane.b32.xlu1 %v1309_v30, %s3382_s12  ;;  %v1992_v30 = vpack.c.bf16 %v1965_v37, %v3762_v41  ;;  %v3786_v62 = vmax.f32 %v592_v19, 0.0  ;;  %v593_v25 = vadd.f32 %v3516_v14, %v557_v50  ;;  %v3792_v52 = vsel %vm1351_vm0, %v1333_v43, %v1334_v12 }
  0x3f   : > { %v1967_v47 = vsel %vm3736_vm6, %v3780_v53, 0.0  ;;  %v594_v48 = vadd.f32 %v3516_v14, %v558_v29  ;;  %vm3798_vm7 = vcmp.lt.s32.totalorder %v773_v17, 15  ;;  %v787_v31 = vand.u32 15, %v661_v58 }
  0x40   : > { %5403 = vst [vmem:[#allocation14_spill] sm:$0xff] %v3786_v62  ;;  %v3803_v19 = vmax.f32 %v593_v25, 0.0  ;;  %v1336_v37 = vrot.slane %v3786_v62, 1  ;;  %v3125_v50 = vunpack.c.h.bf16 %v3158_v26  ;;  %v559_v12 = vmul.f32 %v3124_v6, %v3502_v2 }
  0x41   : > { %1808 = vrot.lane.b32.xlu0 %v1769_v9, %s3383_s14  ;;  %v3128_v4 = vunpack.c.l.bf16 %v3159_v27  ;;  %v3129_v28 = vunpack.c.h.bf16 %v3159_v27  ;;  %v1311_v29 = vpack.c.bf16 %v3786_v62, %v3753_v7  ;;  %v1993_v17 = vpack.c.bf16 %v1967_v47, %v3792_v52 }
  0x42   : > { %1526 = vrot.lane.b32.xlu1 %v1310_v46, %s3382_s12  ;;  %5406 = vst [vmem:[#allocation15_spill] sm:$0xff] %v3803_v19  ;;  %v1746_v46 = vsel %vm3798_vm7, %v3780_v53, 0.0  ;;  %v1337_v58 = vrot.slane %v3803_v19, 1  ;;  %v3816_v26 = vmax.f32 %v594_v48, 0.0  ;;  %v560_v25 = vmul.f32 %v3125_v50, %v3502_v2 }
  0x43   : > { %v595_v6 = vadd.f32 %v3516_v14, %v559_v12  ;;  %vm3826_vm8 = vcmp.lt.s32.totalorder %v787_v31, 15  ;;  %v562_v48 = vmul.f32 %v3129_v28, %v3502_v2  ;;  %v663_v43 = vadd.s32 136, %v3491_v1 }
  0x44   : > { %5407 = vst [vmem:[#allocation16_spill] sm:$0xff] %v3816_v26  ;;  %v3824_v47 = vsel %vm1351_vm0, %v1336_v37, %v1337_v58  ;;  %v1771_v31 = vpack.c.bf16 %v1746_v46, %v3792_v52  ;;  %v596_v21 = vadd.f32 %v3516_v14, %v560_v25  ;;  %v3845_v50 = vsel %vm1351_vm0, %v1335_v51, %v1336_v37  ;;  %v3161_v37 = vld [vmem:[%s3497_s23 + $0x60] sm:$0xff]  }
  0x45   : > { %1810 = vrot.lane.b32.xlu0 %v1770_v33, %s3383_s14  ;;  %v561_v33 = vmul.f32 %v3128_v4, %v3502_v2  ;;  %5408 = vst [vmem:[#allocation17_spill] sm:$0xff] %v3824_v47  ;;  %v3834_v23 = vmax.f32 %v595_v6, 0.0  ;;  %v1338_v4 = vrot.slane %v3816_v26, 1  ;;  %5412 = vst [vmem:[#allocation19_spill] sm:$0xff] %v3845_v50  ;;  %v1748_v6 = vsel %vm3826_vm8, %v3824_v47, 0.0 }
  0x46   : > { %2031 = vrot.lane.b32.xlu1 %v1992_v30, %s3383_s14  ;;  %v1312_v46 = vpack.c.bf16 %v3816_v26, %v3803_v19  ;;  %v665_v51 = vadd.s32 152, %v3491_v1  ;;  %v1969_v30 = vsel %vm3798_vm7, %v3824_v47, 0.0  ;;  %v5415_v59 = vmov 0 }
  0x47   : > { %5411 = vst [vmem:[#allocation18_spill] sm:$0xff] %v3834_v23  ;;  %v597_v28 = vadd.f32 %v3516_v14, %v561_v33  ;;  %v1339_v12 = vrot.slane %v3834_v23, 1  ;;  %v801_v33 = vand.u32 15, %v663_v43  ;;  %v3869_v43 = vmax.f32 %v596_v21, 0.0 }
  0x48   : > { %v3879_v7 = vsel %vm1351_vm0, %v1337_v58, %v1338_v4  ;;  %v1994_v21 = vpack.c.bf16 %v1969_v30, %v3845_v50  ;;  %v815_v47 = vand.u32 15, %v665_v51  ;;  %v3136_v62 = vunpack.c.l.bf16 %v3161_v37 }
  0x49   : > { %2033 = vrot.lane.b32.xlu0 %v1993_v17, %s3383_s14  ;;  %v598_v17 = vadd.f32 %v3516_v14, %v562_v48  ;;  %v3855_v25 = vmax.f32 %v597_v28, 0.0  ;;  %v3864_v24 = vsel %vm1351_vm0, %v1338_v4, %v1339_v12  ;;  %v3132_v48 = vunpack.c.l.bf16 %v3160_v13  ;;  %5418 = vst [vmem:[#allocation23_spill] sm:$0xff] %v3879_v7 }
  0x4a   : > { %1528 = vrot.lane.b32.xlu1 %v1311_v29, %s3382_s12  ;;  %5414 = vst [vmem:[#allocation21_spill] sm:$0xff] %v3864_v24  ;;  %v1772_v28 = vpack.c.bf16 %v1748_v6, %v3845_v50  ;;  %vm3871_vm9 = vcmp.lt.s32.totalorder %v801_v33, 15  ;;  %v1971_v29 = vsel %vm3826_vm8, %v3864_v24, 0.0  ;;  %v1340_v6 = vrot.slane %v3869_v43, 1 }
  0x4b   : > { %5413 = vst [vmem:[#allocation20_spill] sm:$0xff] %v3855_v25  ;;  %v5416_v59 = vsel %vm3871_vm9, 4294967295, %v5415_v59  ;;  %v1341_v33 = vrot.slane %v3855_v25, 1  ;;  %v1750_v58 = vsel %vm3871_vm9, %v3864_v24, 0.0  ;;  %v3133_v4 = vunpack.c.h.bf16 %v3160_v13  ;;  %v3162_v24 = vld [vmem:[%s3497_s23 + $0x68] sm:$0xff]  }
  0x4c   : > { %5417 = vst [vmem:[#allocation22_spill] sm:$0xff] %v5416_v59  ;;  %v563_v19 = vmul.f32 %v3132_v48, %v3502_v2  ;;  %v1995_v30 = vpack.c.bf16 %v1971_v29, %v3879_v7  ;;  %v667_v50 = vadd.s32 168, %v3491_v1  ;;  %v1313_v51 = vpack.c.bf16 %v3869_v43, %v3834_v23 }
  0x4d   : > { %1812 = vrot.lane.b32.xlu0 %v1771_v31, %s3383_s14  ;;  %v3884_v31 = vmax.f32 %v598_v17, 0.0  ;;  %v564_v13 = vmul.f32 %v3133_v4, %v3502_v2  ;;  %vm3911_vm10 = vcmp.lt.s32.totalorder %v815_v47, 15  ;;  %v5420_v29 = vmov 0 }
  0x4e   : > { %1530 = vrot.lane.b32.xlu1 %v1312_v46, %s3382_s12  ;;  %v3137_v46 = vunpack.c.h.bf16 %v3161_v37  ;;  %v599_v48 = vadd.f32 %v3516_v14, %v563_v19  ;;  %v3909_v37 = vsel %vm1351_vm0, %v1340_v6, %v1341_v33  ;;  %v5421_v29 = vsel %vm3911_vm10, 4294967295, %v5420_v29 }
  0x4f   : > { %v1314_v22 = vpack.c.bf16 %v3884_v31, %v3855_v25  ;;  %5419 = vst [vmem:[#allocation24_spill] sm:$0xff] %v3909_v37  ;;  %5422 = vst [vmem:[#allocation25_spill] sm:$0xff] %v5421_v29  ;;  %v565_v17 = vmul.f32 %v3136_v62, %v3502_v2  ;;  %v600_v26 = vadd.f32 %v3516_v14, %v564_v13  ;;  %v1342_v19 = vrot.slane %v3884_v31, 1 }
  0x50   : > { %v3917_v4 = vmax.f32 %v599_v48, 0.0  ;;  %v3140_v15 = vunpack.c.l.bf16 %v3162_v24  ;;  %v1973_v62 = vsel %vm3871_vm9, %v3909_v37, 0.0  ;;  %v1752_v13 = vsel %vm3911_vm10, %v3909_v37, 0.0 }
  0x51   : > { %1814 = vrot.lane.b32.xlu0 %v1772_v28, %s3383_s14  ;;  %v1773_v28 = vpack.c.bf16 %v1750_v58, %v3879_v7  ;;  %v3924_v58 = vsel %vm1351_vm0, %v1339_v12, %v1340_v6  ;;  %v601_v47 = vadd.f32 %v3516_v14, %v565_v17  ;;  %v829_v7 = vand.u32 15, %v667_v50 }
  0x52   : > { %2035 = vrot.lane.b32.xlu1 %v1994_v21, %s3383_s14  ;;  %v566_v21 = vmul.f32 %v3137_v46, %v3502_v2  ;;  %5423 = vst [vmem:[#allocation26_spill] sm:$0xff] %v3924_v58  ;;  %v1343_v46 = vrot.slane %v3917_v4, 1  ;;  %v3141_v50 = vunpack.c.h.bf16 %v3162_v24  ;;  %v567_v17 = vmul.f32 %v3140_v15, %v3502_v2 }
  0x53   : > { %v3937_v6 = vmax.f32 %v601_v47, 0.0  ;;  %v3942_v54 = vmax.f32 %v600_v26, 0.0  ;;  %v1774_v24 = vpack.c.bf16 %v1752_v13, %v3924_v58  ;;  %vm3952_vm11 = vcmp.lt.s32.totalorder %v829_v7, 15 }
  0x54   : > { %v602_v12 = vadd.f32 %v3516_v14, %v566_v21  ;;  %v3946_v37 = vsel %vm1351_vm0, %v1342_v19, %v1343_v46  ;;  %v5425_v15 = vmov 0  ;;  %v3163_v21 = vld [vmem:[%s3497_s23 + $0x70] sm:$0xff]   ;;  %v3959_v26 = vsel %vm1351_vm0, %v1341_v33, %v1342_v19 }
  0x55   : > { %2037 = vrot.lane.b32.xlu0 %v1995_v30, %s3383_s14  ;;  %v669_v30 = vadd.s32 184, %v3491_v1  ;;  %5424 = vst [vmem:[#allocation27_spill] sm:$0xff] %v3946_v37  ;;  %v5426_v15 = vsel %vm3952_vm11, 4294967295, %v5425_v15  ;;  %5428 = vst [vmem:[#allocation29_spill] sm:$0xff] %v3959_v26  ;;  %v1975_v47 = vsel %vm3911_vm10, %v3946_v37, 0.0  ;;  %v1344_v5 = vrot.slane %v3942_v54, 1 }
  0x56   : > { %1532 = vrot.lane.b32.xlu1 %v1313_v51, %s3382_s12  ;;  %v1996_v51 = vpack.c.bf16 %v1973_v62, %v3924_v58  ;;  %5427 = vst [vmem:[#allocation28_spill] sm:$0xff] %v5426_v15  ;;  %v3966_v62 = vmax.f32 %v602_v12, 0.0  ;;  %v1345_v7 = vrot.slane %v3937_v6, 1  ;;  %v568_v13 = vmul.f32 %v3141_v50, %v3502_v2 }
  0x57   : > { %v603_v48 = vadd.f32 %v3516_v14, %v567_v17  ;;  %v1754_v33 = vsel %vm3952_vm11, %v3946_v37, 0.0  ;;  %v3144_v19 = vunpack.c.l.bf16 %v3163_v21  ;;  %v3145_v59 = vunpack.c.h.bf16 %v3163_v21 }
  0x58   : > { %5429 = vst [vmem:[#allocation30_spill] sm:$0xff] %v3966_v62  ;;  %v671_v58 = vadd.s32 200, %v3491_v1  ;;  %v673_v50 = vadd.s32 216, %v3491_v1  ;;  %v3983_v17 = vsel %vm1351_vm0, %v1344_v5, %v1345_v7  ;;  %v5432_v37 = vmov 0 }
  0x59   : > { %1816 = vrot.lane.b32.xlu0 %v1773_v28, %s3383_s14  ;;  %v843_v28 = vand.u32 15, %v669_v30  ;;  %v604_v30 = vadd.f32 %v3516_v14, %v568_v13  ;;  %v3978_v12 = vmax.f32 %v603_v48, 0.0  ;;  %5431 = vst [vmem:[#allocation32_spill] sm:$0xff] %v3983_v17  ;;  %v1346_v21 = vrot.slane %v3966_v62, 1 }
  0x5a   : > { %1534 = vrot.lane.b32.xlu1 %v1314_v22, %s3382_s12  ;;  %v1997_v22 = vpack.c.bf16 %v1975_v47, %v3959_v26  ;;  %v1315_v48 = vpack.c.bf16 %v3942_v54, %v3917_v4  ;;  %v1775_v47 = vpack.c.bf16 %v1754_v33, %v3959_v26  ;;  %v3997_v13 = vsel %vm1351_vm0, %v1343_v46, %v1344_v5 }
  0x5b   : > { %5430 = vst [vmem:[#allocation31_spill] sm:$0xff] %v3978_v12  ;;  %vm3985_vm12 = vcmp.lt.s32.totalorder %v843_v28, 15  ;;  %5435 = vst [vmem:[#allocation34_spill] sm:$0xff] %v3997_v13  ;;  %v3999_v28 = vmax.f32 %v604_v30, 0.0  ;;  %v1347_v29 = vrot.slane %v3978_v12, 1  ;;  %v570_v25 = vmul.f32 %v3145_v59, %v3502_v2 }
  0x5c   : > { %v5433_v37 = vsel %vm3985_vm12, 4294967295, %v5432_v37  ;;  %v857_v23 = vand.u32 15, %v671_v58  ;;  %v1756_v5 = vsel %vm3985_vm12, %v3983_v17, 0.0  ;;  %v871_v33 = vand.u32 15, %v673_v50 }
  0x5d   : > { %1818 = vrot.lane.b32.xlu0 %v1774_v24, %s3383_s14  ;;  %5434 = vst [vmem:[#allocation33_spill] sm:$0xff] %v5433_v37  ;;  %v569_v24 = vmul.f32 %v3144_v19, %v3502_v2  ;;  %5436 = vst [vmem:[#allocation35_spill] sm:$0xff] %v3999_v28  ;;  %v1348_v46 = vrot.slane %v3999_v28, 1  ;;  %v4015_v59 = vsel %vm1351_vm0, %v1346_v21, %v1347_v29  ;;  %v5444_v26 = vmov 0 }
  0x5e   : > { %2039 = vrot.lane.b32.xlu1 %v1996_v51, %s3383_s14  ;;  %v1977_v51 = vsel %vm3952_vm11, %v3983_v17, 0.0  ;;  %5437 = vst [vmem:[#allocation36_spill] sm:$0xff] %v4015_v59  ;;  %v606_v58 = vadd.f32 %v3516_v14, %v570_v25  ;;  %vm4020_vm13 = vcmp.lt.s32.totalorder %v857_v23, 15  ;;  %v1316_v50 = vpack.c.bf16 %v3966_v62, %v3937_v6 }
  0x5f   : > { %v605_v19 = vadd.f32 %v3516_v14, %v569_v24  ;;  %v3164_v24 = vld [vmem:[%s3497_s23 + $0x78] sm:$0xff]   ;;  %v4031_v17 = vsel %vm1351_vm0, %v1345_v7, %v1346_v21  ;;  %v1979_v25 = vsel %vm3985_vm12, %v4015_v59, 0.0  ;;  %v1998_v23 = vpack.c.bf16 %v1977_v51, %v3997_v13  ;;  %s3308_s23 = sshll.u32 %s3386_s30, 4  ;;  %s3309_s23 = int_to_ptr.vmem [resolvable:$false] %s3308_s23 }
  0x60   : > { %5442 = vst [vmem:[#allocation39_spill] sm:$0xff] %v4031_v17  ;;  %v1758_v7 = vsel %vm4020_vm13, %v4015_v59, 0.0  ;;  %vm4050_vm14 = vcmp.lt.s32.totalorder %v871_v33, 15  ;;  %v3148_v37 = vunpack.c.l.bf16 %v3164_v24  ;;  %v3149_v15 = vunpack.c.h.bf16 %v3164_v24  ;;  %v4066_v33 = vld [vmem:[%s449_s22 + $0x8] sm:$0xff] }
  0x61   : > { %2041 = vrot.lane.b32.xlu0 %v1997_v22, %s3383_s14  ;;  %v4018_v30 = vmax.f32 %v605_v19, 0.0  ;;  %v5439_v22 = vmov 0  ;;  %v4043_v19 = vmax.f32 %v606_v58, 0.0  ;;  %v5445_v26 = vsel %vm4050_vm14, 4294967295, %v5444_v26 }
  0x62   : > { %v5440_v22 = vsel %vm4020_vm13, 4294967295, %v5439_v22  ;;  %1536 = vrot.lane.b32.xlu1 %v1315_v48, %s3382_s12  ;;  %v1776_v48 = vpack.c.bf16 %v1756_v5, %v3997_v13  ;;  %5446 = vst [vmem:[#allocation41_spill] sm:$0xff] %v5445_v26  ;;  %v1317_v51 = vpack.c.bf16 %v3999_v28, %v3978_v12  ;;  %v1999_v5 = vpack.c.bf16 %v1979_v25, %v4031_v17 }
  0x63   : > { %5438 = vst [vmem:[#allocation37_spill] sm:$0xff] %v4018_v30  ;;  %5441 = vst [vmem:[#allocation38_spill] sm:$0xff] %v5440_v22  ;;  %v1349_v21 = vrot.slane %v4018_v30, 1  ;;  %v4059_v58 = vsel %vm1351_vm0, %v1347_v29, %v1348_v46  ;;  %v4062_v13 = vrot.slane %v4043_v19, 1  ;;  %v1777_v24 = vpack.c.bf16 %v1758_v7, %v4031_v17  ;;  %v4100_v17 = vld [vmem:[%s458_s25] sm:$0xff]  ;;  %v4106_v22 = vld [vmem:[%s458_s25 + $0x8] sm:$0xff] }
  0x64   : > { %5443 = vst [vmem:[#allocation40_spill] sm:$0xff] %v4043_v19  ;;  %5447 = vst [vmem:[#allocation42_spill] sm:$0xff] %v4059_v58  ;;  %v571_v25 = vmul.f32 %v3148_v37, %v3502_v2  ;;  %v572_v59 = vmul.f32 %v3149_v15, %v3502_v2  ;;  %v1318_v28 = vpack.c.bf16 %v4043_v19, %v4018_v30  ;;  %v677_v7 = vadd.s32 248, %v3491_v1  ;;  %s416_s25 = sand.u32 1, %s3364_s28  }
  0x65   : > { %1820 = vrot.lane.b32.xlu0 %v1775_v47, %s3383_s14  ;;  %5448 = vst [vmem:[#allocation43_spill] sm:$0xff] %v4062_v13  ;;  %v4064_v47 = vld [vmem:[%s449_s22] sm:$0xff]  ;;  %v4077_v29 = vsel %vm1351_vm0, %v1348_v46, %v1349_v21  ;;  %v4096_v2 = vsel %vm1351_vm0, %v1349_v21, %v4062_v13  ;;  %v1463_v20 = vsel %vm3826_vm8, %v3780_v53, 0.0  ;;  %v650_v55 = vadd.s32 32, %v3491_v1  ;;  %s2837_s22 = scalar_lea.sflag [#allocation3], %s416_s25 }
  0x66   : > { %1538 = vrot.lane.b32.xlu1 %v1316_v50, %s3382_s12  ;;  %5449 = vst [vmem:[#allocation44_spill] sm:$0xff] %v4077_v29  ;;  %v1981_v12 = vsel %vm4020_vm13, %v4077_v29, 0.0  ;;  %v1760_v50 = vsel %vm4050_vm14, %v4077_v29, 0.0  ;;  %v607_v46 = vadd.f32 %v3516_v14, %v571_v25  ;;  %v608_v37 = vadd.f32 %v3516_v14, %v572_v59 }
  0x67   : > { %v2000_v29 = vpack.c.bf16 %v1981_v12, %v4059_v58  ;;  %v675_v25 = vadd.s32 232, %v3491_v1  ;;  %v1778_v14 = vpack.c.bf16 %v1760_v50, %v4059_v58  ;;  %v1951_v12 = vrot.slane %v4100_v17, 1 }
  0x68   : > { %v4110_v59 = vmax.f32 %v607_v46, 0.0  ;;  %v4112_v21 = vmax.f32 %v608_v37, 0.0  ;;  %v1952_v46 = vrot.slane %v4106_v22, 1  ;;  %v899_v15 = vand.u32 15, %v677_v7 }
  0x69   : > { %1822 = vrot.lane.b32.xlu0 %v1776_v48, %s3383_s14  ;;  %v1320_v48 = vrot.slane %v4066_v33, 1  ;;  %v885_v19 = vand.u32 15, %v675_v25  ;;  %v5450_v25 = vmov 0  ;;  %v5453_v58 = vrot.slane %v4064_v47, 1 }
  0x6a   : > { %2043 = vrot.lane.b32.xlu1 %v1998_v23, %s3383_s14  ;;  %v1728_v23 = vrot.slane %v4110_v59, 1  ;;  %v1729_v37 = vrot.slane %v4112_v21, 1  ;;  %v1727_v50 = vpack.c.bf16 %v4112_v21, %v4110_v59  ;;  %v682_v32 = vand.u32 15, %v3491_v1 }
  0x6b   : > { %v1381_v30 = vsel %vm1351_vm0, %v1320_v48, %v3592_v3  ;;  %vm4126_vm15 = vcmp.lt.s32.totalorder %v885_v19, 15  ;;  %v1382_v62 = vsel %vm1351_vm0, %v5453_v58, %v1320_v48  ;;  %v1451_v58 = vsel %vm3566_vm1, %v3604_v8, 0.0 }
  0x6c   : > { %v5451_v25 = vsel %vm4126_vm15, 4294967295, %v5450_v25  ;;  %v1731_v19 = vsel %vm1351_vm0, %v4062_v13, %v1728_v23  ;;  %v1732_v7 = vsel %vm1351_vm0, %v1729_v37, %v3592_v3  ;;  %v1954_v48 = vsel %vm1351_vm0, %v1729_v37, %v1951_v12 }
  0x6d   : > { %2045 = vrot.lane.b32.xlu0 %v1999_v5, %s3383_s14  ;;  %5452 = vst [vmem:[#allocation45_spill] sm:$0xff] %v5451_v25  ;;  %v1449_v5 = vsel %vm3576_vm2, %v1381_v30, 0.0  ;;  %v1983_v61 = vsel %vm4050_vm14, %v1731_v19, 0.0  ;;  %v1762_v30 = vsel %vm4126_vm15, %v1731_v19, 0.0  ;;  %vm4152_vm2 = vcmp.lt.s32.totalorder %v899_v15, 15 }
  0x6e   : > { %1540 = vrot.lane.b32.xlu1 %v1317_v51, %s3382_s12  ;;  %v1730_v3 = vsel %vm1351_vm0, %v1728_v23, %v1729_v37  ;;  %v1764_v56 = vsel %vm4152_vm2, %v1732_v7, 0.0  ;;  %v4163_v8 = vpack.c.bf16 %v1449_v5, %v1382_v62  ;;  %v1985_v19 = vsel %vm4126_vm15, %v1954_v48, 0.0 }
  0x6f   : > { %v2001_v15 = vpack.c.bf16 %v1983_v61, %v4096_v2  ;;  %v1779_v26 = vpack.c.bf16 %v1762_v30, %v4096_v2  ;;  %v4169_v13 = vpack.c.bf16 %v1985_v19, %v1730_v3  ;;  %v1955_v23 = vsel %vm1351_vm0, %v1952_v46, %v3571_v57  ;;  %v5482_v19 = vld [vmem:[#allocation7_spill] sm:$0xff] }
  0x70   : > { %v1455_v62 = vsel %vm3663_vm4, %v3609_v10, 0.0  ;;  %v1453_v37 = vsel %vm3634_vm3, %v3584_v63, 0.0  ;;  %v1459_v5 = vsel %vm3736_vm6, %v3724_v49, 0.0  ;;  %v1780_v7 = vpack.c.bf16 %v1764_v56, %v1730_v3 }
  0x71   : > { %1824 = vrot.lane.b32.xlu0 %v1777_v24, %s3383_s14  ;;  %v1953_v24 = vsel %vm1351_vm0, %v1951_v12, %v1952_v46  ;;  %v4187_v12 = vpack.c.bf16 %v1451_v58, %v3629_v18  ;;  %v4192_v57 = vpack.c.bf16 %v1459_v5, %v3715_v34  ;;  %v4196_v10 = vpack.c.bf16 %v1455_v62, %v3613_v11 }
  0x72   : > { %1542 = vrot.lane.b32.xlu1 %v1318_v28, %s3382_s12  ;;  %v1987_v28 = vsel %vm4152_vm2, %v1955_v23, 0.0  ;;  %v4199_v63 = vpack.c.bf16 %v1453_v37, %v3589_v0  ;;  %v1461_v18 = vsel %vm3798_vm7, %v3746_v60, 0.0  ;;  %v4210_v34 = vpack.c.bf16 %v1463_v20, %v3792_v52 }
  0x73   : > { %v4207_v45 = vpack.c.bf16 %v1987_v28, %v1953_v24  ;;  %v4213_v49 = vpack.c.bf16 %v1461_v18, %v3762_v41  ;;  %v648_v11 = vadd.s32 16, %v3491_v1  ;;  %v1457_v0 = vsel %vm3708_vm5, %v3661_v44, 0.0 }
  0x74   : > { %v652_v60 = vadd.s32 48, %v3491_v1  ;;  %vm1158_vm1 = vcmp.lt.s32.totalorder %v3491_v1, 1  ;;  %v5456_v52 = vrot.slane %v3536_v36, 7  ;;  %v5457_v41 = vrot.slane %v3534_v35, 7 }
  0x75   : > { %1826 = vrot.lane.b32.xlu0 %v1778_v14, %s3383_s14  ;;  %v696_v53 = vand.u32 15, %v648_v11  ;;  %v710_v14 = vand.u32 15, %v650_v55  ;;  %v4238_v58 = vrot.slane %v4112_v21, 7  ;;  %v5460_v61 = vrot.slane %v3540_v38, 7 }
  0x76   : > { %2047 = vrot.lane.b32.xlu1 %v2000_v29, %s3383_s14  ;;  %v1183_v9 = vsel %vm1158_vm1, %v5457_v41, %v5456_v52  ;;  %v5458_v27 = vmov %v5457_v41  ;;  %v5459_v29 = vrot.slane %v3548_v42, 7  ;;  %v724_v46 = vand.u32 15, %v652_v60 }
  0x77   : > { %v1187_v35 = vsel %vm1158_vm1, %v3692_v16, %v5460_v61  ;;  %vm4245_vm3 = vcmp.ge.s32.totalorder %v696_v53, 1  ;;  %vm4249_vm4 = vcmp.ge.s32.totalorder %v682_v32, 1  ;;  %v5465_v3 = vrot.slane %v4066_v33, 7 }
  0x78   : > { %v1184_v44 = vsel %vm1158_vm1, %v5459_v29, %v5458_v27  ;;  %v654_v56 = vadd.s32 64, %v3491_v1  ;;  %vm4260_vm5 = vcmp.ge.s32.totalorder %v710_v14, 1  ;;  %vm4264_vm6 = vcmp.ge.s32.totalorder %v724_v46, 1  ;;  %v5475_v27 = vld [vmem:[#allocation12_spill] sm:$0xff] }
  0x79   : > { %2049 = vrot.lane.b32.xlu0 %v2001_v15, %s3383_s14  ;;  %v1188_v21 = vsel %vm1158_vm1, %v5465_v3, %v3692_v16  ;;  %v1904_v24 = vsel %vm4245_vm3, %v1184_v44, 0.0  ;;  %v1261_v62 = vsel %vm4264_vm6, %v1184_v44, 0.0  ;;  %v1678_v18 = vsel %vm1158_vm1, %v4238_v58, %v3692_v16 }
  0x7a   : > { %1782 = vrot.lane.b32.xlu1 %v1727_v50, %s3382_s12  ;;  %v1257_v23 = vsel %vm4245_vm3, %v1188_v21, 0.0  ;;  %v1683_v50 = vsel %vm4260_vm5, %v1184_v44, 0.0  ;;  %v4276_v37 = vpack.c.bf16 %v1183_v9, %v1904_v24  ;;  %v4281_v28 = vpack.c.bf16 %v1183_v9, %v1261_v62 }
  0x7b   : > { %v4278_v5 = vpack.c.bf16 %v1187_v35, %v1257_v23  ;;  %v4283_v20 = vpack.c.bf16 %v1183_v9, %v1683_v50  ;;  %v738_v11 = vand.u32 15, %v654_v56  ;;  %v1679_v55 = vsel %vm4249_vm4, %v1678_v18, 0.0 }
  0x7c   : > { %v5470_v60 = vrot.slane %v3544_v40, 7  ;;  %v5471_v53 = vrot.slane %v3542_v39, 7  ;;  %v5473_v41 = vrot.slane %v3536_v36, 7  ;;  %v5474_v16 = vmov %v5459_v29 }
  0x7d   : > { %1828 = vrot.lane.b32.xlu0 %v1779_v26, %s3383_s14  ;;  %v1185_v29 = vsel %vm1158_vm1, %v5475_v27, %v5474_v16  ;;  %v5476_v44 = vpack.c.bf16 %v4066_v33, %v4064_v47  ;;  %v4312_v32 = vpack.c.bf16 %v1187_v35, %v1679_v55  ;;  %vm4314_vm7 = vcmp.ge.s32.totalorder %v738_v11, 1 }
  0x7e   : > { %v1181_v26 = vsel %vm1158_vm1, %v5471_v53, %v5470_v60  ;;  %v5472_v52 = vmov %v5471_v53  ;;  %v5479_v35 = vrot.slane %v3540_v38, 7  ;;  %v5480_v23 = vrot.slane %v4106_v22, 7  ;;  %v5483_v60 = vld [vmem:[#allocation6_spill] sm:$0xff] }
  0x7f   : > { %v1182_v9 = vsel %vm1158_vm1, %v5473_v41, %v5472_v52  ;;  %1512 = vrot.lane.b32.xlu1 %v5476_v44, %s3382_s12  ;;  %v656_v18 = vadd.s32 80, %v3491_v1  ;;  %v5481_v30 = vpack.c.bf16 %v4106_v22, %v4100_v17  ;;  %v4357_v11 = vpack.c.bf16 %v1457_v0, %v5482_v19 }
  0x80   : > { %v1685_v36 = vsel %vm4264_vm6, %v1182_v9, 0.0  ;;  %v1906_v42 = vsel %vm4260_vm5, %v1182_v9, 0.0  ;;  %v1263_v14 = vsel %vm4314_vm7, %v1182_v9, 0.0  ;;  %v1186_v3 = vsel %vm1158_vm1, %v5479_v35, %v5475_v27 }
  0x81   : > { %v4324_v46 = vpack.c.bf16 %v1181_v26, %v1685_v36  ;;  %v4326_v61 = vpack.c.bf16 %v1181_v26, %v1906_v42  ;;  %1830 = vrot.lane.b32.xlu0 %v1780_v7, %s3383_s14  ;;  %v4334_v21 = vpack.c.bf16 %v1181_v26, %v1263_v14  ;;  %v1259_v56 = vsel %vm4260_vm5, %v1186_v3, 0.0  ;;  %v5485_v26 = vld [vmem:[#allocation5_spill] sm:$0xff] }
  0x82   : > { %v1681_v24 = vsel %vm4245_vm3, %v1186_v3, 0.0  ;;  %v1901_v62 = vsel %vm1158_vm1, %v5480_v23, %v5475_v27  ;;  %v4345_v38 = vpack.c.bf16 %v1185_v29, %v1259_v56  ;;  %v5484_v53 = vrot.slane %v5483_v60, 7  ;;  %v5491_v3 = vld [vmem:[#allocation8_spill] sm:$0xff] }
  0x83   : > { %v4347_v50 = vpack.c.bf16 %v1185_v29, %v1681_v24  ;;  %v1902_v7 = vsel %vm4249_vm4, %v1901_v62, 0.0  ;;  %2005 = vrot.lane.b32.xlu1 %v5481_v30, %s3382_s12  ;;  %v5486_v52 = vrot.slane %v5485_v26, 7  ;;  %v5488_v16 = vrot.slane %v3544_v40, 7  ;;  %v5489_v40 = vld [vmem:[#allocation9_spill] sm:$0xff]  ;;  %v5497_v26 = vld [vmem:[#allocation11_spill] sm:$0xff]  ;;  %s3042_s12 = sshll.u32 %s416_s25, 1 }
  0x84   : > { %v4359_v55 = vpack.c.bf16 %v1185_v29, %v1902_v7  ;;  %v752_v44 = vand.u32 15, %v656_v18  ;;  %v658_v36 = vadd.s32 96, %v3491_v1  ;;  %v5490_v35 = vrot.slane %v5489_v40, 7 }
  0x85   : > { %v1179_v41 = vsel %vm1158_vm1, %v5486_v52, %v5484_v53  ;;  %v5487_v9 = vmov %v5486_v52  ;;  %2051 = vrot.lane.b32.xlu0 %v4169_v13, %s3383_s14  ;;  %v5492_v56 = vrot.slane %v5491_v3, 7  ;;  %v5494_v15 = vmov %v5484_v53 }
  0x86   : > { %v1180_v27 = vsel %vm1158_vm1, %v5488_v16, %v5487_v9  ;;  %vm4396_vm8 = vcmp.ge.s32.totalorder %v752_v44, 1  ;;  %v766_v7 = vand.u32 15, %v658_v36  ;;  %v660_v30 = vadd.s32 112, %v3491_v1  ;;  %v5499_v9 = vld [vmem:[#allocation10_spill] sm:$0xff] }
  0x87   : > { %v1687_v0 = vsel %vm4314_vm7, %v1180_v27, 0.0  ;;  %v1908_v29 = vsel %vm4264_vm6, %v1180_v27, 0.0  ;;  %v1177_v24 = vsel %vm1158_vm1, %v5492_v56, %v5490_v35  ;;  %v5493_v23 = vmov %v5492_v56  ;;  %1560 = vrot.lane.b32.xlu1 %v4163_v8, %s3383_s14  ;;  %v5504_v56 = vld [vmem:[#allocation14_spill] sm:$0xff] }
  0x88   : > { %v4380_v42 = vpack.c.bf16 %v1179_v41, %v1687_v0  ;;  %v4382_v14 = vpack.c.bf16 %v1179_v41, %v1908_v29  ;;  %v1178_v62 = vsel %vm1158_vm1, %v5494_v15, %v5493_v23  ;;  %v1265_v19 = vsel %vm4396_vm8, %v1180_v27, 0.0  ;;  %v5506_v15 = vld [vmem:[#allocation13_spill] sm:$0xff] }
  0x89   : > { %v1910_v18 = vsel %vm4314_vm7, %v1178_v62, 0.0  ;;  %v1689_v60 = vsel %vm4396_vm8, %v1178_v62, 0.0  ;;  %v5498_v52 = vrot.slane %v5497_v26, 7  ;;  %v5500_v16 = vrot.slane %v5499_v9, 7  ;;  %2053 = vrot.lane.b32.xlu0 %v4207_v45, %s3383_s14 }
  0x8a   : > { %v4409_v53 = vpack.c.bf16 %v1177_v24, %v1910_v18  ;;  %v4417_v44 = vpack.c.bf16 %v1179_v41, %v1265_v19  ;;  %vm4419_vm3 = vcmp.ge.s32.totalorder %v766_v7, 1  ;;  %v4423_v8 = vpack.c.bf16 %v1177_v24, %v1689_v60 }
  0x8b   : > { %v1175_v39 = vsel %vm1158_vm1, %v5500_v16, %v5498_v52  ;;  %v780_v27 = vand.u32 15, %v660_v30  ;;  %v1267_v29 = vsel %vm4419_vm3, %v1178_v62, 0.0  ;;  %v5503_v36 = vmov %v5500_v16  ;;  %1562 = vrot.lane.b32.xlu1 %v4187_v12, %s3383_s14  ;;  %v5512_v12 = vld [vmem:[#allocation16_spill] sm:$0xff] }
  0x8c   : > { %v1176_v41 = vsel %vm1158_vm1, %v5490_v35, %v5503_v36  ;;  %v662_v3 = vadd.s32 128, %v3491_v1  ;;  %v5505_v23 = vrot.slane %v5504_v56, 7  ;;  %v5507_v7 = vrot.slane %v5506_v15, 7  ;;  %v5514_v35 = vld [vmem:[#allocation15_spill] sm:$0xff] }
  0x8d   : > { %v4442_v45 = vpack.c.bf16 %v1177_v24, %v1267_v29  ;;  %vm4444_vm5 = vcmp.ge.s32.totalorder %v780_v27, 1  ;;  %v1691_v40 = vsel %vm4419_vm3, %v1176_v41, 0.0  ;;  %v1912_v30 = vsel %vm4396_vm8, %v1176_v41, 0.0  ;;  %1564 = vrot.lane.b32.xlu0 %v4199_v63, %s3383_s14 }
  0x8e   : > { %v1173_v18 = vsel %vm1158_vm1, %v5507_v7, %v5505_v23  ;;  %v1269_v19 = vsel %vm4444_vm5, %v1176_v41, 0.0  ;;  %v4456_v60 = vpack.c.bf16 %v1175_v39, %v1691_v40  ;;  %v4458_v24 = vpack.c.bf16 %v1175_v39, %v1912_v30 }
  0x8f   : > { %v794_v52 = vand.u32 15, %v662_v3  ;;  %v4460_v9 = vpack.c.bf16 %v1175_v39, %v1269_v19  ;;  %v5510_v16 = vmov %v5507_v7  ;;  %v5511_v27 = vrot.slane %v5497_v26, 7  ;;  %1566 = vrot.lane.b32.xlu1 %v4196_v10, %s3383_s14 }
  0x90   : > { %v664_v29 = vadd.s32 144, %v3491_v1  ;;  %v5513_v36 = vrot.slane %v5512_v12, 7  ;;  %v5515_v41 = vrot.slane %v5514_v35, 7  ;;  %v5519_v7 = vrot.slane %v5504_v56, 7 }
  0x91   : > { %v1174_v13 = vsel %vm1158_vm1, %v5511_v27, %v5510_v16  ;;  %vm4477_vm6 = vcmp.ge.s32.totalorder %v794_v52, 1  ;;  %v666_v27 = vadd.s32 160, %v3491_v1  ;;  %v5522_v10 = vrot.slane %v3869_v43, 7  ;;  %1568 = vrot.lane.b32.xlu0 %v4357_v11, %s3383_s14 }
  0x92   : > { %v1171_v23 = vsel %vm1158_vm1, %v5515_v41, %v5513_v36  ;;  %v1693_v26 = vsel %vm4444_vm5, %v1174_v13, 0.0  ;;  %v1914_v3 = vsel %vm4419_vm3, %v1174_v13, 0.0  ;;  %v5518_v15 = vmov %v5515_v41 }
  0x93   : > { %v1172_v40 = vsel %vm1158_vm1, %v5519_v7, %v5518_v15  ;;  %v1271_v63 = vsel %vm4477_vm6, %v1174_v13, 0.0  ;;  %v4493_v30 = vpack.c.bf16 %v1173_v18, %v1693_v26  ;;  %v4495_v19 = vpack.c.bf16 %v1173_v18, %v1914_v3  ;;  %1570 = vrot.lane.b32.xlu1 %v4192_v57, %s3383_s14 }
  0x94   : > { %v808_v52 = vand.u32 15, %v664_v29  ;;  %v4499_v0 = vpack.c.bf16 %v1173_v18, %v1271_v63  ;;  %v1695_v16 = vsel %vm4477_vm6, %v1172_v40, 0.0  ;;  %v1916_v56 = vsel %vm4444_vm5, %v1172_v40, 0.0  ;;  %v5523_v18 = vld [vmem:[#allocation18_spill] sm:$0xff] }
  0x95   : > { %v4510_v36 = vpack.c.bf16 %v1171_v23, %v1695_v16  ;;  %v4512_v29 = vpack.c.bf16 %v1171_v23, %v1916_v56  ;;  %v5524_v35 = vrot.slane %v5523_v18, 7  ;;  %v1150_v62 = vrot.slane %v3917_v4, 7  ;;  %1572 = vrot.lane.b32.xlu0 %v4213_v49, %s3383_s14 }
  0x96   : > { %vm4506_vm7 = vcmp.ge.s32.totalorder %v808_v52, 1  ;;  %v822_v3 = vand.u32 15, %v666_v27  ;;  %v5526_v7 = vrot.slane %v5512_v12, 7  ;;  %v1151_v52 = vrot.slane %v3942_v54, 7  ;;  %v5530_v27 = vld [vmem:[#allocation20_spill] sm:$0xff] }
  0x97   : > { %v1169_v41 = vsel %vm1158_vm1, %v5524_v35, %v5522_v10  ;;  %v1273_v26 = vsel %vm4506_vm7, %v1172_v40, 0.0  ;;  %v5525_v15 = vmov %v5524_v35  ;;  %v668_v54 = vadd.s32 176, %v3491_v1  ;;  %1574 = vrot.lane.b32.xlu1 %v4210_v34, %s3383_s14  ;;  %v1515_v13 = vpop.permute.xlu0 %1514 }
  0x98   : > { %v1170_v63 = vsel %vm1158_vm1, %v5526_v7, %v5525_v15  ;;  %v4532_v16 = vpack.c.bf16 %v1171_v23, %v1273_v26  ;;  %vm4540_vm8 = vcmp.ge.s32.totalorder %v822_v3, 1  ;;  %vm1592_vm3 = vcmask 64512  }
  0x99   : > { %v1697_v4 = vsel %vm4506_vm7, %v1170_v63, 0.0  ;;  %v1918_v11 = vsel %vm4477_vm6, %v1170_v63, 0.0  ;;  %v1275_v23 = vsel %vm4540_vm8, %v1170_v63, 0.0  ;;  %v5529_v39 = vrot.slane %v3884_v31, 7 }
  0x9a   : > { %v4544_v12 = vpack.c.bf16 %v1169_v41, %v1697_v4  ;;  %v4546_v56 = vpack.c.bf16 %v1169_v41, %v1918_v11  ;;  %v5531_v10 = vrot.slane %v5530_v27, 7  ;;  %v5533_v35 = vrot.slane %v3869_v43, 7  ;;  %v4571_v4 = vpop.permute.xlu1 %1518 }
  0x9b   : > { %v4565_v3 = vpack.c.bf16 %v1169_v41, %v1275_v23  ;;  %v836_v15 = vand.u32 15, %v668_v54  ;;  %v1152_v27 = vrot.slane %v3937_v6, 7  ;;  %v4584_v49 = vsel %vm1592_vm3, %v4281_v28, %v4571_v4  ;;  %v5538_v54 = vld [vmem:[#allocation30_spill] sm:$0xff] }
  0x9c   : > { %v1167_v57 = vsel %vm1158_vm1, %v5531_v10, %v5529_v39  ;;  %v5532_v18 = vmov %v5531_v10  ;;  %v670_v39 = vadd.s32 192, %v3491_v1  ;;  %5535 = vst [vmem:[#allocation7_spill] sm:$0xff] %v4584_v49  ;;  %v1153_v23 = vrot.slane %v5538_v54, 7  ;;  %v5542_v54 = vld [vmem:[#allocation35_spill] sm:$0xff] }
  0x9d   : > { %v1168_v26 = vsel %vm1158_vm1, %v5533_v35, %v5532_v18  ;;  %vm4586_vm5 = vcmp.ge.s32.totalorder %v836_v15, 1  ;;  %v4593_v10 = vsel %vm1592_vm3, %v4278_v5, %v1515_v13  ;;  %v5540_v18 = vld [vmem:[#allocation31_spill] sm:$0xff]  ;;  %v1165_v28 = vsel %vm1158_vm1, %v1150_v62, %v1151_v52 }
  0x9e   : > { %v1699_v7 = vsel %vm4540_vm8, %v1168_v26, 0.0  ;;  %v1920_v63 = vsel %vm4506_vm7, %v1168_v26, 0.0  ;;  %5539 = vst [vmem:[#allocation6_spill] sm:$0xff] %v4593_v10  ;;  %v1277_v6 = vsel %vm4586_vm5, %v1168_v26, 0.0  ;;  %v850_v34 = vand.u32 15, %v670_v39  ;;  %v4607_v5 = vpop.permute.xlu1 %1520 }
  0x9f   : > { %v4573_v11 = vpack.c.bf16 %v1167_v57, %v1699_v7  ;;  %v4575_v43 = vpack.c.bf16 %v1167_v57, %v1920_v63  ;;  %v1154_v35 = vrot.slane %v5540_v18, 7  ;;  %v4598_v7 = vpack.c.bf16 %v1167_v57, %v1277_v6 }
  0xa0   : > { %v5541_v15 = vrot.slane %v3884_v31, 7  ;;  %v1155_v49 = vrot.slane %v5542_v54, 7  ;;  %vm4609_vm6 = vcmp.ge.s32.totalorder %v850_v34, 1  ;;  %v4620_v31 = vsel %vm1592_vm3, %v4334_v21, %v4607_v5  ;;  %v5550_v54 = vld [vmem:[#allocation37_spill] sm:$0xff] }
  0xa1   : > { %5534 = vst [vmem:[#allocation12_spill] sm:$0xff] %v4573_v11  ;;  %5545 = vst [vmem:[#allocation5_spill] sm:$0xff] %v4620_v31  ;;  %vm1641_vm7 = vcmask 130048   ;;  %v672_v21 = vadd.s32 208, %v3491_v1  ;;  %v1156_v31 = vrot.slane %v5550_v54, 7  ;;  %v1162_v41 = vsel %vm1158_vm1, %v1153_v23, %v1154_v35 }
  0xa2   : > { %v1166_v63 = vsel %vm1158_vm1, %v5541_v15, %v1150_v62  ;;  %v4622_v62 = vpop.permute.xlu0 %1516  ;;  %v1163_v15 = vsel %vm1158_vm1, %v1152_v27, %v1153_v23 }
  0xa3   : > { %v1701_v57 = vsel %vm4586_vm5, %v1166_v63, 0.0  ;;  %v1922_v26 = vsel %vm4540_vm8, %v1166_v63, 0.0  ;;  %v1279_v39 = vsel %vm4609_vm6, %v1166_v63, 0.0  ;;  %v4629_v6 = vsel %vm1592_vm3, %v4345_v38, %v4622_v62 }
  0xa4   : > { %5546 = vst [vmem:[#allocation9_spill] sm:$0xff] %v4629_v6  ;;  %v4631_v34 = vpack.c.bf16 %v1165_v28, %v1279_v39  ;;  %v4633_v40 = vpack.c.bf16 %v1165_v28, %v1701_v57  ;;  %v4635_v18 = vpack.c.bf16 %v1165_v28, %v1922_v26  ;;  %v1164_v63 = vsel %vm1158_vm1, %v1151_v52, %v1152_v27 }
  0xa5   : > { %v674_v38 = vadd.s32 224, %v3491_v1  ;;  %v1161_v39 = vsel %vm1158_vm1, %v1154_v35, %v1155_v49  ;;  %v1835_v28 = vsel %vm1592_vm3, %v4347_v50, %v4622_v62  ;;  %v864_v26 = vand.u32 15, %v672_v21 }
  0xa6   : > { %5547 = vst [vmem:[#allocation8_spill] sm:$0xff] %v4631_v34  ;;  %5548 = vst [vmem:[#allocation11_spill] sm:$0xff] %v4633_v40  ;;  %v1803_v57 = vpop.permute.xlu0 %1802  ;;  %v1703_v6 = vsel %vm4609_vm6, %v1164_v63, 0.0  ;;  %v1924_v54 = vsel %vm4586_vm5, %v1164_v63, 0.0  ;;  %v5551_v40 = vld [vmem:[#allocation40_spill] sm:$0xff]  ;;  %v4659_v34 = vpop.permute.xlu1 %1522  ;;  %v2058_v21 = vsel %vm1592_vm3, %v4276_v37, %v4571_v4  ;;  %v1926_v37 = vsel %vm4609_vm6, %v1162_v41, 0.0 }
  0xa7   : > { %5549 = vst [vmem:[#allocation10_spill] sm:$0xff] %v4635_v18  ;;  %v1868_v25 = vsel %vm1641_vm7, %v1835_v28, %v1803_v57  ;;  %v4654_v52 = vpack.c.bf16 %v1163_v15, %v1703_v6  ;;  %v4656_v27 = vpack.c.bf16 %v1163_v15, %v1924_v54  ;;  %v878_v18 = vand.u32 15, %v674_v38 }
  0xa8   : > { %v1157_v11 = vrot.slane %v5551_v40, 7  ;;  %2138 = vrot.lane.b32.xlu1 %v1868_v25, %s3384_s26  ;;  %vm4662_vm8 = vcmp.ge.s32.totalorder %v864_v26, 1  ;;  %v676_v6 = vadd.s32 240, %v3491_v1  ;;  %v4675_v40 = vsel %vm1592_vm3, %v4417_v44, %v4659_v34 }
  0xa9   : > { %v1281_v25 = vsel %vm4662_vm8, %v1164_v63, 0.0  ;;  %vm4681_vm5 = vcmp.ge.s32.totalorder %v878_v18, 1  ;;  %v1705_v23 = vsel %vm4662_vm8, %v1162_v41, 0.0  ;;  %v4694_v63 = vpack.c.bf16 %v1161_v39, %v1926_v37 }
  0xaa   : > { %v2026_v38 = vpop.permute.xlu0 %2025  ;;  %v4679_v28 = vpack.c.bf16 %v1163_v15, %v1281_v25  ;;  %v1283_v44 = vsel %vm4681_vm5, %v1162_v41, 0.0  ;;  %v4692_v26 = vpack.c.bf16 %v1161_v39, %v1705_v23  ;;  %v1833_v18 = vsel %vm1592_vm3, %v4312_v32, %v1515_v13  ;;  %v1801_v15 = vpop.permute.xlu1 %1800 }
  0xab   : > { %v2091_v35 = vsel %vm1641_vm7, %v2058_v21, %v2026_v38  ;;  %v4699_v54 = vpack.c.bf16 %v1161_v39, %v1283_v44  ;;  %v892_v10 = vand.u32 15, %v676_v6  ;;  %v1159_v21 = vsel %vm1158_vm1, %v1156_v31, %v1157_v11 }
  0xac   : > { %2186 = vrot.lane.b32.xlu1 %v2091_v35, %s3385_s11  ;;  %v1126_v25 = vrot.slane %v4064_v47, 7  ;;  %v1866_v41 = vsel %vm1641_vm7, %v1833_v18, %v1801_v15  ;;  %v1160_v38 = vsel %vm1158_vm1, %v1155_v49, %v1156_v31  ;;  %v1674_v23 = vrot.slane %v4110_v59, 7 }
  0xad   : > { %v1897_v32 = vrot.slane %v4100_v17, 7  ;;  %2136 = vrot.lane.b32.xlu0 %v1866_v41, %s3384_s26  ;;  %vm4710_vm6 = vcmp.ge.s32.totalorder %v892_v10, 1  ;;  %v1707_v6 = vsel %vm4681_vm5, %v1160_v38, 0.0  ;;  %v1928_v37 = vsel %vm4662_vm8, %v1160_v38, 0.0 }
  0xae   : > { %v1805_v13 = vpop.permute.xlu0 %1804  ;;  %v1837_v49 = vsel %vm1592_vm3, %v4283_v20, %v4571_v4  ;;  %v1285_v17 = vsel %vm4710_vm6, %v1160_v38, 0.0  ;;  %v4723_v59 = vpack.c.bf16 %v1159_v21, %v1707_v6  ;;  %v4725_v31 = vpack.c.bf16 %v1159_v21, %v1928_v37  ;;  %v2024_v44 = vpop.permute.xlu1 %2023 }
  0xaf   : > { %v2056_v35 = vsel %vm1592_vm3, %v4359_v55, %v4622_v62  ;;  %v4730_v18 = vpack.c.bf16 %v1159_v21, %v1285_v17  ;;  %v1676_v50 = vsel %vm1158_vm1, %v1674_v23, %v4238_v58  ;;  %v1677_v20 = vsel %vm1158_vm1, %v1157_v11, %v1674_v23  ;;  %v3299_v62 = vld [vmem:[%s5323_s5 + $0x20] ss:$0 sps:$4 sm:$0xff]  }
  0xb0   : > { %v1839_v4 = vsel %vm1592_vm3, %v4324_v46, %v4607_v5  ;;  %v2089_v15 = vsel %vm1641_vm7, %v2056_v35, %v2024_v44  ;;  %v1709_v10 = vsel %vm4710_vm6, %v1677_v20, 0.0  ;;  %v1930_v55 = vsel %vm4681_vm5, %v1677_v20, 0.0  ;;  %v5560_v35 = vld [vmem:[#allocation43_spill] sm:$0xff] }
  0xb1   : > { %2184 = vrot.lane.b32.xlu0 %v2089_v15, %s3385_s11  ;;  %v4749_v41 = vpack.c.bf16 %v1676_v50, %v1709_v10  ;;  %v4751_v38 = vpack.c.bf16 %v1676_v50, %v1930_v55  ;;  %v5558_v46 = vrot.slane %v4066_v33, 7  ;;  %v1190_v57 = vsel %vm1158_vm1, %v1157_v11, %v1126_v25  ;;  %v3300_v11 = vld [vmem:[%s5323_s5 + $0x18] sm:$0xff]  }
  0xb2   : > { %v1807_v21 = vpop.permute.xlu0 %1806  ;;  %v1255_v37 = vsel %vm4249_vm4, %v1190_v57, 0.0  ;;  %v5559_v17 = vrot.slane %v4064_v47, 1  ;;  %v5561_v50 = vrot.slane %v4106_v22, 7  ;;  %v1900_v20 = vsel %vm1158_vm1, %v4238_v58, %v1897_v32 }
  0xb3   : > { %v1189_v23 = vsel %vm1158_vm1, %v1126_v25, %v5558_v46  ;;  %v1872_v6 = vsel %vm1641_vm7, %v1839_v4, %v1807_v21  ;;  %v2028_v25 = vpop.permute.xlu1 %2027  ;;  %v1870_v22 = vsel %vm1641_vm7, %v1837_v49, %v1805_v13  ;;  %v1932_v15 = vsel %vm4710_vm6, %v1900_v20, 0.0  ;;  %v5562_v20 = vld [vmem:[#allocation17_spill] sm:$0xff] }
  0xb4   : > { %v1383_v44 = vsel %vm1351_vm0, %v5560_v35, %v5559_v17  ;;  %v1899_v33 = vsel %vm1158_vm1, %v1897_v32, %v5561_v50  ;;  %2142 = vrot.lane.b32.xlu1 %v1872_v6, %s3384_s26  ;;  %v4775_v48 = vpack.c.bf16 %v1189_v23, %v1255_v37  ;;  %vm2351_vm0 = vcmask 1043456  }
  0xb5   : > { %v1479_v47 = vsel %vm4152_vm2, %v1383_v44, 0.0  ;;  %3238 = vmatprep.subr.msk.bf16.mxu0 %vm2351_vm0, %v3299_v62  ;;  %v2353_v10 = vsel %vm2351_vm0, %v3299_v62, 0  ;;  %3239 = vmatprep.subr.msk.bf16.mxu1 %vm2351_vm0, %v3299_v62  ;;  %v2062_v51 = vsel %vm1592_vm3, %v4382_v14, %v4659_v34  ;;  %v4792_v58 = vpack.c.bf16 %v1899_v33, %v1932_v15 }
  0xb6   : > { %v4784_v4 = vpack.c.bf16 %v1479_v47, %v4096_v2  ;;  %2140 = vrot.lane.b32.xlu0 %v1870_v22, %s3384_s26  ;;  %v2030_v1 = vpop.permute.xlu0 %2029  ;;  %3187 = vmatpush3.bf16.msra.mxu0 %v2353_v10  ;;  %v3301_v2 = vld [vmem:[%s5323_s5 + $0x10] sm:$0xff]   ;;  %v2060_v13 = vsel %vm1592_vm3, %v4326_v61, %v4607_v5  ;;  %v1841_v55 = vsel %vm1592_vm3, %v4380_v42, %v4659_v34  ;;  %v3302_v5 = vld [vmem:[%s5323_s5 + $0x8] sm:$0xff]   ;;  %v1465_v15 = vsel %vm3871_vm9, %v5562_v20, 0.0 }
  0xb7   : > { %v2095_v32 = vsel %vm1641_vm7, %v2062_v51, %v2030_v1  ;;  %3188 = vmatprep.subr.bf16.mxu0 %v3300_v11  ;;  %3233 = vmatpush3.bf16.msra.mxu1 %v2353_v10  ;;  %v1525_v39 = vpop.permute.xlu1 %1524  ;;  %v2093_v49 = vsel %vm1641_vm7, %v2060_v13, %v2028_v25  ;;  %v5577_v1 = vld [vmem:[#allocation10_spill] sm:$0xff]  ;;  %vm2216_vm9 = vcmask 195584  }
  0xb8   : > { %2190 = vrot.lane.b32.xlu1 %v2095_v32, %s3385_s11  ;;  %3229 = vmatprep.subr.bf16.mxu1 %v3300_v11  ;;  %v4804_v14 = vsel %vm1592_vm3, %v4442_v45, %v1525_v39  ;;  %v1843_v45 = vsel %vm1592_vm3, %v4423_v8, %v1525_v39  ;;  %v2064_v34 = vsel %vm1592_vm3, %v4409_v53, %v1525_v39  ;;  %v3303_v8 = vld [vmem:[%s5323_s5] sm:$0xff]  }
  0xba   : > { %2188 = vrot.lane.b32.xlu0 %v2093_v49, %s3385_s11  ;;  %v1809_v62 = vpop.permute.xlu0 %1808  ;;  %3189 = vmatpush3.bf16.msra.mxu0 %v3300_v11 }
  0xbb   : > { %v1874_v61 = vsel %vm1641_vm7, %v1841_v55, %v1809_v62  ;;  %3190 = vmatprep.subr.bf16.mxu0 %v3301_v2  ;;  %3234 = vmatpush3.bf16.msra.mxu1 %v3300_v11  ;;  %v1527_v21 = vpop.permute.xlu1 %1526 }
  0xbc   : > { %3230 = vmatprep.subr.bf16.mxu1 %v3301_v2  ;;  %v4819_v42 = vsel %vm1592_vm3, %v4460_v9, %v1527_v21  ;;  %v2066_v57 = vsel %vm1592_vm3, %v4458_v24, %v1527_v21  ;;  %v1845_v35 = vsel %vm1592_vm3, %v4456_v60, %v1527_v21 }
  0xbe   : > { %2144 = vrot.lane.b32.xlu0 %v1874_v61, %s3384_s26  ;;  %v1811_v46 = vpop.permute.xlu0 %1810  ;;  %3191 = vmatpush3.bf16.msra.mxu0 %v3301_v2 }
  0xbf   : > { %v1876_v23 = vsel %vm1641_vm7, %v1843_v45, %v1811_v46  ;;  %3192 = vmatprep.subr.bf16.mxu0 %v3302_v5  ;;  %3235 = vmatpush3.bf16.msra.mxu1 %v3301_v2  ;;  %v2032_v9 = vpop.permute.xlu1 %2031  ;;  %v5566_v2 = vld [vmem:[#allocation19_spill] sm:$0xff] }
  0xc0   : > { %2146 = vrot.lane.b32.xlu1 %v1876_v23, %s3384_s26  ;;  %3231 = vmatprep.subr.bf16.mxu1 %v3302_v5  ;;  %v2097_v53 = vsel %vm1641_vm7, %v2064_v34, %v2032_v9  ;;  %v1488_v13 = vpack.c.bf16 %v1465_v15, %v5566_v2 }
  0xc2   : > { %2192 = vrot.lane.b32.xlu0 %v2097_v53, %s3385_s11  ;;  %v2034_v6 = vpop.permute.xlu0 %2033  ;;  %3193 = vmatpush3.bf16.msra.mxu0 %v3302_v5 }
  0xc3   : > { %v2099_v37 = vsel %vm1641_vm7, %v2066_v57, %v2034_v6  ;;  %3194 = vmatprep.subr.bf16.mxu0 %v3303_v8  ;;  %3236 = vmatpush3.bf16.msra.mxu1 %v3302_v5  ;;  %v1529_v17 = vpop.permute.xlu1 %1528  ;;  %v5570_v6 = vld [vmem:[#allocation27_spill] sm:$0xff] }
  0xc4   : > { %2194 = vrot.lane.b32.xlu1 %v2099_v37, %s3385_s11  ;;  %3232 = vmatprep.subr.bf16.mxu1 %v3303_v8  ;;  %v4837_v24 = vsel %vm1592_vm3, %v4499_v0, %v1529_v17  ;;  %v1847_v33 = vsel %vm1592_vm3, %v4493_v30, %v1529_v17  ;;  %v2068_v0 = vsel %vm1592_vm3, %v4495_v19, %v1529_v17 }
  0xc6   : > { %v1813_v44 = vpop.permute.xlu0 %1812  ;;  %3195 = vmatpush3.bf16.msra.mxu0 %v3303_v8 }
  0xc7   : > { %v1878_v50 = vsel %vm1641_vm7, %v1845_v35, %v1813_v44  ;;  %3237 = vmatpush3.bf16.msra.mxu1 %v3303_v8  ;;  %v1531_v11 = vpop.permute.xlu1 %1530  ;;  %v5568_v8 = vld [vmem:[#allocation24_spill] sm:$0xff]  ;;  %v5572_v35 = vld [vmem:[#allocation26_spill] sm:$0xff] }
  0xc8   : > { %2148 = vrot.lane.b32.xlu0 %v1878_v50, %s3384_s26  ;;  %v4847_v25 = vsel %vm1592_vm3, %v4532_v16, %v1531_v11  ;;  %v2070_v30 = vsel %vm1592_vm3, %v4512_v29, %v1531_v11  ;;  %v5564_v16 = vld [vmem:[#allocation21_spill] sm:$0xff]  ;;  %v5567_v29 = vld [vmem:[#allocation23_spill] sm:$0xff]  ;;  %v1849_v61 = vsel %vm1592_vm3, %v4510_v36, %v1531_v11  ;;  %v1469_v9 = vsel %vm3952_vm11, %v5568_v8, 0.0 }
  0xc9   : > { %v1467_v32 = vsel %vm3911_vm10, %v5564_v16, 0.0  ;;  %v1490_v44 = vpack.c.bf16 %v1469_v9, %v5572_v35  ;;  %vm2249_vm10 = vcmask 392192   ;;  %vm2318_vm11 = vcmask 588800  }
  0xca   : > { %v1815_v47 = vpop.permute.xlu0 %1814  ;;  %v1489_v55 = vpack.c.bf16 %v1467_v32, %v5567_v29 }
  0xcb   : > { %v1880_v60 = vsel %vm1641_vm7, %v1847_v33, %v1815_v47  ;;  %v2036_v10 = vpop.permute.xlu1 %2035 }
  0xcc   : > { %2150 = vrot.lane.b32.xlu1 %v1880_v60, %s3384_s26  ;;  %v2101_v51 = vsel %vm1641_vm7, %v2068_v0, %v2036_v10  ;;  %v5574_v0 = vld [vmem:[#allocation8_spill] sm:$0xff] }
  0xcd   : > { %2196 = vrot.lane.b32.xlu0 %v2101_v51, %s3385_s11  ;;  %v5575_v60 = vld [vmem:[#allocation12_spill] sm:$0xff] }
  0xce   : > { %v2038_v19 = vpop.permute.xlu0 %2037 }
  0xcf   : > { %v2103_v39 = vsel %vm1641_vm7, %v2070_v30, %v2038_v19  ;;  %v1533_v49 = vpop.permute.xlu1 %1532  ;;  %v5576_v30 = vld [vmem:[#allocation11_spill] sm:$0xff] }
  0xd0   : > { %2198 = vrot.lane.b32.xlu1 %v2103_v39, %s3385_s11  ;;  %v4869_v62 = vsel %vm1592_vm3, %v4565_v3, %v1533_v49  ;;  %v1851_v21 = vsel %vm1592_vm3, %v4544_v12, %v1533_v49  ;;  %v2072_v3 = vsel %vm1592_vm3, %v4546_v56, %v1533_v49  ;;  %v1471_v56 = vsel %vm3985_vm12, %v5570_v6, 0.0 }
  0xd1   : > { %1576 = vrot.lane.b32.xlu0 %v1488_v13, %s3383_s14  ;;  %v5578_v13 = vld [vmem:[#allocation32_spill] sm:$0xff]  ;;  %vm2619_vm12 = vcmask 31744  }
  0xd2   : > { %v1817_v5 = vpop.permute.xlu0 %1816  ;;  %v1473_v49 = vsel %vm4020_vm13, %v5578_v13, 0.0  ;;  %vm2822_vm13 = vcmask 1040384  }
  0xd3   : > { %v1882_v45 = vsel %vm1641_vm7, %v1849_v61, %v1817_v5  ;;  %v1535_v34 = vpop.permute.xlu1 %1534  ;;  %v5580_v61 = vld [vmem:[#allocation36_spill] sm:$0xff] }
  0xd4   : > { %1578 = vrot.lane.b32.xlu1 %v1489_v55, %s3383_s14  ;;  %v4880_v46 = vsel %vm1592_vm3, %v4598_v7, %v1535_v34  ;;  %v2074_v12 = vsel %vm1592_vm3, %v4575_v43, %v1535_v34  ;;  %v5573_v43 = vld [vmem:[#allocation29_spill] sm:$0xff]  ;;  %v1853_v20 = vsel %vm1592_vm3, %v5575_v60, %v1535_v34  ;;  %v5582_v34 = vld [vmem:[#allocation34_spill] sm:$0xff] }
  0xd5   : > { %2152 = vrot.lane.b32.xlu0 %v1882_v45, %s3384_s26  ;;  %v1491_v11 = vpack.c.bf16 %v1471_v56, %v5573_v43  ;;  %v1475_v45 = vsel %vm4050_vm14, %v5580_v61, 0.0  ;;  %vm2824_vm14 = vcmask 25600  }
  0xd6   : > { %v1819_v36 = vpop.permute.xlu0 %1818 }
  0xd7   : > { %v1884_v23 = vsel %vm1641_vm7, %v1851_v21, %v1819_v36  ;;  %v2040_v53 = vpop.permute.xlu1 %2039 }
  0xd8   : > { %2154 = vrot.lane.b32.xlu1 %v1884_v23, %s3384_s26  ;;  %v2105_v7 = vsel %vm1641_vm7, %v2072_v3, %v2040_v53  ;;  %v1492_v3 = vpack.c.bf16 %v1473_v49, %v5582_v34  ;;  %v5587_v34 = vld [vmem:[#allocation6_spill] sm:$0xff] }
  0xd9   : > { %2200 = vrot.lane.b32.xlu0 %v2105_v7, %s3385_s11 }
  0xda   : > { %v2042_v17 = vpop.permute.xlu0 %2041 }
  0xdb   : > { %v2107_v50 = vsel %vm1641_vm7, %v2074_v12, %v2042_v17  ;;  %v1537_v33 = vpop.permute.xlu1 %1536  ;;  %v5584_v17 = vld [vmem:[#allocation44_spill] sm:$0xff] }
  0xdc   : > { %2202 = vrot.lane.b32.xlu1 %v2107_v50, %s3385_s11  ;;  %v4903_v47 = vsel %vm1592_vm3, %v5574_v0, %v1537_v33  ;;  %v1855_v10 = vsel %vm1592_vm3, %v5576_v30, %v1537_v33  ;;  %v2076_v32 = vsel %vm1592_vm3, %v5577_v1, %v1537_v33  ;;  %v5586_v33 = vld [vmem:[#allocation42_spill] sm:$0xff] }
  0xdd   : > { %1580 = vrot.lane.b32.xlu0 %v1490_v44, %s3383_s14  ;;  %v1477_v44 = vsel %vm4126_vm15, %v5584_v17, 0.0 }
  0xde   : > { %v1821_v22 = vpop.permute.xlu0 %1820  ;;  %v1494_v43 = vpack.c.bf16 %v1477_v44, %v5586_v33 }
  0xdf   : > { %v1886_v15 = vsel %vm1641_vm7, %v1853_v20, %v1821_v22  ;;  %v1539_v51 = vpop.permute.xlu1 %1538 }
  0xe0   : > { %1582 = vrot.lane.b32.xlu1 %v1491_v11, %s3383_s14  ;;  %v4914_v16 = vsel %vm1592_vm3, %v4679_v28, %v1539_v51  ;;  %v2078_v29 = vsel %vm1592_vm3, %v4656_v27, %v1539_v51  ;;  %v5583_v27 = vld [vmem:[#allocation39_spill] sm:$0xff]  ;;  %v1857_v9 = vsel %vm1592_vm3, %v4654_v52, %v1539_v51 }
  0xe1   : > { %2156 = vrot.lane.b32.xlu0 %v1886_v15, %s3384_s26  ;;  %v1493_v8 = vpack.c.bf16 %v1475_v45, %v5583_v27 }
  0xe2   : > { %v1823_v19 = vpop.permute.xlu0 %1822 }
  0xe3   : > { %v1888_v2 = vsel %vm1641_vm7, %v1855_v10, %v1823_v19  ;;  %v2044_v55 = vpop.permute.xlu1 %2043 }
  0xe4   : > { %2158 = vrot.lane.b32.xlu1 %v1888_v2, %s3384_s26  ;;  %v2109_v28 = vsel %vm1641_vm7, %v2076_v32, %v2044_v55 }
  0xe5   : > { %2204 = vrot.lane.b32.xlu0 %v2109_v28, %s3385_s11 }
  0xe6   : > { %v2046_v21 = vpop.permute.xlu0 %2045 }
  0xe7   : > { %v2111_v36 = vsel %vm1641_vm7, %v2078_v29, %v2046_v21  ;;  %v1541_v23 = vpop.permute.xlu1 %1540 }
  0xe8   : > { %2206 = vrot.lane.b32.xlu1 %v2111_v36, %s3385_s11  ;;  %v4937_v57 = vsel %vm1592_vm3, %v4699_v54, %v1541_v23  ;;  %v1859_v7 = vsel %vm1592_vm3, %v4692_v26, %v1541_v23  ;;  %v2080_v54 = vsel %vm1592_vm3, %v4694_v63, %v1541_v23 }
  0xe9   : > { %1584 = vrot.lane.b32.xlu0 %v1492_v3, %s3383_s14 }
  0xea   : > { %v1825_v12 = vpop.permute.xlu0 %1824 }
  0xeb   : > { %v1890_v53 = vsel %vm1641_vm7, %v1857_v9, %v1825_v12  ;;  %v1543_v6 = vpop.permute.xlu1 %1542 }
  0xec   : > { %1586 = vrot.lane.b32.xlu1 %v1493_v8, %s3383_s14  ;;  %v4948_v37 = vsel %vm1592_vm3, %v4730_v18, %v1543_v6  ;;  %v2082_v26 = vsel %vm1592_vm3, %v4725_v31, %v1543_v6  ;;  %v1861_v60 = vsel %vm1592_vm3, %v4723_v59, %v1543_v6 }
  0xed   : > { %2160 = vrot.lane.b32.xlu0 %v1890_v53, %s3384_s26  ;;  %v5588_v53 = vld [vmem:[#allocation7_spill] sm:$0xff] }
  0xee   : > { %v1827_v52 = vpop.permute.xlu0 %1826 }
  0xef   : > { %v1892_v56 = vsel %vm1641_vm7, %v1859_v7, %v1827_v52  ;;  %v2048_v50 = vpop.permute.xlu1 %2047 }
  0xf0   : > { %2162 = vrot.lane.b32.xlu1 %v1892_v56, %s3384_s26  ;;  %v2113_v18 = vsel %vm1641_vm7, %v2080_v54, %v2048_v50  ;;  %v5589_v54 = vld [vmem:[#allocation9_spill] sm:$0xff] }
  0xf1   : > { %2208 = vrot.lane.b32.xlu0 %v2113_v18, %s3385_s11 }
  0xf2   : > { %v2050_v63 = vpop.permute.xlu0 %2049 }
  0xf3   : > { %v2115_v11 = vsel %vm1641_vm7, %v2082_v26, %v2050_v63  ;;  %v1783_v0 = vpop.permute.xlu1 %1782  ;;  %v5590_v63 = vld [vmem:[#allocation5_spill] sm:$0xff] }
  0xf4   : > { %2210 = vrot.lane.b32.xlu1 %v2115_v11, %s3385_s11  ;;  %v1864_v22 = vsel %vm1592_vm3, %v4749_v41, %v1783_v0  ;;  %v2084_v59 = vsel %vm1592_vm3, %v4751_v38, %v1783_v0 }
  0xf5   : > { %1588 = vrot.lane.b32.xlu0 %v1494_v43, %s3383_s14 }
  0xf6   : > { %v1829_v31 = vpop.permute.xlu0 %1828 }
  0xf7   : > { %v1894_v20 = vsel %vm1641_vm7, %v1861_v60, %v1829_v31  ;;  %v1513_v15 = vpop.permute.xlu1 %1512 }
  0xf8   : > { %1590 = vrot.lane.b32.xlu1 %v4784_v4, %s3383_s14  ;;  %v1595_v5 = vsel %vm1592_vm3, %v4775_v48, %v1513_v15  ;;  %s3082_s14 = sshll.u32 %s3489_s19, 8 }
  0xf9   : > { %2164 = vrot.lane.b32.xlu0 %v1894_v20, %s3384_s26  ;;  %s5069_s20 = scalar_lea.vmem %s5319_s1, %s3082_s14  ;;  %s5081_s24 = scalar_lea.vmem %s5325_s7, %s3082_s14 }
  0xfa   : > { %v1831_v30 = vpop.permute.xlu0 %1830  ;;  %s418_s14 = scalar_lea.vmem [#allocation2], %s3042_s12 }
  0xfb   : > { %v1896_v10 = vsel %vm1641_vm7, %v1864_v22, %v1831_v30  ;;  %v2006_v51 = vpop.permute.xlu1 %2005 }
  0xfc   : > { %2166 = vrot.lane.b32.xlu1 %v1896_v10, %s3384_s26  ;;  %v2087_v41 = vsel %vm1592_vm3, %v4792_v58, %v2006_v51  ;;  %s2855_s26 = sshll.u32 %s418_s14, 4  ;;  %s2856_s26 = int_to_ptr.vmem [resolvable:$true] %s2855_s26 }
  0xfd   : > { %s3304_s19 = scalar_lea.vmem %s2856_s26, 32  ;;  %p3311_p1 = scmp.lt.s32.totalorder %s2856_s26, %s3309_s23 }
  0xfe   : > { %v2052_v1 = vpop.permute.xlu0 %2051  ;;  %p3305_p12 = scmp.ne.s32.totalorder %s2856_s26, %s3304_s19 }
  0xff   : > { %v2117_v32 = vsel %vm1641_vm7, %v2084_v59, %v2052_v1  ;;  %v1561_v19 = vpop.permute.xlu1 %1560 }
 0x100   : > { %2212 = vrot.lane.b32.xlu0 %v2117_v32, %s3385_s11  ;;  %v1643_v21 = vsel %vm1641_vm7, %v1595_v5, %v1561_v19  ;;  %p3306_p13 = pnand %p3305_p12, %p3472_p4 }
 0x102   : > { %v2054_v4 = vpop.permute.xlu0 %2053  ;;  %p3307_p0 = pneg %p3306_p13 }
 0x103   : > { %v2119_v2 = vsel %vm1641_vm7, %v2087_v41, %v2054_v4  ;;  %v1563_v13 = vpop.permute.xlu1 %1562 }
 0x104   : > { %2214 = vrot.lane.b32.xlu1 %v2119_v2, %s3385_s11  ;;  %v1645_v3 = vsel %vm1641_vm7, %v5587_v34, %v1563_v13 }
 0x106   : > { %v1565_v49 = vpop.permute.xlu0 %1564 }
 0x107   : > { %v1567_v39 = vpop.permute.xlu1 %1566  ;;  %v1647_v52 = vsel %vm1641_vm7, %v5589_v54, %v1565_v49 }
 0x108   : > { %v1649_v7 = vsel %vm1641_vm7, %v5588_v53, %v1567_v39 }
 0x10a   : > { %v1569_v55 = vpop.permute.xlu0 %1568 }
 0x10b   : > { %v1571_v29 = vpop.permute.xlu1 %1570  ;;  %v1651_v33 = vsel %vm1641_vm7, %v5590_v63, %v1569_v55 }
 0x10c   : > { %v1653_v0 = vsel %vm1641_vm7, %v4675_v40, %v1571_v29 }
 0x10e   : > { %v1573_v28 = vpop.permute.xlu0 %1572 }
 0x10f   : > { %v1575_v38 = vpop.permute.xlu1 %1574  ;;  %v1655_v10 = vsel %vm1641_vm7, %v4804_v14, %v1573_v28 }
 0x110   : > { %v1657_v40 = vsel %vm1641_vm7, %v4819_v42, %v1575_v38 }
 0x11a   : > { %v2139_v61 = vpop.permute.xlu1 %2138 }
 0x11b   : > { %v2220_v27 = vsel %vm2216_vm9, %v1645_v3, %v2139_v61 }
 0x11e   : > { %v2187_v45 = vpop.permute.xlu1 %2186 }
 0x11f   : > { %v2137_v58 = vpop.permute.xlu0 %2136  ;;  %v2253_v9 = vsel %vm2249_vm10, %v2220_v27, %v2187_v45 }
 0x120   : > { %v2218_v36 = vsel %vm2216_vm9, %v1643_v21, %v2137_v58 }
 0x123   : > { %v2185_v23 = vpop.permute.xlu0 %2184 }
 0x124   : > { %v2251_v8 = vsel %vm2249_vm10, %v2218_v36, %v2185_v23 }
 0x125   : > { %3196 = vmatprep.mubr.msk.bf16.mxu0 %vm2318_vm11, %v2251_v8 }
 0x126   : > { %v2143_v48 = vpop.permute.xlu1 %2142  ;;  %3197 = vmatmul.mubr.msk.bf16.vlgmr.msra.gmra.mxu0 %vm2318_vm11, %v2253_v9 }
 0x127   : > { %v2224_v56 = vsel %vm2216_vm9, %v1649_v7, %v2143_v48 }
 0x128   : > { %v2141_v12 = vpop.permute.xlu0 %2140 }
 0x129   : > { %v2222_v17 = vsel %vm2216_vm9, %v1647_v52, %v2141_v12 }
 0x12a   : > { %v2191_v6 = vpop.permute.xlu1 %2190 }
 0x12b   : > { %v2257_v35 = vsel %vm2249_vm10, %v2224_v56, %v2191_v6 }
 0x12c   : > { %v2189_v44 = vpop.permute.xlu0 %2188 }
 0x12d   : > { %v2255_v26 = vsel %vm2249_vm10, %v2222_v17, %v2189_v44 }
 0x12e   : > { %3200 = vmatprep.mubr.msk.bf16.mxu0 %vm2318_vm11, %v2255_v26 }
 0x12f   : > { %3201 = vmatmul.mubr.msk.bf16.gmra.mxu0 %vm2318_vm11, %v2257_v35 }
 0x130   : > { %v2145_v50 = vpop.permute.xlu0 %2144 }
 0x131   : > { %v2226_v43 = vsel %vm2216_vm9, %v1651_v33, %v2145_v50 }
 0x132   : > { %v2147_v18 = vpop.permute.xlu1 %2146 }
 0x133   : > { %v2228_v31 = vsel %vm2216_vm9, %v1653_v0, %v2147_v18 }
 0x134   : > { %v2193_v11 = vpop.permute.xlu0 %2192 }
 0x135   : > { %v2259_v60 = vsel %vm2249_vm10, %v2226_v43, %v2193_v11 }
 0x136   : > { %3204 = vmatprep.mubr.msk.bf16.mxu0 %vm2318_vm11, %v2259_v60  ;;  %v2195_v20 = vpop.permute.xlu1 %2194 }
 0x137   : > { %v2261_v22 = vsel %vm2249_vm10, %v2228_v31, %v2195_v20  ;;  %v2516_v31 = vld [vmem:[%s5069_s20] sm:$0xff] }
 0x138   : > { %3205 = vmatmul.mubr.msk.bf16.gmra.mxu0 %vm2318_vm11, %v2261_v22 }
 0x13a   : > { %v2149_v15 = vpop.permute.xlu0 %2148 }
 0x13b   : > { %v2230_v51 = vsel %vm2216_vm9, %v1655_v10, %v2149_v15  ;;  %v2519_v15 = vld [vmem:[%s5069_s20 + $0x18] sm:$0xff] }
 0x13e   : > { %v2151_v30 = vpop.permute.xlu1 %2150 }
 0x13f   : > { %v2197_v59 = vpop.permute.xlu0 %2196  ;;  %v2232_v32 = vsel %vm2216_vm9, %v1657_v40, %v2151_v30 }
 0x140   : > { %v2263_v1 = vsel %vm2249_vm10, %v2230_v51, %v2197_v59 }
 0x141   : > { %3208 = vmatprep.mubr.msk.bf16.mxu0 %vm2318_vm11, %v2263_v1  ;;  %v2517_v1 = vld [vmem:[%s5069_s20 + $0x8] sm:$0xff] }
 0x142   : > { %v2199_v41 = vpop.permute.xlu1 %2198 }
 0x143   : > { %v2265_v19 = vsel %vm2249_vm10, %v2232_v32, %v2199_v41  ;;  %v1577_v4 = vpop.permute.xlu0 %1576  ;;  %v2522_v41 = vld [vmem:[%s5069_s20 + $0x30] sm:$0xff] }
 0x144   : > { %3209 = vmatmul.mubr.msk.bf16.gmra.mxu0 %vm2318_vm11, %v2265_v19  ;;  %v1659_v39 = vsel %vm1641_vm7, %v4837_v24, %v1577_v4 }
 0x146   : > { %v1579_v2 = vpop.permute.xlu1 %1578 }
 0x147   : > { %v2153_v14 = vpop.permute.xlu0 %2152  ;;  %v1661_v29 = vsel %vm1641_vm7, %v4847_v25, %v1579_v2 }
 0x148   : > { %v2234_v42 = vsel %vm2216_vm9, %v1659_v39, %v2153_v14  ;;  %v2520_v14 = vld [vmem:[%s5069_s20 + $0x20] sm:$0xff] }
 0x14a   : > { %v2155_v13 = vpop.permute.xlu1 %2154 }
 0x14b   : > { %v2201_v49 = vpop.permute.xlu0 %2200  ;;  %v2236_v38 = vsel %vm2216_vm9, %v1661_v29, %v2155_v13 }
 0x14c   : > { %v2267_v55 = vsel %vm2249_vm10, %v2234_v42, %v2201_v49 }
 0x14d   : > { %3212 = vmatprep.mubr.msk.bf16.mxu1 %vm2318_vm11, %v2267_v55 }
 0x14e   : > { %v2203_v28 = vpop.permute.xlu1 %2202 }
 0x14f   : > { %v2269_v61 = vsel %vm2249_vm10, %v2236_v38, %v2203_v28  ;;  %v1581_v5 = vpop.permute.xlu0 %1580  ;;  %v2523_v28 = vld [vmem:[%s5069_s20 + $0x38] sm:$0xff] }
 0x150   : > { %3213 = vmatmul.mubr.msk.bf16.vlgmr.msra.gmra.mxu1 %vm2318_vm11, %v2269_v61  ;;  %v1663_v21 = vsel %vm1641_vm7, %v4869_v62, %v1581_v5 }
 0x152   : > { %v1583_v58 = vpop.permute.xlu1 %1582 }
 0x153   : > { %v2157_v24 = vpop.permute.xlu0 %2156  ;;  %v1665_v3 = vsel %vm1641_vm7, %v4880_v46, %v1583_v58 }
 0x154   : > { %v2238_v25 = vsel %vm2216_vm9, %v1663_v21, %v2157_v24 }
 0x156   : > { %v2159_v45 = vpop.permute.xlu1 %2158 }
 0x157   : > { %v2205_v34 = vpop.permute.xlu0 %2204  ;;  %v2240_v23 = vsel %vm2216_vm9, %v1665_v3, %v2159_v45 }
 0x158   : > { %v2271_v36 = vsel %vm2249_vm10, %v2238_v25, %v2205_v34  ;;  %v2521_v34 = vld [vmem:[%s5069_s20 + $0x28] sm:$0xff] }
 0x159   : > { %3216 = vmatprep.mubr.msk.bf16.mxu1 %vm2318_vm11, %v2271_v36 }
 0x15a   : > { %v2207_v27 = vpop.permute.xlu1 %2206 }
 0x15b   : > { %v2273_v8 = vsel %vm2249_vm10, %v2240_v23, %v2207_v27  ;;  %v1585_v9 = vpop.permute.xlu0 %1584 }
 0x15c   : > { %3217 = vmatmul.mubr.msk.bf16.gmra.mxu1 %vm2318_vm11, %v2273_v8  ;;  %v1667_v53 = vsel %vm1641_vm7, %v4903_v47, %v1585_v9 }
 0x15e   : > { %v1587_v48 = vpop.permute.xlu1 %1586 }
 0x15f   : > { %v2161_v62 = vpop.permute.xlu0 %2160  ;;  %v1669_v6 = vsel %vm1641_vm7, %v4914_v16, %v1587_v48 }
 0x160   : > { %v2242_v46 = vsel %vm2216_vm9, %v1667_v53, %v2161_v62 }
 0x162   : > { %v2163_v12 = vpop.permute.xlu1 %2162 }
 0x163   : > { %v2209_v7 = vpop.permute.xlu0 %2208  ;;  %v2244_v52 = vsel %vm2216_vm9, %v1669_v6, %v2163_v12  ;;  %v2526_v6 = vld [vmem:[%s5069_s20 + $0x50] sm:$0xff] }
 0x164   : > { %v2275_v54 = vsel %vm2249_vm10, %v2242_v46, %v2209_v7 }
 0x165   : > { %3220 = vmatprep.mubr.msk.bf16.mxu1 %vm2318_vm11, %v2275_v54 }
 0x166   : > { %v2211_v56 = vpop.permute.xlu1 %2210 }
 0x167   : > { %v2277_v17 = vsel %vm2249_vm10, %v2244_v52, %v2211_v56  ;;  %v1589_v35 = vpop.permute.xlu0 %1588 }
 0x168   : > { %3221 = vmatmul.mubr.msk.bf16.gmra.mxu1 %vm2318_vm11, %v2277_v17  ;;  %v1671_v26 = vsel %vm1641_vm7, %v4937_v57, %v1589_v35  ;;  %v2518_v57 = vld [vmem:[%s5069_s20 + $0x10] sm:$0xff]  ;;  %v2524_v17 = vld [vmem:[%s5069_s20 + $0x40] sm:$0xff] }
 0x16a   : > { %v1591_v47 = vpop.permute.xlu1 %1590 }
 0x16b   : > { %v2165_v44 = vpop.permute.xlu0 %2164  ;;  %v1673_v33 = vsel %vm1641_vm7, %v4948_v37, %v1591_v47  ;;  %v5075_v37 = vld [vmem:[%s5324_s6] ss:$0 sm:$0xff] }
 0x16c   : > { %v2246_v16 = vsel %vm2216_vm9, %v1671_v26, %v2165_v44 }
 0x16e   : > { %v2167_v50 = vpop.permute.xlu1 %2166 }
 0x16f   : > { %v2248_v43 = vsel %vm2216_vm9, %v1673_v33, %v2167_v50 }
 0x172   : > { %v2213_v18 = vpop.permute.xlu0 %2212 }
 0x173   : > { %v2279_v63 = vsel %vm2249_vm10, %v2246_v16, %v2213_v18 }
 0x174   : > { %3224 = vmatprep.mubr.msk.bf16.mxu1 %vm2318_vm11, %v2279_v63  ;;  %v2527_v63 = vld [vmem:[%s5069_s20 + $0x58] sm:$0xff] }
 0x176   : > { %v2215_v11 = vpop.permute.xlu1 %2214 }
 0x177   : > { %v2281_v0 = vsel %vm2249_vm10, %v2248_v43, %v2215_v11 }
 0x178   : > { %3225 = vmatmul.mubr.msk.bf16.gmra.mxu1 %vm2318_vm11, %v2281_v0 }
 0x1e6   : > { %v3198_v60 = vpop.f32.mrf.mxu0 }
 0x1e7   : > { %v2550_v20 = vadd.f32 %v3198_v60, %v2518_v57 }
 0x1e8   : > { %v2389_v22 = vpop.f32.mrf.mxu0 }
 0x1e9   : > { %v2589_v30 = vadd.f32 %v5075_v37, %v2550_v20  ;;  %v2548_v10 = vadd.f32 %v2516_v31, %v2389_v22 }
 0x1ea   : > { %v3199_v51 = vpop.f32.mrf.mxu0 }
 0x1eb   : > { %2622 = vst.msk [vmem:[%s5081_s24 + $0x10] sm:$0xff] %vm2619_vm12, %v2589_v30  ;;  %v2587_v59 = vadd.f32 %v5075_v37, %v2548_v10  ;;  %v2551_v40 = vadd.f32 %v3199_v51, %v2519_v15  ;;  %v2723_v29 = vmul.f32 %v2589_v30, %v2589_v30  ;;  %v2655_v45 = vsel %vm2619_vm12, %v2589_v30, 0.0  ;;  %v2525_v15 = vld [vmem:[%s5069_s20 + $0x48] sm:$0xff] }
 0x1ec   : > { %v2392_v32 = vpop.f32.mrf.mxu0 }
 0x1ed   : > { %2620 = vst.msk [vmem:[%s5081_s24] sm:$0xff] %vm2619_vm12, %v2587_v59  ;;  %v2590_v19 = vadd.f32 %v5075_v37, %v2551_v40  ;;  %v2549_v4 = vadd.f32 %v2517_v1, %v2392_v32  ;;  %v2721_v39 = vmul.f32 %v2587_v59, %v2587_v59  ;;  %v2652_v61 = vsel %vm2619_vm12, %v2587_v59, 0.0 }
 0x1ee   : > { %v2756_v9 = vsel %vm2619_vm12, %v2723_v29, 0.0 }
 0x1ef   : > { %v3202_v2 = vpop.f32.mrf.mxu0  ;;  %2623 = vst.msk [vmem:[%s5081_s24 + $0x18] sm:$0xff] %vm2619_vm12, %v2590_v19  ;;  %v2588_v42 = vadd.f32 %v5075_v37, %v2549_v4  ;;  %v2753_v3 = vsel %vm2619_vm12, %v2721_v39, 0.0  ;;  %v2724_v36 = vmul.f32 %v2590_v19, %v2590_v19  ;;  %v2657_v12 = vsel %vm2619_vm12, %v2590_v19, 0.0 }
 0x1f0   : > { %v2554_v13 = vadd.f32 %v3202_v2, %v2522_v41 }
 0x1f1   : > { %v2405_v49 = vpop.f32.mrf.mxu0  ;;  %2621 = vst.msk [vmem:[%s5081_s24 + $0x8] sm:$0xff] %vm2619_vm12, %v2588_v42  ;;  %v2653_v5 = vsel %vm2619_vm12, %v2588_v42, 0.0  ;;  %v2722_v58 = vmul.f32 %v2588_v42, %v2588_v42  ;;  %v2758_v35 = vsel %vm2619_vm12, %v2724_v36, 0.0 }
 0x1f2   : > { %v2593_v55 = vadd.f32 %v5075_v37, %v2554_v13  ;;  %v2552_v38 = vadd.f32 %v2520_v14, %v2405_v49  ;;  %v2654_v21 = vadd.f32 %v2653_v5, %v2652_v61  ;;  %v2530_v49 = vld [vmem:[%s5069_s20 + $0x70] sm:$0xff]  ;;  %v2528_v5 = vld [vmem:[%s5069_s20 + $0x60] sm:$0xff] }
 0x1f3   : > { %v3203_v24 = vpop.f32.mrf.mxu0  ;;  %v2754_v23 = vsel %vm2619_vm12, %v2722_v58, 0.0 }
 0x1f4   : > { %2626 = vst.msk [vmem:[%s5081_s24 + $0x30] sm:$0xff] %vm2619_vm12, %v2593_v55  ;;  %v2591_v25 = vadd.f32 %v5075_v37, %v2552_v38  ;;  %v2555_v27 = vadd.f32 %v3203_v24, %v2523_v28  ;;  %v2656_v48 = vadd.f32 %v2655_v45, %v2654_v21  ;;  %v2755_v62 = vadd.f32 %v2754_v23, %v2753_v3 }
 0x1f5   : > { %v2408_v8 = vpop.f32.mrf.mxu0  ;;  %v2727_v57 = vmul.f32 %v2593_v55, %v2593_v55  ;;  %v2663_v59 = vsel %vm2619_vm12, %v2593_v55, 0.0 }
 0x1f6   : > { %2624 = vst.msk [vmem:[%s5081_s24 + $0x20] sm:$0xff] %vm2619_vm12, %v2591_v25  ;;  %v2725_v53 = vmul.f32 %v2591_v25, %v2591_v25  ;;  %v2594_v46 = vadd.f32 %v5075_v37, %v2555_v27  ;;  %v2553_v7 = vadd.f32 %v2521_v34, %v2408_v8  ;;  %v2757_v54 = vadd.f32 %v2756_v9, %v2755_v62  ;;  %v2531_v34 = vld [vmem:[%s5069_s20 + $0x78] sm:$0xff] }
 0x1f7   : > { %v2658_v52 = vadd.f32 %v2657_v12, %v2656_v48  ;;  %v2659_v47 = vsel %vm2619_vm12, %v2591_v25, 0.0  ;;  %v2764_v4 = vsel %vm2619_vm12, %v2727_v57, 0.0 }
 0x1f8   : > { %v3206_v56 = vpop.f32.mrf.mxu0  ;;  %2627 = vst.msk [vmem:[%s5081_s24 + $0x38] sm:$0xff] %vm2619_vm12, %v2594_v46  ;;  %v2592_v44 = vadd.f32 %v5075_v37, %v2553_v7  ;;  %v2759_v16 = vadd.f32 %v2758_v35, %v2757_v54  ;;  %v2760_v33 = vsel %vm2619_vm12, %v2725_v53, 0.0  ;;  %v2728_v2 = vmul.f32 %v2594_v46, %v2594_v46  ;;  %v2529_v53 = vld [vmem:[%s5069_s20 + $0x68] sm:$0xff] }
 0x1f9   : > { %v2660_v26 = vadd.f32 %v2659_v47, %v2658_v52  ;;  %v2558_v50 = vadd.f32 %v3206_v56, %v2526_v6  ;;  %v2665_v39 = vsel %vm2619_vm12, %v2594_v46, 0.0 }
 0x1fa   : > { %v2421_v18 = vpop.f32.mrf.mxu0  ;;  %2625 = vst.msk [vmem:[%s5081_s24 + $0x28] sm:$0xff] %vm2619_vm12, %v2592_v44  ;;  %v2661_v43 = vsel %vm2619_vm12, %v2592_v44, 0.0  ;;  %v2726_v11 = vmul.f32 %v2592_v44, %v2592_v44  ;;  %v2761_v60 = vadd.f32 %v2760_v33, %v2759_v16  ;;  %v2766_v55 = vsel %vm2619_vm12, %v2728_v2, 0.0  ;;  %v2534_v16 = vld [vmem:[%s5069_s20 + $0x90] sm:$0xff] }
 0x1fb   : > { %v2556_v0 = vadd.f32 %v2524_v17, %v2421_v18  ;;  %v2662_v31 = vadd.f32 %v2661_v43, %v2660_v26  ;;  %v2597_v20 = vadd.f32 %v5075_v37, %v2558_v50 }
 0x1fc   : > { %v3207_v22 = vpop.f32.mrf.mxu0  ;;  %v2762_v30 = vsel %vm2619_vm12, %v2726_v11, 0.0  ;;  %v2532_v11 = vld [vmem:[%s5069_s20 + $0x80] sm:$0xff] }
 0x1fd   : > { %v2595_v10 = vadd.f32 %v5075_v37, %v2556_v0  ;;  %v2559_v51 = vadd.f32 %v3207_v22, %v2527_v63  ;;  %v2763_v40 = vadd.f32 %v2762_v30, %v2761_v60  ;;  %2630 = vst.msk [vmem:[%s5081_s24 + $0x50] sm:$0xff] %vm2619_vm12, %v2597_v20  ;;  %v2664_v32 = vadd.f32 %v2663_v59, %v2662_v31  ;;  %v2535_v59 = vld [vmem:[%s5069_s20 + $0x98] sm:$0xff] }
 0x1fe   : > { %v2424_v1 = vpop.f32.mrf.mxu0  ;;  %v2731_v46 = vmul.f32 %v2597_v20, %v2597_v20  ;;  %v2671_v52 = vsel %vm2619_vm12, %v2597_v20, 0.0 }
 0x1ff   : > { %2628 = vst.msk [vmem:[%s5081_s24 + $0x40] sm:$0xff] %vm2619_vm12, %v2595_v10  ;;  %v2598_v41 = vadd.f32 %v5075_v37, %v2559_v51  ;;  %v2557_v19 = vadd.f32 %v2525_v15, %v2424_v1  ;;  %v2765_v14 = vadd.f32 %v2764_v4, %v2763_v40  ;;  %v2729_v42 = vmul.f32 %v2595_v10, %v2595_v10  ;;  %v2533_v4 = vld [vmem:[%s5069_s20 + $0x88] sm:$0xff] }
 0x200   : > { %v2666_v29 = vadd.f32 %v2665_v39, %v2664_v32  ;;  %v2667_v38 = vsel %vm2619_vm12, %v2595_v10, 0.0  ;;  %v2772_v35 = vsel %vm2619_vm12, %v2731_v46, 0.0 }
 0x201   : > { %2631 = vst.msk [vmem:[%s5081_s24 + $0x58] sm:$0xff] %vm2619_vm12, %v2598_v41  ;;  %v2596_v13 = vadd.f32 %v5075_v37, %v2557_v19  ;;  %v2767_v58 = vadd.f32 %v2766_v55, %v2765_v14  ;;  %v2768_v45 = vsel %vm2619_vm12, %v2729_v42, 0.0  ;;  %v2732_v47 = vmul.f32 %v2598_v41, %v2598_v41 }
 0x202   : > { %v2668_v3 = vadd.f32 %v2667_v38, %v2666_v29  ;;  %v2673_v18 = vsel %vm2619_vm12, %v2598_v41, 0.0 }
 0x203   : > { %2629 = vst.msk [vmem:[%s5081_s24 + $0x48] sm:$0xff] %vm2619_vm12, %v2596_v13  ;;  %v2730_v28 = vmul.f32 %v2596_v13, %v2596_v13  ;;  %v2669_v21 = vsel %vm2619_vm12, %v2596_v13, 0.0  ;;  %v2769_v9 = vadd.f32 %v2768_v45, %v2767_v58  ;;  %v2774_v60 = vsel %vm2619_vm12, %v2732_v47, 0.0  ;;  %v2538_v58 = vld [vmem:[%s5069_s20 + $0xb0] sm:$0xff] }
 0x204   : > { %v3210_v61 = vpop.f32.mrf.mxu0  ;;  %v2670_v48 = vadd.f32 %v2669_v21, %v2668_v3  ;;  %v2536_v3 = vld [vmem:[%s5069_s20 + $0xa0] sm:$0xff] }
 0x205   : > { %v2562_v24 = vadd.f32 %v3210_v61, %v2530_v49  ;;  %v2770_v27 = vsel %vm2619_vm12, %v2730_v28, 0.0 }
 0x206   : > { %v2437_v25 = vpop.f32.mrf.mxu0  ;;  %v2771_v6 = vadd.f32 %v2770_v27, %v2769_v9  ;;  %v2672_v17 = vadd.f32 %v2671_v52, %v2670_v48 }
 0x207   : > { %v2601_v36 = vadd.f32 %v5075_v37, %v2562_v24  ;;  %v2560_v23 = vadd.f32 %v2528_v5, %v2437_v25 }
 0x208   : > { %v3211_v8 = vpop.f32.mrf.mxu0  ;;  %v2773_v50 = vadd.f32 %v2772_v35, %v2771_v6  ;;  %v2674_v0 = vadd.f32 %v2673_v18, %v2672_v17  ;;  %v2537_v35 = vld [vmem:[%s5069_s20 + $0xa8] sm:$0xff] }
 0x209   : > { %2634 = vst.msk [vmem:[%s5081_s24 + $0x70] sm:$0xff] %vm2619_vm12, %v2601_v36  ;;  %v2599_v62 = vadd.f32 %v5075_v37, %v2560_v23  ;;  %v2563_v12 = vadd.f32 %v3211_v8, %v2531_v34  ;;  %v2735_v2 = vmul.f32 %v2601_v36, %v2601_v36  ;;  %v2679_v42 = vsel %vm2619_vm12, %v2601_v36, 0.0 }
 0x20a   : > { %v2440_v7 = vpop.f32.mrf.mxu0  ;;  %v2775_v30 = vadd.f32 %v2774_v60, %v2773_v50  ;;  %v2542_v60 = vld [vmem:[%s5069_s20 + $0xd0] sm:$0xff] }
 0x20b   : > { %2632 = vst.msk [vmem:[%s5081_s24 + $0x60] sm:$0xff] %vm2619_vm12, %v2599_v62  ;;  %v2602_v54 = vadd.f32 %v5075_v37, %v2563_v12  ;;  %v2561_v56 = vadd.f32 %v2529_v53, %v2440_v7  ;;  %v2733_v44 = vmul.f32 %v2599_v62, %v2599_v62  ;;  %v2675_v63 = vsel %vm2619_vm12, %v2599_v62, 0.0  ;;  %v2539_v7 = vld [vmem:[%s5069_s20 + $0xb8] sm:$0xff] }
 0x20c   : > { %v2676_v15 = vadd.f32 %v2675_v63, %v2674_v0  ;;  %v2780_v38 = vsel %vm2619_vm12, %v2735_v2, 0.0 }
 0x20d   : > { %2635 = vst.msk [vmem:[%s5081_s24 + $0x78] sm:$0xff] %vm2619_vm12, %v2602_v54  ;;  %v2600_v26 = vadd.f32 %v5075_v37, %v2561_v56  ;;  %v2776_v31 = vsel %vm2619_vm12, %v2733_v44, 0.0  ;;  %v2736_v28 = vmul.f32 %v2602_v54, %v2602_v54  ;;  %v2681_v45 = vsel %vm2619_vm12, %v2602_v54, 0.0 }
 0x20e   : > { %v2777_v32 = vadd.f32 %v2776_v31, %v2775_v30 }
 0x20f   : > { %2633 = vst.msk [vmem:[%s5081_s24 + $0x68] sm:$0xff] %vm2619_vm12, %v2600_v26  ;;  %v2734_v33 = vmul.f32 %v2600_v26, %v2600_v26  ;;  %v2677_v20 = vsel %vm2619_vm12, %v2600_v26, 0.0  ;;  %v2782_v27 = vsel %vm2619_vm12, %v2736_v28, 0.0 }
 0x210   : > { %v3214_v43 = vpop.f32.mrf.mxu1  ;;  %v2678_v41 = vadd.f32 %v2677_v20, %v2676_v15 }
 0x211   : > { %v2566_v57 = vadd.f32 %v3214_v43, %v2534_v16  ;;  %v2778_v40 = vsel %vm2619_vm12, %v2734_v33, 0.0 }
 0x212   : > { %v2453_v22 = vpop.f32.mrf.mxu1  ;;  %v2779_v39 = vadd.f32 %v2778_v40, %v2777_v32  ;;  %v2680_v55 = vadd.f32 %v2679_v42, %v2678_v41 }
 0x213   : > { %v2605_v10 = vadd.f32 %v5075_v37, %v2566_v57  ;;  %v2564_v51 = vadd.f32 %v2532_v11, %v2453_v22 }
 0x214   : > { %v3215_v1 = vpop.f32.mrf.mxu1  ;;  %v2781_v24 = vadd.f32 %v2780_v38, %v2779_v39  ;;  %v2682_v36 = vadd.f32 %v2681_v45, %v2680_v55  ;;  %v2541_v38 = vld [vmem:[%s5069_s20 + $0xc8] sm:$0xff] }
 0x215   : > { %2638 = vst.msk [vmem:[%s5081_s24 + $0x90] sm:$0xff] %vm2619_vm12, %v2605_v10  ;;  %v2603_v19 = vadd.f32 %v5075_v37, %v2564_v51  ;;  %v2567_v14 = vadd.f32 %v3215_v1, %v2535_v59  ;;  %v2739_v47 = vmul.f32 %v2605_v10, %v2605_v10  ;;  %v2687_v50 = vsel %vm2619_vm12, %v2605_v10, 0.0  ;;  %v2540_v10 = vld [vmem:[%s5069_s20 + $0xc0] sm:$0xff] }
 0x216   : > { %v2456_v13 = vpop.f32.mrf.mxu1  ;;  %v2783_v12 = vadd.f32 %v2782_v27, %v2781_v24 }
 0x217   : > { %2636 = vst.msk [vmem:[%s5081_s24 + $0x80] sm:$0xff] %vm2619_vm12, %v2603_v19  ;;  %v2606_v49 = vadd.f32 %v5075_v37, %v2567_v14  ;;  %v2565_v29 = vadd.f32 %v2533_v4, %v2456_v13  ;;  %v2737_v61 = vmul.f32 %v2603_v19, %v2603_v19  ;;  %v2683_v21 = vsel %vm2619_vm12, %v2603_v19, 0.0  ;;  %v2543_v13 = vld [vmem:[%s5069_s20 + $0xd8] sm:$0xff] }
 0x218   : > { %v2684_v62 = vadd.f32 %v2683_v21, %v2682_v36  ;;  %v2788_v43 = vsel %vm2619_vm12, %v2739_v47, 0.0 }
 0x219   : > { %2639 = vst.msk [vmem:[%s5081_s24 + $0x98] sm:$0xff] %vm2619_vm12, %v2606_v49  ;;  %v2604_v5 = vadd.f32 %v5075_v37, %v2565_v29  ;;  %v2784_v8 = vsel %vm2619_vm12, %v2737_v61, 0.0  ;;  %v2740_v11 = vmul.f32 %v2606_v49, %v2606_v49  ;;  %v2689_v20 = vsel %vm2619_vm12, %v2606_v49, 0.0 }
 0x21a   : > { %v2785_v52 = vadd.f32 %v2784_v8, %v2783_v12 }
 0x21b   : > { %2637 = vst.msk [vmem:[%s5081_s24 + $0x88] sm:$0xff] %vm2619_vm12, %v2604_v5  ;;  %v2738_v25 = vmul.f32 %v2604_v5, %v2604_v5  ;;  %v2685_v9 = vsel %vm2619_vm12, %v2604_v5, 0.0  ;;  %v2790_v40 = vsel %vm2619_vm12, %v2740_v11, 0.0 }
 0x21c   : > { %v3218_v34 = vpop.f32.mrf.mxu1  ;;  %v2686_v56 = vadd.f32 %v2685_v9, %v2684_v62 }
 0x21d   : > { %v2570_v23 = vadd.f32 %v3218_v34, %v2538_v58  ;;  %v2786_v6 = vsel %vm2619_vm12, %v2738_v25, 0.0 }
 0x21e   : > { %v2469_v48 = vpop.f32.mrf.mxu1  ;;  %v2787_v16 = vadd.f32 %v2786_v6, %v2785_v52  ;;  %v2688_v33 = vadd.f32 %v2687_v50, %v2686_v56  ;;  %v2547_v50 = vld [vmem:[%s5069_s20 + $0xf8] sm:$0xff] }
 0x21f   : > { %v2609_v53 = vadd.f32 %v5075_v37, %v2570_v23  ;;  %v2568_v46 = vadd.f32 %v2536_v3, %v2469_v48 }
 0x220   : > { %v3219_v54 = vpop.f32.mrf.mxu1  ;;  %v2789_v31 = vadd.f32 %v2788_v43, %v2787_v16  ;;  %v2690_v51 = vadd.f32 %v2689_v20, %v2688_v33 }
 0x221   : > { %2642 = vst.msk [vmem:[%s5081_s24 + $0xb0] sm:$0xff] %vm2619_vm12, %v2609_v53  ;;  %v2607_v17 = vadd.f32 %v5075_v37, %v2568_v46  ;;  %v2571_v44 = vadd.f32 %v3219_v54, %v2539_v7  ;;  %v2743_v28 = vmul.f32 %v2609_v53, %v2609_v53  ;;  %v2695_v24 = vsel %vm2619_vm12, %v2609_v53, 0.0  ;;  %v2546_v7 = vld [vmem:[%s5069_s20 + $0xf0] sm:$0xff] }
 0x222   : > { %v2472_v26 = vpop.f32.mrf.mxu1  ;;  %v2791_v4 = vadd.f32 %v2790_v40, %v2789_v31  ;;  %v2545_v31 = vld [vmem:[%s5069_s20 + $0xe8] sm:$0xff] }
 0x223   : > { %2640 = vst.msk [vmem:[%s5081_s24 + $0xa0] sm:$0xff] %vm2619_vm12, %v2607_v17  ;;  %v2610_v18 = vadd.f32 %v5075_v37, %v2571_v44  ;;  %v2569_v63 = vadd.f32 %v2537_v35, %v2472_v26  ;;  %v2741_v0 = vmul.f32 %v2607_v17, %v2607_v17  ;;  %v2691_v22 = vsel %vm2619_vm12, %v2607_v17, 0.0  ;;  %v2544_v17 = vld [vmem:[%s5069_s20 + $0xe0] sm:$0xff] }
 0x224   : > { %v2692_v19 = vadd.f32 %v2691_v22, %v2690_v51  ;;  %v2796_v34 = vsel %vm2619_vm12, %v2743_v28, 0.0 }
 0x225   : > { %2643 = vst.msk [vmem:[%s5081_s24 + $0xb8] sm:$0xff] %vm2619_vm12, %v2610_v18  ;;  %v2608_v57 = vadd.f32 %v5075_v37, %v2569_v63  ;;  %v2792_v1 = vsel %vm2619_vm12, %v2741_v0, 0.0  ;;  %v2744_v3 = vmul.f32 %v2610_v18, %v2610_v18  ;;  %v2697_v8 = vsel %vm2619_vm12, %v2610_v18, 0.0 }
 0x226   : > { %v2793_v49 = vadd.f32 %v2792_v1, %v2791_v4 }
 0x227   : > { %2641 = vst.msk [vmem:[%s5081_s24 + $0xa8] sm:$0xff] %vm2619_vm12, %v2608_v57  ;;  %v2742_v15 = vmul.f32 %v2608_v57, %v2608_v57  ;;  %v2693_v32 = vsel %vm2619_vm12, %v2608_v57, 0.0  ;;  %v2798_v12 = vsel %vm2619_vm12, %v2744_v3, 0.0 }
 0x228   : > { %v3222_v30 = vpop.f32.mrf.mxu1  ;;  %v2694_v29 = vadd.f32 %v2693_v32, %v2692_v19 }
 0x229   : > { %v2574_v59 = vadd.f32 %v3222_v30, %v2542_v60  ;;  %v2794_v39 = vsel %vm2619_vm12, %v2742_v15, 0.0 }
 0x22a   : > { %v2485_v41 = vpop.f32.mrf.mxu1  ;;  %v2795_v58 = vadd.f32 %v2794_v39, %v2793_v49  ;;  %v2696_v25 = vadd.f32 %v2695_v24, %v2694_v29 }
 0x22b   : > { %v2613_v2 = vadd.f32 %v5075_v37, %v2574_v59  ;;  %v2572_v14 = vadd.f32 %v2540_v10, %v2485_v41 }
 0x22c   : > { %v3223_v42 = vpop.f32.mrf.mxu1  ;;  %v2797_v27 = vadd.f32 %v2796_v34, %v2795_v58  ;;  %v2698_v62 = vadd.f32 %v2697_v8, %v2696_v25 }
 0x22d   : > { %2646 = vst.msk [vmem:[%s5081_s24 + $0xd0] sm:$0xff] %vm2619_vm12, %v2613_v2  ;;  %v2611_v55 = vadd.f32 %v5075_v37, %v2572_v14  ;;  %v2575_v61 = vadd.f32 %v3223_v42, %v2543_v13  ;;  %v2747_v26 = vmul.f32 %v2613_v2, %v2613_v2  ;;  %v2703_v43 = vsel %vm2619_vm12, %v2613_v2, 0.0 }
 0x22e   : > { %v2488_v5 = vpop.f32.mrf.mxu1  ;;  %v2799_v54 = vadd.f32 %v2798_v12, %v2797_v27 }
 0x22f   : > { %2644 = vst.msk [vmem:[%s5081_s24 + $0xc0] sm:$0xff] %vm2619_vm12, %v2611_v55  ;;  %v2614_v45 = vadd.f32 %v5075_v37, %v2575_v61  ;;  %v2573_v21 = vadd.f32 %v2541_v38, %v2488_v5  ;;  %v2745_v36 = vmul.f32 %v2611_v55, %v2611_v55  ;;  %v2699_v9 = vsel %vm2619_vm12, %v2611_v55, 0.0 }
 0x230   : > { %v2700_v6 = vadd.f32 %v2699_v9, %v2698_v62  ;;  %v2804_v20 = vsel %vm2619_vm12, %v2747_v26, 0.0 }
 0x231   : > { %2647 = vst.msk [vmem:[%s5081_s24 + $0xd8] sm:$0xff] %vm2619_vm12, %v2614_v45  ;;  %v2612_v23 = vadd.f32 %v5075_v37, %v2573_v21  ;;  %v2800_v53 = vsel %vm2619_vm12, %v2745_v36, 0.0  ;;  %v2748_v22 = vmul.f32 %v2614_v45, %v2614_v45  ;;  %v2705_v59 = vsel %vm2619_vm12, %v2614_v45, 0.0 }
 0x232   : > { %v2801_v35 = vadd.f32 %v2800_v53, %v2799_v54 }
 0x233   : > { %2645 = vst.msk [vmem:[%s5081_s24 + $0xc8] sm:$0xff] %vm2619_vm12, %v2612_v23  ;;  %v2746_v48 = vmul.f32 %v2612_v23, %v2612_v23  ;;  %v2701_v46 = vsel %vm2619_vm12, %v2612_v23, 0.0  ;;  %v2806_v41 = vsel %vm2619_vm12, %v2748_v22, 0.0 }
 0x234   : > { %v2702_v47 = vadd.f32 %v2701_v46, %v2700_v6 }
 0x235   : > { %v2802_v52 = vsel %vm2619_vm12, %v2746_v48, 0.0 }
 0x236   : > { %v2803_v18 = vadd.f32 %v2802_v52, %v2801_v35  ;;  %v2704_v0 = vadd.f32 %v2703_v43, %v2702_v47 }
 0x238   : > { %v3226_v56 = vpop.f32.mrf.mxu1  ;;  %v2805_v30 = vadd.f32 %v2804_v20, %v2803_v18  ;;  %v2706_v32 = vadd.f32 %v2705_v59, %v2704_v0 }
 0x239   : > { %v2578_v44 = vadd.f32 %v3226_v56, %v2546_v7 }
 0x23a   : > { %v2501_v16 = vpop.f32.mrf.mxu1  ;;  %v2807_v14 = vadd.f32 %v2806_v41, %v2805_v30 }
 0x23b   : > { %v2617_v63 = vadd.f32 %v5075_v37, %v2578_v44  ;;  %v2576_v33 = vadd.f32 %v2544_v17, %v2501_v16 }
 0x23c   : > { %v3227_v11 = vpop.f32.mrf.mxu1 }
 0x23d   : > { %2650 = vst.msk [vmem:[%s5081_s24 + $0xf0] sm:$0xff] %vm2619_vm12, %v2617_v63  ;;  %v2615_v57 = vadd.f32 %v5075_v37, %v2576_v33  ;;  %v2579_v60 = vadd.f32 %v3227_v11, %v2547_v50  ;;  %v2751_v13 = vmul.f32 %v2617_v63, %v2617_v63  ;;  %v2711_v55 = vsel %vm2619_vm12, %v2617_v63, 0.0 }
 0x23e   : > { %v2504_v15 = vpop.f32.mrf.mxu1 }
 0x23f   : > { %2648 = vst.msk [vmem:[%s5081_s24 + $0xe0] sm:$0xff] %vm2619_vm12, %v2615_v57  ;;  %v2749_v10 = vmul.f32 %v2615_v57, %v2615_v57  ;;  %v2618_v51 = vadd.f32 %v5075_v37, %v2579_v60  ;;  %v2707_v40 = vsel %vm2619_vm12, %v2615_v57, 0.0  ;;  %v2577_v1 = vadd.f32 %v2545_v31, %v2504_v15 }
 0x240   : > { %v2708_v2 = vadd.f32 %v2707_v40, %v2706_v32 }
 0x241   : > { %2651 = vst.msk [vmem:[%s5081_s24 + $0xf8] sm:$0xff] %vm2619_vm12, %v2618_v51  ;;  %v2808_v19 = vsel %vm2619_vm12, %v2749_v10, 0.0  ;;  %v2616_v4 = vadd.f32 %v5075_v37, %v2577_v1  ;;  %v2752_v38 = vmul.f32 %v2618_v51, %v2618_v51  ;;  %v2812_v37 = vsel %vm2619_vm12, %v2751_v13, 0.0 }
 0x242   : > { %v2809_v49 = vadd.f32 %v2808_v19, %v2807_v14  ;;  %v2713_v58 = vsel %vm2619_vm12, %v2618_v51, 0.0 }
 0x243   : > { %2649 = vst.msk [vmem:[%s5081_s24 + $0xe8] sm:$0xff] %vm2619_vm12, %v2616_v4  ;;  %v2709_v39 = vsel %vm2619_vm12, %v2616_v4, 0.0  ;;  %v2750_v42 = vmul.f32 %v2616_v4, %v2616_v4  ;;  %v2814_v21 = vsel %vm2619_vm12, %v2752_v38, 0.0  ;;  %s3310_s24 = scalar_lea.vmem %s3309_s23, 64 }
 0x244   : > { %v2710_v29 = vadd.f32 %v2709_v39, %v2708_v2  ;;  %p3312_p2 = scmp.lt.s32.totalorder %s3310_s24, %s3304_s19 }
 0x245   : > { %v2810_v28 = vsel %vm2619_vm12, %v2750_v42, 0.0 }
 0x246   : > { %v2712_v61 = vadd.f32 %v2711_v55, %v2710_v29  ;;  %v2811_v5 = vadd.f32 %v2810_v28, %v2809_v49  ;;  %p3313_p3 = por %p3312_p2, %p3311_p1 }
 0x248   : > { %v2714_v24 = vadd.f32 %v2713_v58, %v2712_v61  ;;  %v2813_v45 = vadd.f32 %v2812_v37, %v2811_v5  ;;  %p3314_p5 = pnand %p3313_p3, %p3307_p0 }
 0x24a   : > { %v2715_v25 = vrot.slane %v2714_v24, 4  ;;  %v2815_v34 = vadd.f32 %v2814_v21, %v2813_v45 }
 0x24c   : > { %v2716_v3 = vadd.f32 %v2715_v25, %v2714_v24  ;;  %v2816_v36 = vrot.slane %v2815_v34, 4 }
 0x24e   : > { %v2717_v23 = vrot.slane %v2716_v3, 2  ;;  %v2817_v27 = vadd.f32 %v2816_v36, %v2815_v34 }
 0x250   : > { %v2718_v8 = vadd.f32 %v2717_v23, %v2716_v3  ;;  %v2818_v9 = vrot.slane %v2817_v27, 2 }
 0x252   : > { %v2719_v48 = vrot.slane %v2718_v8, 1  ;;  %v2819_v62 = vadd.f32 %v2818_v9, %v2817_v27 }
 0x254   : > { %v2820_v12 = vrot.slane %v2819_v62, 1  ;;  %v2720_v53 = vadd.f32 %v2719_v48, %v2718_v8 }
 0x256   : > { %v2821_v46 = vadd.f32 %v2820_v12, %v2819_v62 }
 0x258   : > { %v2823_v7 = vsel %vm2822_vm13, %v2720_v53, %v2821_v46 }
 0x259   : > { %2825 = vst.msk [vmem:[%s418_s14] sm:$0x3] %vm2824_vm14, %v2823_v7 }
 0x25a   : > { %3317 = shalt.err (!%p3314_p5)
}
 0x25b   : > { %s3318_s12 = scalar_lea.hbm %s5278_s21, 32  ;;  %s3322_s14 = scalar_lea.hbm %s5326_s8, 64 }
 0x25c   : > { %p3319_p6 = scmp.ne.s32.totalorder %s5278_s21, %s3318_s12  ;;  %p3323_p10 = scmp.lt.s32.totalorder %s5278_s21, %s5326_s8 }
 0x25d   : > { %p3324_p11 = scmp.lt.s32.totalorder %s3322_s14, %s3318_s12 }
 0x25e   : > { %p3320_p7 = pnand %p3319_p6, %p3472_p4 }
 0x25f   : > { %p3325_p12 = por %p3324_p11, %p3323_p10 }
 0x260   : > { %p3321_p9 = pneg %p3320_p7 }
 0x262   : > { %p3326_p13 = pnand %p3325_p12, %p3321_p9 }
 0x264   : > { %3329 = shalt.err (!%p3326_p13)
}
 0x265   : > { %3240 = dma.vmem_to_hbm [thread:$0]  (%p3472_p4), %s2856_s26, 32, %s5278_s21, %s2837_s22  }
 0x266 PF: > { %p3246_p0 = scmp.ge.s32.totalorder %s3380_s10, 2  ;;  %s2880_s19 = sand.u32 1, %s3360_s27  }
 0x267   : > { %s2881_s30 = scalar_lea.sflag [#allocation3], %s2880_s19 }
 0x268   : > { %p3243_p1 = pnand %p3246_p0, %p3479_p8 }
 0x26a   : > { %p3244_p2 = pneg %p3243_p1 }
 0x26c   : > { %3355 = dma.done.wait (%p3244_p2), %s2881_s30, 32  }
 0x26d   : > { %3357 = vsyncadd (%p3244_p2), %s2881_s30, 4294967264  ;;  %s22_s10 = sadd.s32 1, %s3380_s10   ;;  %s5591_s27 = smov %s3364_s28 }
 0x26e   : > { %p19_p3 = scmp.ge.s32.totalorder %s22_s10, 4   ;;  %s5592_s28 = smov %s3368_s29 }
 0x26f   : > { %s5593_s29 = smov %s3485_s18  ;;  %s5594_s30 = smov %s3376_s9 }
 0x270   : > { %s5595_s9 = smov %s5597_s13  ;;  %21 = sbr.rel (!%p19_p3) target bundleno = 4 (0x4), region = 104 }
 0x275   :  { %2886 = vsyncpa [#allocation3], 1 }
 0x276   :  { %2888 = vsyncpa [#allocation3 + $0x1], 1 }

</bundles_post_ra>
